<compile_context>
chip_gen: v7x
topology: tpu7x:2x2x1
jax: 0.10.0
libtpu: 0.0.40
codegen_flags: <defaults>
</compile_context>

<pallas_src>
import jax
import jax.numpy as jnp
from jax.experimental import pallas as pl
from jax.experimental.pallas import tpu as pltpu

_BP = 8  # batch rows padded to one full sublane tile (min tile is 8 anyway)


# ------------------------------- fused kernel ------------------------------- #

def _make_kernel(H, W, C, O, B):
    """Builds the per-branch-step kernel body (grid = (2,) over the two subnets)."""
    WC = W * C              # lanes of one input row: (w, c)
    K1 = (W + 2) * C        # one kh tap incl. zero halo
    WO = W * O              # conv output lanes: (w, o)

    def kernel(x_ref, wc_ref, bc_ref, wfc_ref, bfc_ref, w1_ref, b1_ref, w2_ref,
               b2_ref, out_ref, lhs_ref, flat_ref, acc_ref):
        step = pl.program_id(0)                  # 0 -> subcnn1, 1 -> subcnn2
        BP = lhs_ref.shape[1]
        K3P = lhs_ref.shape[2]

        # One-time zero fill: provides the conv spatial halo, the batch padding
        # (sublanes B..BP-1) and the K padding (lanes 3*K1..K3P-1).  The data
        # windows written below are identical on both steps, so the zeros stay
        # valid on step 1 without refilling.
        @pl.when(step == 0)
        def _():
            lhs_ref[...] = jnp.zeros_like(lhs_ref)

        # im2col: three static block stores (one per kh tap); rows are (h, b),
        # lanes are (kh, w_pad, c).
        for kh in range(3):
            r0 = max(0, kh - 1)          # first valid input row for this tap
            r1 = min(H, kh + H - 1)      # one past the last valid input row
            h0 = r0 - kh + 1             # output row receiving input row r0
            n = r1 - r0
            lhs_ref[h0:h0 + n, 0:B, kh * K1 + C:kh * K1 + C + WC] = x_ref[r0:r1, :, :]

        # 3x3 same-conv + bias + ReLU as ONE (H*BP, K3P) @ (K3P, W*O) MXU matmul.
        lhs = lhs_ref[...].reshape(H * BP, K3P).astype(jnp.bfloat16)
        conv = jnp.dot(lhs, wc_ref[...], preferred_element_type=jnp.float32)
        conv = jnp.maximum(conv + bc_ref[...], 0.0)        # rows (h, b), lanes (w, o)

        # Relayout rows (h, b) -> lanes (h, w, o) with H aligned one-vreg copies,
        # then ONE (BP, H*W*O) @ (H*W*O, F) matmul replaces H small K=W*O matmuls
        # plus H-1 dependent accumulator adds.
        for h in range(H):
            flat_ref[:, h * WO:(h + 1) * WO] = conv[h * BP:(h + 1) * BP, :]
        res = jnp.maximum(
            jnp.dot(flat_ref[...].astype(jnp.bfloat16), wfc_ref[...],
                    preferred_element_type=jnp.float32) + bfc_ref[...], 0.0)

        # Head partial: this branch's features against its half of fc1 -> the
        # 1024-wide concat never materializes.  Accumulate across the two steps.
        part = jnp.dot(res.astype(jnp.bfloat16), w1_ref[...],
                       preferred_element_type=jnp.float32)          # (BP, 1024)

        @pl.when(step == 0)
        def _():
            acc_ref[...] = part

        @pl.when(step == pl.num_programs(0) - 1)
        def _():
            hmid = acc_ref[...] + part + b1_ref[...]
            logits = jnp.dot(hmid.astype(jnp.bfloat16), w2_ref[...],
                             preferred_element_type=jnp.float32) + b2_ref[...]
            out_ref[...] = logits[0:out_ref.shape[0], :].astype(out_ref.dtype)

    return kernel


# --------------------------------- wrapper ---------------------------------- #

def net_forward(ts1, ts2, kp):
    """Fused forward pass.  ts1/ts2 are PyTorch-style NCHW; kp = prepare_params(...)."""
    B, C, H, W = ts1.shape
    assert B <= _BP, "this path packs the batch into one 8-row sublane tile"
    WC = W * C
    # Tiny layout glue on the ~8 KiB inputs: branch-major stack, rows (h, b), lanes (w, c).
    x = jnp.stack([
        jnp.transpose(ts1, (2, 0, 3, 1)).reshape(H, B, WC),
        jnp.transpose(ts2, (2, 0, 3, 1)).reshape(H, B, WC)])

    K3P, WO = kp["wconv"].shape[1], kp["wconv"].shape[2]
    F = kp["wfc"].shape[2]
    NH = kp["w1"].shape[2]
    NOUT = kp["w2"].shape[1]
    O = WO // W

    grid_spec = pltpu.PrefetchScalarGridSpec(
        num_scalar_prefetch=0,
        grid=(2,),                                    # one step per subnet branch
        in_specs=[
            pl.BlockSpec((None, H, B, WC), lambda b: (b, 0, 0, 0)),   # inputs
            pl.BlockSpec((None, K3P, WO), lambda b: (b, 0, 0)),       # conv matrix
            pl.BlockSpec((None, 1, WO), lambda b: (b, 0, 0)),         # conv bias
            pl.BlockSpec((None, H * WO, F), lambda b: (b, 0, 0)),     # flat FC weight
            pl.BlockSpec((None, 1, F), lambda b: (b, 0, 0)),          # FC bias
            pl.BlockSpec((None, F, NH), lambda b: (b, 0, 0)),         # fc1 half
            pl.BlockSpec((1, NH), lambda b: (0, 0)),                  # b1 (invariant)
            pl.BlockSpec((NH, NOUT), lambda b: (0, 0)),               # w2 (invariant)
            pl.BlockSpec((1, NOUT), lambda b: (0, 0)),                # b2 (invariant)
        ],
        out_specs=pl.BlockSpec((B, NOUT), lambda b: (0, 0)),
        scratch_shapes=[
            pltpu.VMEM((H, _BP, K3P), jnp.float32),   # im2col (zeros = halo/padding)
            pltpu.VMEM((_BP, H * WO), jnp.float32),   # flattened conv activations
            pltpu.VMEM((_BP, NH), jnp.float32),       # fc1 accumulator across branches
        ],
    )

    return pl.pallas_call(
        _make_kernel(H, W, C, O, B),
        out_shape=jax.ShapeDtypeStruct((B, NOUT), jnp.float32),
        grid_spec=grid_spec,
        compiler_params=pltpu.CompilerParams(
            dimension_semantics=("arbitrary",),       # branch axis carries the accumulator
            vmem_limit_bytes=16 * 1024 * 1024,        # ~7 MiB resident; safe on v5e/v6e/v7x
        ),
    )(x, kp["wconv"], kp["bconv"], kp["wfc"], kp["bfc"],
      kp["w1"], kp["b1"], kp["w2"], kp["b2"])


# ---------------------- parameter init & preprocessing ---------------------- #

def make_net_params(key, in_ch, h, w, conv_out_ch=8, feat_dim=512):
    """PyTorch-layout parameters (Linear weights are (out, in); conv is OIHW)."""
    def subnet_params(k):
        k1, k2, k3, k4 = jax.random.split(k, 4)
        fan_conv = in_ch * 9
        fan_fc = conv_out_ch * h * w
        return dict(
            wconv=jax.random.normal(k1, (conv_out_ch, in_ch, 3, 3), jnp.float32)
            * (1.0 / fan_conv ** 0.5),
            bconv=jax.random.normal(k2, (conv_out_ch,), jnp.float32) * 0.01,
            wfc=jax.random.normal(k3, (feat_dim, fan_fc), jnp.float32)
            * (1.0 / fan_fc ** 0.5),
            bfc=jax.random.normal(k4, (feat_dim,), jnp.float32) * 0.01,
        )

    k1, k2, k3, k4, k5, k6 = jax.random.split(key, 6)
    return dict(
        subcnn1=subnet_params(k1),
        subcnn2=subnet_params(k2),
        w1=jax.random.normal(k3, (1024, 1024), jnp.float32) * (1.0 / 1024 ** 0.5),
        b1=jax.random.normal(k4, (1024,), jnp.float32) * 0.01,
        w2=jax.random.normal(k5, (2, 1024), jnp.float32) * (1.0 / 1024 ** 0.5),
        b2=jax.random.normal(k6, (2,), jnp.float32) * 0.01,
    )


def _conv_as_matrix(wconv, w):
    """PyTorch OIHW 3x3 conv weight -> (3*(w+2)*C, w*O) matrix.

    With an im2col LHS whose columns are (kh, w_pad, c) (w_pad includes the zero
    halo), lhs @ matrix evaluates the whole padded convolution for a full row of
    output pixels in one MXU matmul; output lanes are ordered (w, o).
    """
    O, C, KH, KW = wconv.shape
    blocks = []
    for kh in range(KH):
        blk = jnp.zeros(((w + 2) * C, w * O), jnp.float32)
        for kw in range(KW):
            sel = jnp.eye(w + 2, w, k=-kw, dtype=jnp.float32)   # w_pad == w_out + kw
            blk = blk + jnp.kron(sel, wconv[:, :, kh, kw].T.astype(jnp.float32))
        blocks.append(blk)
    return jnp.concatenate(blocks, axis=0)


def prepare_params(params, h, w):
    """One-time conversion of PyTorch-layout params to kernel layouts.

    Hoists every transpose/reshape/cast/pad out of the forward pass: conv weights
    become a single matmul operand (K padded to whole lane tiles), the subnet FC
    weight is stored flat as (h*w*o, F) with rows permuted from PyTorch's
    channels-first flatten order (o, h, w) to the kernel's (h, w, o) order, fc1
    is pre-split into its res1/res2 halves, and all large weights are bf16
    (accumulation stays f32 in-kernel).  Per-branch tensors are stacked on a
    leading branch axis so the grid can stream them.
    """
    def prep_subnet(p):
        O, C = p["wconv"].shape[0], p["wconv"].shape[1]
        F = p["wfc"].shape[0]
        K3 = 3 * (w + 2) * C
        K3P = ((K3 + 127) // 128) * 128                     # pad conv K to lane tiles
        mat = jnp.pad(_conv_as_matrix(p["wconv"], w), ((0, K3P - K3), (0, 0)))
        wfc = p["wfc"].reshape(F, O, h, w)                  # PyTorch flatten: (o, h, w)
        wfc = jnp.transpose(wfc, (2, 3, 1, 0)).reshape(h * w * O, F)   # rows (h, w, o)
        return dict(
            wconv=mat.astype(jnp.bfloat16),
            bconv=jnp.tile(p["bconv"], w).reshape(1, w * O).astype(jnp.float32),
            wfc=wfc.astype(jnp.bfloat16),
            bfc=p["bfc"].reshape(1, F).astype(jnp.float32),
        )

    s1 = prep_subnet(params["subcnn1"])
    s2 = prep_subnet(params["subcnn2"])
    F = params["subcnn1"]["wfc"].shape[0]
    w1t = params["w1"].T.astype(jnp.bfloat16)               # (in = 2F, out)
    return dict(
        wconv=jnp.stack([s1["wconv"], s2["wconv"]]),
        bconv=jnp.stack([s1["bconv"], s2["bconv"]]),
        wfc=jnp.stack([s1["wfc"], s2["wfc"]]),
        bfc=jnp.stack([s1["bfc"], s2["bfc"]]),
        w1=jnp.stack([w1t[:F, :], w1t[F:, :]]),             # pre-split fc1, branch-major
        b1=params["b1"].reshape(1, -1).astype(jnp.float32),
        w2=params["w2"].T.astype(jnp.bfloat16),
        b2=params["b2"].reshape(1, -1).astype(jnp.float32),
    )


# ------------------------------ pure-JAX reference --------------------------- #

def net_reference(ts1, ts2, params):
    """Mirrors the PyTorch module, with the same bf16 weight/activation rounding
    the kernel applies, so only f32 accumulation order differs."""
    def bf16(x):
        return x.astype(jnp.bfloat16).astype(jnp.float32)

    def subnet(x, p):
        y = jax.lax.conv_general_dilated(
            bf16(x), bf16(p["wconv"]), window_strides=(1, 1),
            padding=((1, 1), (1, 1)),
            dimension_numbers=("NCHW", "OIHW", "NCHW"),
            precision=jax.lax.Precision.HIGHEST)
        y = jnp.maximum(y + p["bconv"][None, :, None, None], 0.0)
        feat = y.reshape(y.shape[0], -1)                    # PyTorch view(B,-1): (o,h,w)
        r = jnp.dot(bf16(feat), bf16(p["wfc"]).T,
                    precision=jax.lax.Precision.HIGHEST) + p["bfc"]
        return jnp.maximum(r, 0.0)

    r1 = subnet(ts1, params["subcnn1"])
    r2 = subnet(ts2, params["subcnn2"])
    cat = jnp.concatenate([r1, r2], axis=1)
    hmid = jnp.dot(bf16(cat), bf16(params["w1"]).T,
                   precision=jax.lax.Precision.HIGHEST) + params["b1"]
    return jnp.dot(bf16(hmid), bf16(params["w2"]).T,
                   precision=jax.lax.Precision.HIGHEST) + params["b2"]


# ----------------------------------- main ------------------------------------ #

if __name__ == "__main__":
    B, C, H, W = 2, 4, 16, 16          # kernel supports up to B=8 per call for free
    key = jax.random.PRNGKey(0)
    kkey, k1, k2 = jax.random.split(key, 3)

    params = make_net_params(kkey, C, H, W)        # PyTorch-layout params
    kparams = prepare_params(params, H, W)         # one-time kernel-layout conversion
    ts1 = jax.random.normal(k1, (B, C, H, W), jnp.float32)   # NCHW, like PyTorch
    ts2 = jax.random.normal(k2, (B, C, H, W), jnp.float32)

    fwd = jax.jit(net_forward)
    out = fwd(ts1, ts2, kparams)
    jax.block_until_ready(out)
    assert out.shape == (B, 2) and out.dtype == jnp.float32

    ref = net_reference(ts1, ts2, params)
    err = float(jnp.max(jnp.abs(out - ref)))
    scale = max(1.0, float(jnp.max(jnp.abs(ref))))
    assert err <= 2e-2 * scale, f"kernel/reference mismatch: max|diff|={err}"
    print("KERNEL_OK")
</pallas_src>

<mosaic_0001>
module attributes {stable_mosaic.version = 11 : i64} {
  func.func @kernel(%arg0: i32, %arg1: memref<1x16x2x64xf32, #tpu.memory_space<vmem>>, %arg2: memref<1x256x128xbf16, #tpu.memory_space<vmem>>, %arg3: memref<1x1x128xf32, #tpu.memory_space<vmem>>, %arg4: memref<1x2048x512xbf16, #tpu.memory_space<vmem>>, %arg5: memref<1x1x512xf32, #tpu.memory_space<vmem>>, %arg6: memref<1x512x1024xbf16, #tpu.memory_space<vmem>>, %arg7: memref<1x1024xf32, #tpu.memory_space<vmem>>, %arg8: memref<1024x2xbf16, #tpu.memory_space<vmem>>, %arg9: memref<1x2xf32, #tpu.memory_space<vmem>>, %arg10: memref<2x2xf32, #tpu.memory_space<vmem>>, %arg11: memref<16x8x256xf32, #tpu.memory_space<vmem>>, %arg12: memref<8x2048xf32, #tpu.memory_space<vmem>>, %arg13: memref<8x1024xf32, #tpu.memory_space<vmem>>) attributes {dimension_semantics = [#tpu.dimension_semantics<arbitrary>], iteration_bounds = array<i64: 2>, scalar_prefetch = 0 : i64, scratch_operands = 3 : i64, tpu.core_type = #tpu.core_type<tc>, window_params = [{transform_indices = @transform_0, window_bounds = array<i64: 1, 16, 2, 64>}, {transform_indices = @transform_1, window_bounds = array<i64: 1, 256, 128>}, {transform_indices = @transform_2, window_bounds = array<i64: 1, 1, 128>}, {transform_indices = @transform_3, window_bounds = array<i64: 1, 2048, 512>}, {transform_indices = @transform_4, window_bounds = array<i64: 1, 1, 512>}, {transform_indices = @transform_5, window_bounds = array<i64: 1, 512, 1024>}, {pipeline_mode = #tpu.pipeline_mode<synchronous>, transform_indices = @transform_6, window_bounds = array<i64: 1, 1024>}, {pipeline_mode = #tpu.pipeline_mode<synchronous>, transform_indices = @transform_7, window_bounds = array<i64: 1024, 2>}, {pipeline_mode = #tpu.pipeline_mode<synchronous>, transform_indices = @transform_8, window_bounds = array<i64: 1, 2>}, {pipeline_mode = #tpu.pipeline_mode<synchronous>, transform_indices = @transform_9, window_bounds = array<i64: 2, 2>}]} {
    %c0_i32 = arith.constant 0 : i32
    %0 = arith.cmpi eq, %arg0, %c0_i32 : i32
    %1 = arith.extui %0 : i1 to i32
    %c0_i32_0 = arith.constant 0 : i32
    %2 = arith.cmpi ne, %1, %c0_i32_0 : i32
    scf.if %2 {
      %cst_61 = arith.constant 0.000000e+00 : f32
      %77 = vector.broadcast %cst_61 : f32 to vector<16x8x256xf32>
      %c0_62 = arith.constant 0 : index
      %c0_63 = arith.constant 0 : index
      %c0_64 = arith.constant 0 : index
      %78 = vector.load %arg11[%c0_62, %c0_63, %c0_64] : memref<16x8x256xf32, #tpu.memory_space<vmem>>, vector<16x8x256xf32>
      tpu.vector_store %arg11[%c0_62, %c0_63, %c0_64], %77 {strides = array<i32>} : memref<16x8x256xf32, #tpu.memory_space<vmem>>, vector<16x8x256xf32>,
    } else {
    }
    %c0 = arith.constant 0 : index
    %c0_1 = arith.constant 0 : index
    %c0_2 = arith.constant 0 : index
    %c0_3 = arith.constant 0 : index
    %3 = vector.load %arg1[%c0, %c0_1, %c0_2, %c0_3] : memref<1x16x2x64xf32, #tpu.memory_space<vmem>>, vector<1x15x2x64xf32>
    %4 = vector.shape_cast %3 : vector<1x15x2x64xf32> to vector<15x2x64xf32>
    %c1 = arith.constant 1 : index
    %c0_4 = arith.constant 0 : index
    %c4 = arith.constant 4 : index
    %5 = vector.load %arg11[%c1, %c0_4, %c4] : memref<16x8x256xf32, #tpu.memory_space<vmem>>, vector<15x2x64xf32>
    tpu.vector_store %arg11[%c1, %c0_4, %c4], %4 {strides = array<i32>} : memref<16x8x256xf32, #tpu.memory_space<vmem>>, vector<15x2x64xf32>,
    %c0_5 = arith.constant 0 : index
    %c0_6 = arith.constant 0 : index
    %c0_7 = arith.constant 0 : index
    %c0_8 = arith.constant 0 : index
    %6 = vector.load %arg1[%c0_5, %c0_6, %c0_7, %c0_8] : memref<1x16x2x64xf32, #tpu.memory_space<vmem>>, vector<1x16x2x64xf32>
    %7 = vector.shape_cast %6 : vector<1x16x2x64xf32> to vector<16x2x64xf32>
    %c0_9 = arith.constant 0 : index
    %c0_10 = arith.constant 0 : index
    %c76 = arith.constant 76 : index
    %8 = vector.load %arg11[%c0_9, %c0_10, %c76] : memref<16x8x256xf32, #tpu.memory_space<vmem>>, vector<16x2x64xf32>
    tpu.vector_store %arg11[%c0_9, %c0_10, %c76], %7 {strides = array<i32>} : memref<16x8x256xf32, #tpu.memory_space<vmem>>, vector<16x2x64xf32>,
    %c0_11 = arith.constant 0 : index
    %c1_12 = arith.constant 1 : index
    %c0_13 = arith.constant 0 : index
    %c0_14 = arith.constant 0 : index
    %9 = vector.load %arg1[%c0_11, %c1_12, %c0_13, %c0_14] : memref<1x16x2x64xf32, #tpu.memory_space<vmem>>, vector<1x15x2x64xf32>
    %10 = vector.shape_cast %9 : vector<1x15x2x64xf32> to vector<15x2x64xf32>
    %c0_15 = arith.constant 0 : index
    %c0_16 = arith.constant 0 : index
    %c148 = arith.constant 148 : index
    %11 = vector.load %arg11[%c0_15, %c0_16, %c148] : memref<16x8x256xf32, #tpu.memory_space<vmem>>, vector<15x2x64xf32>
    tpu.vector_store %arg11[%c0_15, %c0_16, %c148], %10 {strides = array<i32>} : memref<16x8x256xf32, #tpu.memory_space<vmem>>, vector<15x2x64xf32>,
    %c0_17 = arith.constant 0 : index
    %c0_18 = arith.constant 0 : index
    %c0_19 = arith.constant 0 : index
    %12 = vector.load %arg11[%c0_17, %c0_18, %c0_19] : memref<16x8x256xf32, #tpu.memory_space<vmem>>, vector<16x8x256xf32>
    %13 = vector.shape_cast %12 : vector<16x8x256xf32> to vector<128x256xf32>
    %14 = arith.truncf %13 : vector<128x256xf32> to vector<128x256xbf16>
    %c0_20 = arith.constant 0 : index
    %c0_21 = arith.constant 0 : index
    %c0_22 = arith.constant 0 : index
    %15 = vector.load %arg2[%c0_20, %c0_21, %c0_22] : memref<1x256x128xbf16, #tpu.memory_space<vmem>>, vector<1x256x128xbf16>
    %16 = vector.shape_cast %15 : vector<1x256x128xbf16> to vector<256x128xbf16>
    %cst = arith.constant dense<0.000000e+00> : vector<128x128xf32>
    %17 = tpu.matmul %14, %16, %cst {dimension_numbers = #tpu.dot_dimension_numbers<[1], [0], [0], [1], [0, 0, 1, 1], [], []>} : vector<128x256xbf16>, vector<256x128xbf16>, vector<128x128xf32> -> vector<128x128xf32>
    %c0_23 = arith.constant 0 : index
    %c0_24 = arith.constant 0 : index
    %c0_25 = arith.constant 0 : index
    %18 = vector.load %arg3[%c0_23, %c0_24, %c0_25] : memref<1x1x128xf32, #tpu.memory_space<vmem>>, vector<1x1x128xf32>
    %19 = vector.shape_cast %18 : vector<1x1x128xf32> to vector<1x128xf32>
    %20 = vector.broadcast %19 : vector<1x128xf32> to vector<128x128xf32>
    %21 = arith.addf %17, %20 : vector<128x128xf32>
    %cst_26 = arith.constant 0.000000e+00 : f32
    %22 = vector.broadcast %cst_26 : f32 to vector<128x128xf32>
    %23 = arith.maximumf %21, %22 : vector<128x128xf32>
    %24 = vector.extract_strided_slice %23 {offsets = [0, 0], sizes = [8, 128], strides = [1, 1]} : vector<128x128xf32> to vector<8x128xf32>
    %c0_27 = arith.constant 0 : index
    %c0_28 = arith.constant 0 : index
    %25 = vector.load %arg12[%c0_27, %c0_28] : memref<8x2048xf32, #tpu.memory_space<vmem>>, vector<8x128xf32>
    tpu.vector_store %arg12[%c0_27, %c0_28], %24 {strides = array<i32>} : memref<8x2048xf32, #tpu.memory_space<vmem>>, vector<8x128xf32>,
    %26 = vector.extract_strided_slice %23 {offsets = [8, 0], sizes = [8, 128], strides = [1, 1]} : vector<128x128xf32> to vector<8x128xf32>
    %c0_29 = arith.constant 0 : index
    %c128 = arith.constant 128 : index
    %27 = vector.load %arg12[%c0_29, %c128] : memref<8x2048xf32, #tpu.memory_space<vmem>>, vector<8x128xf32>
    tpu.vector_store %arg12[%c0_29, %c128], %26 {strides = array<i32>} : memref<8x2048xf32, #tpu.memory_space<vmem>>, vector<8x128xf32>,
    %28 = vector.extract_strided_slice %23 {offsets = [16, 0], sizes = [8, 128], strides = [1, 1]} : vector<128x128xf32> to vector<8x128xf32>
    %c0_30 = arith.constant 0 : index
    %c256 = arith.constant 256 : index
    %29 = vector.load %arg12[%c0_30, %c256] : memref<8x2048xf32, #tpu.memory_space<vmem>>, vector<8x128xf32>
    tpu.vector_store %arg12[%c0_30, %c256], %28 {strides = array<i32>} : memref<8x2048xf32, #tpu.memory_space<vmem>>, vector<8x128xf32>,
    %30 = vector.extract_strided_slice %23 {offsets = [24, 0], sizes = [8, 128], strides = [1, 1]} : vector<128x128xf32> to vector<8x128xf32>
    %c0_31 = arith.constant 0 : index
    %c384 = arith.constant 384 : index
    %31 = vector.load %arg12[%c0_31, %c384] : memref<8x2048xf32, #tpu.memory_space<vmem>>, vector<8x128xf32>
    tpu.vector_store %arg12[%c0_31, %c384], %30 {strides = array<i32>} : memref<8x2048xf32, #tpu.memory_space<vmem>>, vector<8x128xf32>,
    %32 = vector.extract_strided_slice %23 {offsets = [32, 0], sizes = [8, 128], strides = [1, 1]} : vector<128x128xf32> to vector<8x128xf32>
    %c0_32 = arith.constant 0 : index
    %c512 = arith.constant 512 : index
    %33 = vector.load %arg12[%c0_32, %c512] : memref<8x2048xf32, #tpu.memory_space<vmem>>, vector<8x128xf32>
    tpu.vector_store %arg12[%c0_32, %c512], %32 {strides = array<i32>} : memref<8x2048xf32, #tpu.memory_space<vmem>>, vector<8x128xf32>,
    %34 = vector.extract_strided_slice %23 {offsets = [40, 0], sizes = [8, 128], strides = [1, 1]} : vector<128x128xf32> to vector<8x128xf32>
    %c0_33 = arith.constant 0 : index
    %c640 = arith.constant 640 : index
    %35 = vector.load %arg12[%c0_33, %c640] : memref<8x2048xf32, #tpu.memory_space<vmem>>, vector<8x128xf32>
    tpu.vector_store %arg12[%c0_33, %c640], %34 {strides = array<i32>} : memref<8x2048xf32, #tpu.memory_space<vmem>>, vector<8x128xf32>,
    %36 = vector.extract_strided_slice %23 {offsets = [48, 0], sizes = [8, 128], strides = [1, 1]} : vector<128x128xf32> to vector<8x128xf32>
    %c0_34 = arith.constant 0 : index
    %c768 = arith.constant 768 : index
    %37 = vector.load %arg12[%c0_34, %c768] : memref<8x2048xf32, #tpu.memory_space<vmem>>, vector<8x128xf32>
    tpu.vector_store %arg12[%c0_34, %c768], %36 {strides = array<i32>} : memref<8x2048xf32, #tpu.memory_space<vmem>>, vector<8x128xf32>,
    %38 = vector.extract_strided_slice %23 {offsets = [56, 0], sizes = [8, 128], strides = [1, 1]} : vector<128x128xf32> to vector<8x128xf32>
    %c0_35 = arith.constant 0 : index
    %c896 = arith.constant 896 : index
    %39 = vector.load %arg12[%c0_35, %c896] : memref<8x2048xf32, #tpu.memory_space<vmem>>, vector<8x128xf32>
    tpu.vector_store %arg12[%c0_35, %c896], %38 {strides = array<i32>} : memref<8x2048xf32, #tpu.memory_space<vmem>>, vector<8x128xf32>,
    %40 = vector.extract_strided_slice %23 {offsets = [64, 0], sizes = [8, 128], strides = [1, 1]} : vector<128x128xf32> to vector<8x128xf32>
    %c0_36 = arith.constant 0 : index
    %c1024 = arith.constant 1024 : index
    %41 = vector.load %arg12[%c0_36, %c1024] : memref<8x2048xf32, #tpu.memory_space<vmem>>, vector<8x128xf32>
    tpu.vector_store %arg12[%c0_36, %c1024], %40 {strides = array<i32>} : memref<8x2048xf32, #tpu.memory_space<vmem>>, vector<8x128xf32>,
    %42 = vector.extract_strided_slice %23 {offsets = [72, 0], sizes = [8, 128], strides = [1, 1]} : vector<128x128xf32> to vector<8x128xf32>
    %c0_37 = arith.constant 0 : index
    %c1152 = arith.constant 1152 : index
    %43 = vector.load %arg12[%c0_37, %c1152] : memref<8x2048xf32, #tpu.memory_space<vmem>>, vector<8x128xf32>
    tpu.vector_store %arg12[%c0_37, %c1152], %42 {strides = array<i32>} : memref<8x2048xf32, #tpu.memory_space<vmem>>, vector<8x128xf32>,
    %44 = vector.extract_strided_slice %23 {offsets = [80, 0], sizes = [8, 128], strides = [1, 1]} : vector<128x128xf32> to vector<8x128xf32>
    %c0_38 = arith.constant 0 : index
    %c1280 = arith.constant 1280 : index
    %45 = vector.load %arg12[%c0_38, %c1280] : memref<8x2048xf32, #tpu.memory_space<vmem>>, vector<8x128xf32>
    tpu.vector_store %arg12[%c0_38, %c1280], %44 {strides = array<i32>} : memref<8x2048xf32, #tpu.memory_space<vmem>>, vector<8x128xf32>,
    %46 = vector.extract_strided_slice %23 {offsets = [88, 0], sizes = [8, 128], strides = [1, 1]} : vector<128x128xf32> to vector<8x128xf32>
    %c0_39 = arith.constant 0 : index
    %c1408 = arith.constant 1408 : index
    %47 = vector.load %arg12[%c0_39, %c1408] : memref<8x2048xf32, #tpu.memory_space<vmem>>, vector<8x128xf32>
    tpu.vector_store %arg12[%c0_39, %c1408], %46 {strides = array<i32>} : memref<8x2048xf32, #tpu.memory_space<vmem>>, vector<8x128xf32>,
    %48 = vector.extract_strided_slice %23 {offsets = [96, 0], sizes = [8, 128], strides = [1, 1]} : vector<128x128xf32> to vector<8x128xf32>
    %c0_40 = arith.constant 0 : index
    %c1536 = arith.constant 1536 : index
    %49 = vector.load %arg12[%c0_40, %c1536] : memref<8x2048xf32, #tpu.memory_space<vmem>>, vector<8x128xf32>
    tpu.vector_store %arg12[%c0_40, %c1536], %48 {strides = array<i32>} : memref<8x2048xf32, #tpu.memory_space<vmem>>, vector<8x128xf32>,
    %50 = vector.extract_strided_slice %23 {offsets = [104, 0], sizes = [8, 128], strides = [1, 1]} : vector<128x128xf32> to vector<8x128xf32>
    %c0_41 = arith.constant 0 : index
    %c1664 = arith.constant 1664 : index
    %51 = vector.load %arg12[%c0_41, %c1664] : memref<8x2048xf32, #tpu.memory_space<vmem>>, vector<8x128xf32>
    tpu.vector_store %arg12[%c0_41, %c1664], %50 {strides = array<i32>} : memref<8x2048xf32, #tpu.memory_space<vmem>>, vector<8x128xf32>,
    %52 = vector.extract_strided_slice %23 {offsets = [112, 0], sizes = [8, 128], strides = [1, 1]} : vector<128x128xf32> to vector<8x128xf32>
    %c0_42 = arith.constant 0 : index
    %c1792 = arith.constant 1792 : index
    %53 = vector.load %arg12[%c0_42, %c1792] : memref<8x2048xf32, #tpu.memory_space<vmem>>, vector<8x128xf32>
    tpu.vector_store %arg12[%c0_42, %c1792], %52 {strides = array<i32>} : memref<8x2048xf32, #tpu.memory_space<vmem>>, vector<8x128xf32>,
    %54 = vector.extract_strided_slice %23 {offsets = [120, 0], sizes = [8, 128], strides = [1, 1]} : vector<128x128xf32> to vector<8x128xf32>
    %c0_43 = arith.constant 0 : index
    %c1920 = arith.constant 1920 : index
    %55 = vector.load %arg12[%c0_43, %c1920] : memref<8x2048xf32, #tpu.memory_space<vmem>>, vector<8x128xf32>
    tpu.vector_store %arg12[%c0_43, %c1920], %54 {strides = array<i32>} : memref<8x2048xf32, #tpu.memory_space<vmem>>, vector<8x128xf32>,
    %c0_44 = arith.constant 0 : index
    %c0_45 = arith.constant 0 : index
    %56 = vector.load %arg12[%c0_44, %c0_45] : memref<8x2048xf32, #tpu.memory_space<vmem>>, vector<8x2048xf32>
    %57 = arith.truncf %56 : vector<8x2048xf32> to vector<8x2048xbf16>
    %c0_46 = arith.constant 0 : index
    %c0_47 = arith.constant 0 : index
    %c0_48 = arith.constant 0 : index
    %58 = vector.load %arg4[%c0_46, %c0_47, %c0_48] : memref<1x2048x512xbf16, #tpu.memory_space<vmem>>, vector<1x2048x512xbf16>
    %59 = vector.shape_cast %58 : vector<1x2048x512xbf16> to vector<2048x512xbf16>
    %cst_49 = arith.constant dense<0.000000e+00> : vector<8x512xf32>
    %60 = tpu.matmul %57, %59, %cst_49 {dimension_numbers = #tpu.dot_dimension_numbers<[1], [0], [0], [1], [0, 0, 1, 1], [], []>} : vector<8x2048xbf16>, vector<2048x512xbf16>, vector<8x512xf32> -> vector<8x512xf32>
    %c0_50 = arith.constant 0 : index
    %c0_51 = arith.constant 0 : index
    %c0_52 = arith.constant 0 : index
    %61 = vector.load %arg5[%c0_50, %c0_51, %c0_52] : memref<1x1x512xf32, #tpu.memory_space<vmem>>, vector<1x1x512xf32>
    %62 = vector.shape_cast %61 : vector<1x1x512xf32> to vector<1x512xf32>
    %63 = vector.broadcast %62 : vector<1x512xf32> to vector<8x512xf32>
    %64 = arith.addf %60, %63 : vector<8x512xf32>
    %cst_53 = arith.constant 0.000000e+00 : f32
    %65 = vector.broadcast %cst_53 : f32 to vector<8x512xf32>
    %66 = arith.maximumf %64, %65 : vector<8x512xf32>
    %67 = arith.truncf %66 : vector<8x512xf32> to vector<8x512xbf16>
    %c0_54 = arith.constant 0 : index
    %c0_55 = arith.constant 0 : index
    %c0_56 = arith.constant 0 : index
    %68 = vector.load %arg6[%c0_54, %c0_55, %c0_56] : memref<1x512x1024xbf16, #tpu.memory_space<vmem>>, vector<1x512x1024xbf16>
    %69 = vector.shape_cast %68 : vector<1x512x1024xbf16> to vector<512x1024xbf16>
    %cst_57 = arith.constant dense<0.000000e+00> : vector<8x1024xf32>
    %70 = tpu.matmul %67, %69, %cst_57 {dimension_numbers = #tpu.dot_dimension_numbers<[1], [0], [0], [1], [0, 0, 1, 1], [], []>} : vector<8x512xbf16>, vector<512x1024xbf16>, vector<8x1024xf32> -> vector<8x1024xf32>
    %c0_i32_58 = arith.constant 0 : i32
    %71 = arith.cmpi eq, %arg0, %c0_i32_58 : i32
    %72 = arith.extui %71 : i1 to i32
    %c0_i32_59 = arith.constant 0 : i32
    %73 = arith.cmpi ne, %72, %c0_i32_59 : i32
    scf.if %73 {
      %c0_61 = arith.constant 0 : index
      %c0_62 = arith.constant 0 : index
      %77 = vector.load %arg13[%c0_61, %c0_62] : memref<8x1024xf32, #tpu.memory_space<vmem>>, vector<8x1024xf32>
      tpu.vector_store %arg13[%c0_61, %c0_62], %70 {strides = array<i32>} : memref<8x1024xf32, #tpu.memory_space<vmem>>, vector<8x1024xf32>,
    } else {
    }
    %c1_i32 = arith.constant 1 : i32
    %74 = arith.cmpi eq, %arg0, %c1_i32 : i32
    %75 = arith.extui %74 : i1 to i32
    %c0_i32_60 = arith.constant 0 : i32
    %76 = arith.cmpi ne, %75, %c0_i32_60 : i32
    scf.if %76 {
      %c0_61 = arith.constant 0 : index
      %c0_62 = arith.constant 0 : index
      %77 = vector.load %arg13[%c0_61, %c0_62] : memref<8x1024xf32, #tpu.memory_space<vmem>>, vector<8x1024xf32>
      %78 = arith.addf %77, %70 : vector<8x1024xf32>
      %c0_63 = arith.constant 0 : index
      %c0_64 = arith.constant 0 : index
      %79 = vector.load %arg7[%c0_63, %c0_64] : memref<1x1024xf32, #tpu.memory_space<vmem>>, vector<1x1024xf32>
      %80 = vector.broadcast %79 : vector<1x1024xf32> to vector<8x1024xf32>
      %81 = arith.addf %78, %80 : vector<8x1024xf32>
      %82 = arith.truncf %81 : vector<8x1024xf32> to vector<8x1024xbf16>
      %c0_65 = arith.constant 0 : index
      %c0_66 = arith.constant 0 : index
      %83 = vector.load %arg8[%c0_65, %c0_66] : memref<1024x2xbf16, #tpu.memory_space<vmem>>, vector<1024x2xbf16>
      %cst_67 = arith.constant dense<0.000000e+00> : vector<8x2xf32>
      %84 = tpu.matmul %82, %83, %cst_67 {dimension_numbers = #tpu.dot_dimension_numbers<[1], [0], [0], [1], [0, 0, 1, 1], [], []>} : vector<8x1024xbf16>, vector<1024x2xbf16>, vector<8x2xf32> -> vector<8x2xf32>
      %c0_68 = arith.constant 0 : index
      %c0_69 = arith.constant 0 : index
      %85 = vector.load %arg9[%c0_68, %c0_69] : memref<1x2xf32, #tpu.memory_space<vmem>>, vector<1x2xf32>
      %86 = vector.broadcast %85 : vector<1x2xf32> to vector<8x2xf32>
      %87 = arith.addf %84, %86 : vector<8x2xf32>
      %88 = vector.extract_strided_slice %87 {offsets = [0, 0], sizes = [2, 2], strides = [1, 1]} : vector<8x2xf32> to vector<2x2xf32>
      %c0_70 = arith.constant 0 : index
      %c0_71 = arith.constant 0 : index
      %89 = vector.load %arg10[%c0_70, %c0_71] : memref<2x2xf32, #tpu.memory_space<vmem>>, vector<2x2xf32>
      tpu.vector_store %arg10[%c0_70, %c0_71], %88 {strides = array<i32>} : memref<2x2xf32, #tpu.memory_space<vmem>>, vector<2x2xf32>,
    } else {
    }
    return
  }
  func.func @transform_0(%arg0: i32) -> (i32, i32, i32, i32) {
    %c0_i32 = arith.constant 0 : i32
    %c0_i32_0 = arith.constant 0 : i32
    %c0_i32_1 = arith.constant 0 : i32
    %c0_i32_2 = arith.constant 0 : i32
    return %arg0, %c0_i32, %c0_i32_0, %c0_i32_1 : i32, i32, i32, i32
  }
  func.func @transform_1(%arg0: i32) -> (i32, i32, i32) {
    %c0_i32 = arith.constant 0 : i32
    %c0_i32_0 = arith.constant 0 : i32
    %c0_i32_1 = arith.constant 0 : i32
    return %arg0, %c0_i32, %c0_i32_0 : i32, i32, i32
  }
  func.func @transform_2(%arg0: i32) -> (i32, i32, i32) {
    %c0_i32 = arith.constant 0 : i32
    %c0_i32_0 = arith.constant 0 : i32
    %c0_i32_1 = arith.constant 0 : i32
    return %arg0, %c0_i32, %c0_i32_0 : i32, i32, i32
  }
  func.func @transform_3(%arg0: i32) -> (i32, i32, i32) {
    %c0_i32 = arith.constant 0 : i32
    %c0_i32_0 = arith.constant 0 : i32
    %c0_i32_1 = arith.constant 0 : i32
    return %arg0, %c0_i32, %c0_i32_0 : i32, i32, i32
  }
  func.func @transform_4(%arg0: i32) -> (i32, i32, i32) {
    %c0_i32 = arith.constant 0 : i32
    %c0_i32_0 = arith.constant 0 : i32
    %c0_i32_1 = arith.constant 0 : i32
    return %arg0, %c0_i32, %c0_i32_0 : i32, i32, i32
  }
  func.func @transform_5(%arg0: i32) -> (i32, i32, i32) {
    %c0_i32 = arith.constant 0 : i32
    %c0_i32_0 = arith.constant 0 : i32
    %c0_i32_1 = arith.constant 0 : i32
    return %arg0, %c0_i32, %c0_i32_0 : i32, i32, i32
  }
  func.func @transform_6(%arg0: i32) -> (i32, i32) {
    %c0_i32 = arith.constant 0 : i32
    %c0_i32_0 = arith.constant 0 : i32
    %c0_i32_1 = arith.constant 0 : i32
    return %c0_i32, %c0_i32_0 : i32, i32
  }
  func.func @transform_7(%arg0: i32) -> (i32, i32) {
    %c0_i32 = arith.constant 0 : i32
    %c0_i32_0 = arith.constant 0 : i32
    %c0_i32_1 = arith.constant 0 : i32
    return %c0_i32, %c0_i32_0 : i32, i32
  }
  func.func @transform_8(%arg0: i32) -> (i32, i32) {
    %c0_i32 = arith.constant 0 : i32
    %c0_i32_0 = arith.constant 0 : i32
    %c0_i32_1 = arith.constant 0 : i32
    return %c0_i32, %c0_i32_0 : i32, i32
  }
  func.func @transform_9(%arg0: i32) -> (i32, i32) {
    %c0_i32 = arith.constant 0 : i32
    %c0_i32_0 = arith.constant 0 : i32
    %c0_i32_1 = arith.constant 0 : i32
    return %c0_i32, %c0_i32_0 : i32, i32
  }
}

</mosaic_0001>

<bundles_post_ra>
// kernel: net_forward.1
= control target key start
LH: loop header
LB: loop body
LE: loop exit
PB: predicated region body
PF: predicated region fallthrough
CT: control target
= control target key end

     0   :  { %s11868_s0 = inlined_call_operand.vmem [shape: f32[2,16,2,64], index: 0, kind: input, shape index: {}]   ;;  %s11869_s1 = inlined_call_operand.hbm [shape: bf16[2,256,128], index: 1, kind: input, shape index: {}]   ;;  %s11870_s2 = inlined_call_operand.hbm [shape: f32[2,1,128], index: 2, kind: input, shape index: {}]   ;;  %s11871_s3 = inlined_call_operand.hbm [shape: bf16[2,2048,512], index: 3, kind: input, shape index: {}]   ;;  %s11872_s4 = inlined_call_operand.hbm [shape: f32[2,1,512], index: 4, kind: input, shape index: {}]   ;;  %s11873_s5 = inlined_call_operand.hbm [shape: bf16[2,512,1024], index: 5, kind: input, shape index: {}]   ;;  %s11874_s6 = inlined_call_operand.hbm [shape: f32[1,1024], index: 6, kind: input, shape index: {}]   ;;  %s11875_s7 = inlined_call_operand.vmem [shape: bf16[1024,2], index: 7, kind: input, shape index: {}]   ;;  %s11876_s8 = inlined_call_operand.hbm [shape: f32[1,2], index: 8, kind: input, shape index: {}]   ;;  %s11877_s9 = inlined_call_operand.hbm [shape: f32[2,2], index: 9, kind: output, shape index: {}]  }
   0x1   :  { %11892 = sst [smem:[#allocation26_spill]] %s11870_s2 }
   0x2   :  { %11893 = sst [smem:[#allocation27_spill]] %s11874_s6 }
   0x3   :  { %14 = vsyncpa [#allocation6], 0 }
   0x4   :  { %16 = vsyncpa [#allocation6 + $0x1], 0 }
   0x5   :  { %17 = vsyncpa [#allocation9], 0 }
   0x6   :  { %19 = vsyncpa [#allocation9 + $0x1], 0 }
   0x7   :  { %20 = vsyncpa [#allocation12], 0 }
   0x8   :  { %22 = vsyncpa [#allocation12 + $0x1], 0 }
   0x9   :  { %23 = vsyncpa [#allocation15], 0 }
   0xa   :  { %24 = vsyncpa [#allocation7], 0  ;;  %s10202_s30 = smov 0   ;;  %s10204_s10 = smov 0  }
   0xb   :  { %s10206_s11 = smov 0   ;;  %s10208_s12 = smov 0  }
   0xc LB: > { %11894 = sst [smem:[#allocation23_spill]] %s10128_s11  ;;  %s10221_s13 = sadd.s32 4294967295, %s10132_s12   ;;  %s10132_s12 = sphi %s10208_s12, %s11918_s12   ;;  %s10128_s11 = sphi %s10206_s11, %s11920_s11   ;;  %s10124_s10 = sphi %s10204_s10, %s11922_s10   ;;  %s10120_s30 = sphi %s10202_s30, %s11921_s30  }
   0xd   : > { %s10224_s14 = sadd.s32 1, %s10132_s12   ;;  %s63_s16 = sadd.s32 1, %s10128_s11 }
   0xe   : > { %11895 = sst [smem:[#allocation24_spill]] %s10224_s14  ;;  %s60_s15 = ssub.s32 %s10132_s12, %s10224_s14 }
   0xf   : > { %p61_p0 = scmp.eq.s32.totalorder %s60_s15, 0  ;;  %p70_p1 = scmp.ne.s32.totalorder %s10128_s11, %s10124_s10 }
  0x10   : > { %p71_p2 = scmp.eq.s32.totalorder %s10132_s12, 0  ;;  %p76_p3 = scmp.ne.s32.totalorder %s10124_s10, %s10120_s30 }
  0x11   : > { %s10234_s17 = scalar_select %p61_p0, %s10128_s11, %s63_s16  }
  0x12   : > { %p10236_p4 = por %p71_p2, %p70_p1  ;;  %p11878_p5 = scmp.eq.s32.totalorder %s10221_s13, 0 }
  0x13   : > { %11896 = sst [smem:[#allocation25_spill]] %s10234_s17  ;;  %p7773_p6 = scmp.ge.s32.totalorder %s10132_s12, 1 }
  0x14   : > { %p275_p7 = scmp.lt.s32.totalorder %s10132_s12, 3  ;;  %p10245_p8 = por %p11878_p5, %p76_p3 }
  0x15   : > { %s10134_s21 = smov [#allocation14]   ;;  %p8951_p12 = scmp.lt.s32.totalorder %s10132_s12, 2 }
  0x16   : > { %s11898_s19 = scalar_select %p10245_p8, 1, 0 }
  0x17   : > { %p10250_p10 = pnand %p7773_p6, %p275_p7  ;;  %s288_s22 = sshll.u32 %s10134_s21, 4  ;;  %s289_s22 = int_to_ptr.vmem [resolvable:$true] %s288_s22 }
  0x18   : > { %s10258_s23 = sand.u32 1, %s10128_s11   ;;  %s11882_s25 = sand.u32 1, %s10132_s12  }
  0x19   : > { %s11899_s20 = scalar_select %p10250_p10, 1, 0 }
  0x1a   : > { %p8926_p11 = pneg %p10250_p10  ;;  %p10269_p0 = pnand %p8951_p12, %p10236_p4 }
  0x1b   : > { %s11902_s6 = sld [smem:[#allocation27_spill]] }
  0x1c   : > { %p10262_p13 = pnand %p8926_p11, %p11878_p5 }
  0x1d   : > { %s11901_s26 = scalar_select %p10269_p0, 1, 0 }
  0x1e   : > { %s11900_s24 = scalar_select %p10262_p13, 1, 0 }
  0x1f   : > { %p11883_p2 = pneg %p10262_p13 }
  0x21   : > { %s9850_s29 = scalar_lea.hbm %s11902_s6, 128 }
  0x22   : > { %p9851_p1 = scmp.ne.s32.totalorder %s11902_s6, %s9850_s29  ;;  %p9857_p4 = scmp.lt.u32.totalorder %s9850_s29, %s11902_s6 }
  0x24   : > { %p9853_p3 = pnand %p11883_p2, %p9851_p1 }
  0x26   : > { %p9854_p6 = pneg %p9853_p3 }
  0x28   : > { %p9859_p7 = pnand %p9857_p4, %p9854_p6 }
  0x2a   : > { %9862 = shalt.err (!%p9859_p7)
}
  0x2b   : > { %s9863_s21 = scalar_lea.vmem %s289_s22, 128  ;;  %p9871_p5 = scmp.lt.s32.totalorder %s289_s22, %s289_s22 }
  0x2c   : > { %p9864_p11 = scmp.ne.s32.totalorder %s289_s22, %s9863_s21  ;;  %p9872_p8 = scmp.lt.s32.totalorder %s9863_s21, %s9863_s21 }
  0x2e   : > { %p9866_p12 = pnand %p9864_p11, %p11883_p2  ;;  %p9873_p10 = por %p9872_p8, %p9871_p5 }
  0x30   : > { %p9867_p9 = pneg %p9866_p12 }
  0x32   : > { %p9874_p0 = pnand %p9873_p10, %p9867_p9 }
  0x34   : > { %9877 = shalt.err (!%p9874_p0)
}
  0x35   : > { %8929 = dma.hbm_to_vmem [thread:$0]  (!%p10262_p13), %s11902_s6, 128, %s289_s22, [#allocation15]  }
  0x36   : > { %s7780_s29 = sshll.u32 %s10132_s12, 4  ;;  %s11903_s2 = sld [smem:[#allocation26_spill]] }
  0x37   : > { %s345_s18 = scalar_lea.vmem [#allocation8], %s10258_s23  ;;  %s10306_s27 = scalar_lea.sflag [#allocation9], %s11882_s25 }
  0x38   : > { %s352_s21 = sshll.u32 %s345_s18, 4  ;;  %p11904_p8 = scmp.ne.s32.totalorder %s11901_s26, 0  ;;  %s10302_s21 = int_to_ptr.vmem [resolvable:$true] %s352_s21 }
  0x3a   : > { %p10312_p9 = pneg %p11904_p8 }
  0x3c   : > { %s10299_s16 = scalar_lea.hbm %s11903_s2, %s7780_s29  ;;  %s9883_s15 = scalar_lea.hbm %s11903_s2, 32 }
  0x3d   : > { %s9878_s28 = scalar_lea.hbm %s10299_s16, 16  ;;  %p9884_p1 = scmp.lt.u32.totalorder %s10299_s16, %s11903_s2 }
  0x3e   : > { %p9879_p5 = scmp.ne.s32.totalorder %s10299_s16, %s9878_s28  ;;  %p9885_p3 = scmp.lt.u32.totalorder %s9883_s15, %s9878_s28 }
  0x3f   : > { %s11905_s22 = scalar_select %p10312_p9, 1, 0 }
  0x40   : > { %p9881_p10 = pnand %p10312_p9, %p9879_p5  ;;  %p9886_p6 = por %p9885_p3, %p9884_p1 }
  0x41   : > { %p9887_p4 = scmp.lt.u32.totalorder %s9878_s28, %s10299_s16 }
  0x42   : > { %p9882_p0 = pneg %p9881_p10 }
  0x43   : > { %p9888_p7 = por %p9887_p4, %p9886_p6 }
  0x45   : > { %p9889_p11 = pnand %p9888_p7, %p9882_p0 }
  0x47   : > { %9892 = shalt.err (!%p9889_p11)
}
  0x48   : > { %s9893_s25 = scalar_lea.vmem %s10302_s21, 16  ;;  %s10135_s29 = smov [#allocation8]  }
  0x49   : > { %p9894_p12 = scmp.ne.s32.totalorder %s10302_s21, %s9893_s25  ;;  %s9898_s30 = sshll.u32 %s10135_s29, 4  ;;  %s9899_s30 = int_to_ptr.vmem [resolvable:$false] %s9898_s30 }
  0x4a   : > { %s9900_s6 = scalar_lea.vmem %s9899_s30, 32  ;;  %p9901_p2 = scmp.lt.s32.totalorder %s10302_s21, %s9899_s30 }
  0x4b   : > { %p9896_p5 = pnand %p9894_p12, %p10312_p9  ;;  %p9902_p13 = scmp.lt.s32.totalorder %s9900_s6, %s9893_s25 }
  0x4d   : > { %p9897_p10 = pneg %p9896_p5  ;;  %p9903_p1 = por %p9902_p13, %p9901_p2 }
  0x4f   : > { %p9904_p3 = pnand %p9903_p1, %p9897_p10 }
  0x51   : > { %9907 = shalt.err (!%p9904_p3)
}
  0x52   : > { %8939 = dma.hbm_to_vmem [thread:$0]  (!%p11904_p8), %s10299_s16, 16, %s10302_s21, %s10306_s27  }
  0x53   : > { %s7784_s28 = sshll.u32 %s10258_s23, 2  ;;  %s8673_s15 = sshll.u32 %s10132_s12, 6 }
  0x54   : > { %s10341_s30 = scalar_lea.hbm %s11872_s4, %s8673_s15  ;;  %s384_s25 = scalar_lea.vmem [#allocation11], %s7784_s28 }
  0x55   : > { %s392_s6 = sshll.u32 %s384_s25, 4  ;;  %s10136_s2 = smov [#allocation16]   ;;  %s10343_s6 = int_to_ptr.vmem [resolvable:$true] %s392_s6 }
  0x56   : > { %s10345_s17 = sshll.u32 %s10136_s2, 4  ;;  %s11906_s11 = sand.u32 1, %s10132_s12   ;;  %s303_s17 = int_to_ptr.vmem [resolvable:$true] %s10345_s17 }
  0x57   : > { %s10349_s16 = scalar_lea.sflag [#allocation12], %s11906_s11  ;;  %s9908_s21 = scalar_lea.hbm %s10341_s30, 64 }
  0x58   : > { %p9909_p13 = scmp.ne.s32.totalorder %s10341_s30, %s9908_s21  ;;  %s9913_s29 = scalar_lea.hbm %s11872_s4, 128 }
  0x59   : > { %p9914_p6 = scmp.lt.u32.totalorder %s10341_s30, %s11872_s4  ;;  %p9915_p4 = scmp.lt.u32.totalorder %s9913_s29, %s9908_s21 }
  0x5a   : > { %p9911_p2 = pnand %p9909_p13, %p10312_p9  ;;  %p9917_p11 = scmp.lt.u32.totalorder %s9908_s21, %s10341_s30 }
  0x5b   : > { %p9916_p7 = por %p9915_p4, %p9914_p6 }
  0x5c   : > { %p9912_p0 = pneg %p9911_p2 }
  0x5d   : > { %p9918_p12 = por %p9917_p11, %p9916_p7 }
  0x5f   : > { %p9919_p5 = pnand %p9918_p12, %p9912_p0 }
  0x61   : > { %9922 = shalt.err (!%p9919_p5)
}
  0x62   : > { %s9923_s2 = scalar_lea.vmem %s10343_s6, 64  ;;  %s10137_s11 = smov [#allocation11]  }
  0x63   : > { %p9924_p10 = scmp.ne.s32.totalorder %s10343_s6, %s9923_s2  ;;  %s9928_s25 = sshll.u32 %s10137_s11, 4  ;;  %s9929_s25 = int_to_ptr.vmem [resolvable:$false] %s9928_s25 }
  0x64   : > { %s9930_s14 = scalar_lea.vmem %s9929_s25, 128  ;;  %p9931_p13 = scmp.lt.s32.totalorder %s10343_s6, %s9929_s25 }
  0x65   : > { %p9926_p1 = pnand %p9924_p10, %p10312_p9  ;;  %p9932_p2 = scmp.lt.s32.totalorder %s9930_s14, %s9923_s2 }
  0x67   : > { %p9927_p3 = pneg %p9926_p1  ;;  %p9933_p6 = por %p9932_p2, %p9931_p13 }
  0x69   : > { %p9934_p4 = pnand %p9933_p6, %p9927_p3 }
  0x6b   : > { %9937 = shalt.err (!%p9934_p4)
}
  0x6c   : > { %8945 = dma.hbm_to_vmem [thread:$0]  (!%p11904_p8), %s10341_s30, 64, %s10343_s6, %s10349_s16  }
  0x6d   : > { %s9938_s18 = scalar_lea.hbm %s11876_s8, 16  ;;  %p11907_p7 = scmp.ne.s32.totalorder %s11900_s24, 0 }
  0x6e   : > { %p9939_p0 = scmp.ne.s32.totalorder %s11876_s8, %s9938_s18  ;;  %p9945_p10 = scmp.lt.u32.totalorder %s9938_s18, %s11876_s8 }
  0x6f   : > { %p11908_p11 = pneg %p11907_p7 }
  0x71   : > { %p9941_p12 = pnand %p9939_p0, %p11908_p11 }
  0x73   : > { %p9942_p5 = pneg %p9941_p12 }
  0x75   : > { %p9947_p1 = pnand %p9945_p10, %p9942_p5 }
  0x77   : > { %9950 = shalt.err (!%p9947_p1)
}
  0x78   : > { %s9951_s30 = scalar_lea.vmem %s303_s17, 16  ;;  %p11909_p13 = pmov %p11908_p11 }
  0x79   : > { %p9952_p3 = scmp.ne.s32.totalorder %s303_s17, %s9951_s30  ;;  %s9958_s6 = scalar_lea.vmem %s303_s17, 32 }
  0x7a   : > { %p9959_p4 = scmp.lt.s32.totalorder %s303_s17, %s303_s17  ;;  %p9960_p8 = scmp.lt.s32.totalorder %s9958_s6, %s9951_s30 }
  0x7b   : > { %p9954_p2 = pnand %p9952_p3, %p11909_p13 }
  0x7c   : > { %p9961_p9 = por %p9960_p8, %p9959_p4 }
  0x7d   : > { %p9955_p6 = pneg %p9954_p2 }
  0x7f   : > { %p9962_p0 = pnand %p9961_p9, %p9955_p6 }
  0x81   : > { %9965 = shalt.err (!%p9962_p0)
}
  0x82   : > { %8932 = dma.hbm_to_vmem [thread:$0]  (!%p11907_p7), %s11876_s8, 16, %s303_s17, [#allocation15]  }
  0x83   : > { %s7777_s21 = sshll.u32 %s10258_s23, 7  ;;  %s8671_s15 = sshll.u32 %s10132_s12, 11 }
  0x84   : > { %s10399_s28 = scalar_lea.hbm %s11869_s1, %s8671_s15  ;;  %s325_s24 = scalar_lea.vmem [#allocation5], %s7777_s21 }
  0x85   : > { %s332_s2 = sshll.u32 %s325_s24, 4  ;;  %s322_s11 = scalar_lea.sflag [#allocation6], %s10258_s23  ;;  %s10401_s2 = int_to_ptr.vmem [resolvable:$true] %s332_s2 }
  0x86   : > { %s9966_s30 = scalar_lea.hbm %s10399_s28, 2048  ;;  %p11910_p9 = scmp.ne.s32.totalorder %s11905_s22, 0 }
  0x87   : > { %p9967_p8 = scmp.ne.s32.totalorder %s10399_s28, %s9966_s30  ;;  %s9971_s25 = scalar_lea.hbm %s11869_s1, 4096 }
  0x88   : > { %p9972_p12 = scmp.lt.u32.totalorder %s10399_s28, %s11869_s1  ;;  %p9973_p5 = scmp.lt.u32.totalorder %s9971_s25, %s9966_s30 }
  0x89   : > { %p9969_p7 = pnand %p9967_p8, %p11910_p9  ;;  %p9975_p1 = scmp.lt.u32.totalorder %s9966_s30, %s10399_s28 }
  0x8a   : > { %p9974_p10 = por %p9973_p5, %p9972_p12 }
  0x8b   : > { %p9970_p11 = pneg %p9969_p7 }
  0x8c   : > { %p9976_p3 = por %p9975_p1, %p9974_p10 }
  0x8e   : > { %p9977_p13 = pnand %p9976_p3, %p9970_p11 }
  0x90   : > { %9980 = shalt.err (!%p9977_p13)
}
  0x91   : > { %s9981_s21 = scalar_lea.vmem %s10401_s2, 2048  ;;  %s10138_s18 = smov [#allocation5]  }
  0x92   : > { %p9982_p2 = scmp.ne.s32.totalorder %s10401_s2, %s9981_s21  ;;  %s9986_s29 = sshll.u32 %s10138_s18, 4  ;;  %s9987_s29 = int_to_ptr.vmem [resolvable:$false] %s9986_s29 }
  0x93   : > { %s9988_s24 = scalar_lea.vmem %s9987_s29, 4096  ;;  %p9989_p0 = scmp.lt.s32.totalorder %s10401_s2, %s9987_s29 }
  0x94   : > { %p9984_p6 = pnand %p9982_p2, %p11910_p9  ;;  %p9990_p8 = scmp.lt.s32.totalorder %s9988_s24, %s9981_s21 }
  0x96   : > { %p9985_p4 = pneg %p9984_p6  ;;  %p9991_p7 = por %p9990_p8, %p9989_p0 }
  0x98   : > { %p9992_p12 = pnand %p9991_p7, %p9985_p4 }
  0x9a   : > { %9995 = shalt.err (!%p9992_p12)
}
  0x9b   : > { %s10139_s30 = smov 64   ;;  %s10140_s17 = smov 4  }
  0x9c   : > { %p11911_p11 = scmp.ne.s32.totalorder %s11901_s26, 0  ;;  %s7781_s6 = sshll.u32 %s10258_s23, 12 }
  0x9d   : > { %s8672_s25 = sshll.u32 %s10132_s12, 16  ;;  %s363_s18 = scalar_lea.vmem [#allocation10], %s7781_s6 }
  0x9e   : > { %8936 = dma.hbm_to_vmem [thread:$0]  (!%p11911_p11), %s10399_s28, 2048, %s10401_s2, %s322_s11, %s10139_s30, %s10139_s30, %s10140_s17  }
  0x9f   : > { %s10432_s21 = scalar_lea.hbm %s11871_s3, %s8672_s25  ;;  %s370_s29 = sshll.u32 %s363_s18, 4  ;;  %s10434_s29 = int_to_ptr.vmem [resolvable:$true] %s370_s29 }
  0xa0   : > { %s9996_s24 = scalar_lea.hbm %s10432_s21, 65536  ;;  %s10001_s11 = scalar_lea.hbm %s11871_s3, 131072 }
  0xa1   : > { %p9997_p5 = scmp.ne.s32.totalorder %s10432_s21, %s9996_s24  ;;  %p10002_p3 = scmp.lt.u32.totalorder %s10432_s21, %s11871_s3 }
  0xa2   : > { %p10003_p13 = scmp.lt.u32.totalorder %s10001_s11, %s9996_s24  ;;  %p10005_p6 = scmp.lt.u32.totalorder %s9996_s24, %s10432_s21 }
  0xa3   : > { %p9999_p10 = pnand %p9997_p5, %p11910_p9 }
  0xa4   : > { %p10004_p2 = por %p10003_p13, %p10002_p3 }
  0xa5   : > { %p10000_p1 = pneg %p9999_p10 }
  0xa6   : > { %p10006_p4 = por %p10005_p6, %p10004_p2 }
  0xa8   : > { %p10007_p0 = pnand %p10006_p4, %p10000_p1 }
  0xaa   : > { %10010 = shalt.err (!%p10007_p0)
}
  0xab   : > { %s10011_s6 = scalar_lea.vmem %s10434_s29, 65536  ;;  %s10141_s25 = smov [#allocation10]  }
  0xac   : > { %p10012_p8 = scmp.ne.s32.totalorder %s10434_s29, %s10011_s6  ;;  %s10016_s14 = sshll.u32 %s10141_s25, 4  ;;  %s10017_s14 = int_to_ptr.vmem [resolvable:$false] %s10016_s14 }
  0xad   : > { %s10018_s15 = scalar_lea.vmem %s10017_s14, 131072  ;;  %p10019_p5 = scmp.lt.s32.totalorder %s10434_s29, %s10017_s14 }
  0xae   : > { %p10014_p7 = pnand %p10012_p8, %p11910_p9  ;;  %p10020_p10 = scmp.lt.s32.totalorder %s10018_s15, %s10011_s6 }
  0xb0   : > { %p10015_p12 = pneg %p10014_p7  ;;  %p10021_p3 = por %p10020_p10, %p10019_p5 }
  0xb2   : > { %p10022_p13 = pnand %p10021_p3, %p10015_p12 }
  0xb4   : > { %10025 = shalt.err (!%p10022_p13)
}
  0xb5   : > { %s10142_s18 = smov 256   ;;  %s10143_s24 = smov 16  }
  0xb6   : > { %8942 = dma.hbm_to_vmem [thread:$0]  (!%p11911_p11), %s10432_s21, 65536, %s10434_s29, %s10306_s27, %s10142_s18, %s10142_s18, %s10143_s24  }
  0xb7   : > { %s7787_s28 = sshll.u32 %s10258_s23, 11  ;;  %s8674_s2 = sshll.u32 %s10132_s12, 15 }
  0xb8   : > { %s10463_s17 = scalar_lea.hbm %s11873_s5, %s8674_s2  ;;  %s403_s6 = scalar_lea.vmem [#allocation13], %s7787_s28 }
  0xb9   : > { %s410_s25 = sshll.u32 %s403_s6, 4  ;;  %s10026_s14 = scalar_lea.hbm %s10463_s17, 32768  ;;  %s10465_s25 = int_to_ptr.vmem [resolvable:$true] %s410_s25 }
  0xba   : > { %p10027_p1 = scmp.ne.s32.totalorder %s10463_s17, %s10026_s14  ;;  %s10031_s27 = scalar_lea.hbm %s11873_s5, 65536 }
  0xbb   : > { %p10032_p4 = scmp.lt.u32.totalorder %s10463_s17, %s11873_s5  ;;  %p10033_p0 = scmp.lt.u32.totalorder %s10031_s27, %s10026_s14 }
  0xbc   : > { %p10029_p2 = pnand %p10027_p1, %p11910_p9  ;;  %p10035_p7 = scmp.lt.u32.totalorder %s10026_s14, %s10463_s17 }
  0xbd   : > { %p10034_p8 = por %p10033_p0, %p10032_p4 }
  0xbe   : > { %p10030_p6 = pneg %p10029_p2 }
  0xbf   : > { %p10036_p12 = por %p10035_p7, %p10034_p8 }
  0xc1   : > { %p10037_p5 = pnand %p10036_p12, %p10030_p6 }
  0xc3   : > { %10040 = shalt.err (!%p10037_p5)
}
  0xc4   : > { %s10041_s15 = scalar_lea.vmem %s10465_s25, 32768  ;;  %s10144_s18 = smov [#allocation13]  }
  0xc5   : > { %p10042_p10 = scmp.ne.s32.totalorder %s10465_s25, %s10041_s15  ;;  %s10046_s24 = sshll.u32 %s10144_s18, 4  ;;  %s10047_s24 = int_to_ptr.vmem [resolvable:$false] %s10046_s24 }
  0xc6   : > { %s10048_s28 = scalar_lea.vmem %s10047_s24, 65536  ;;  %p10049_p1 = scmp.lt.s32.totalorder %s10465_s25, %s10047_s24 }
  0xc7   : > { %p10044_p3 = pnand %p10042_p10, %p11910_p9  ;;  %p10050_p2 = scmp.lt.s32.totalorder %s10048_s28, %s10041_s15 }
  0xc9   : > { %p10045_p13 = pneg %p10044_p3  ;;  %p10051_p4 = por %p10050_p2, %p10049_p1 }
  0xcb   : > { %p10052_p0 = pnand %p10051_p4, %p10045_p13 }
  0xcd   : > { %10055 = shalt.err (!%p10052_p0)
}
  0xce   : > { %s10145_s2 = smov 512   ;;  %s10146_s11 = smov 32  }
  0xcf   : > { %8948 = dma.hbm_to_vmem [thread:$0]  (!%p11911_p11), %s10463_s17, 32768, %s10465_s25, %s10349_s16, %s10145_s2, %s10145_s2, %s10146_s11  }
  0xd0   : > { %p11912_p9 = scmp.ne.s32.totalorder %s11899_s20, 0 }
  0xd1   : > { %s10492_s22 = sand.u32 (!%p11912_p9), 1, %s10124_s10   ;;  %p11913_p6 = scmp.ne.s32.totalorder (!%p11912_p9), %s11898_s19, 0 }
  0xd2   : > { %422 = sbr.rel (%p11912_p9) target bundleno = 1994 (0x7ca), region = 56  ;;  %s7791_s30 = sshll.u32 (!%p11912_p9), %s10492_s22, 7 }
  0xd3   : > { %s425_s6 = scalar_lea.sflag (!%p11912_p9), [#allocation6], %s10492_s22  ;;  %s10496_s14 = scalar_lea.vmem (!%p11912_p9), [#allocation5], %s7791_s30 }
  0xd9   : > { %10099 = dma.done.wait (%p11913_p6), %s425_s6, 2048  }
  0xda   : > { %10101 = vsyncadd (%p11913_p6), %s425_s6, 4294965248  ;;  %s433_s20 = sand.u32 1, %s10221_s13   ;;  %s436_s16 = scalar_lea.vmem [#allocation8], %s10492_s22 }
  0xdb   : > { %s434_s26 = scalar_lea.sflag [#allocation9], %s433_s20 }
  0xdc   : > { %10103 = dma.done.wait (%p11913_p6), %s434_s26, 65552  }
  0xdd   : > { %10105 = vsyncadd (%p11913_p6), %s434_s26, 4294901744  ;;  %s7792_s17 = sshll.u32 %s10492_s22, 12  ;;  %s7793_s25 = sshll.u32 %s10492_s22, 2 }
  0xde   : > { %s10510_s23 = scalar_lea.vmem [#allocation10], %s7792_s17  ;;  %s451_s12 = scalar_lea.sflag [#allocation12], %s433_s20 }
  0xdf   : > { %s10512_s27 = scalar_lea.vmem [#allocation11], %s7793_s25 }
  0xe0   : > { %10107 = dma.done.wait (%p11913_p6), %s451_s12, 32832  }
  0xe1   : > { %10109 = vsyncadd (%p11913_p6), %s451_s12, 4294934464  ;;  %s7794_s21 = sshll.u32 %s10492_s22, 11  ;;  %p11914_p11 = scmp.eq.s32.totalorder %s10221_s13, 0 }
  0xe2   : > { %s10519_s29 = scalar_lea.vmem [#allocation13], %s7794_s21 }
  0xe3   : > { %10111 = dma.done.wait (%p11914_p11), [#allocation15], 144   ;;  %p11915_p8 = pmov %p11914_p11 }
  0xe4   : > { %p525_p7 = scmp.lt.s32.totalorder %s10221_s13, 1  ;;  %p11916_p12 = scmp.ne.s32.totalorder %s10221_s13, 0 }
  0xe5   : > { %10113 = vsyncadd (%p11915_p8), [#allocation15], 4294967152  ;;  %v10147_v0 = vmov (!%p11916_p12), 0.0  }
  0xe6   : > { %s526_s15 = scalar_select %p525_p7, %s10221_s13, 1 }
  0xe7   : > { %534 = sbr.rel (%p11916_p12) target bundleno = 247 (0xf7), region = 88  ;;  %535 = vst [vmem:[#allocation2] sm:$0xff] (!%p11916_p12), %v10147_v0  ;;  %536 = vst [vmem:[#allocation2 + $0x8] sm:$0xff] (!%p11916_p12), %v10147_v0 }
  0xe8   : > { %s8675_s18 = sshll.u32 %s526_s15, 5  ;;  %537 = vst [vmem:[#allocation2 + $0x10] sm:$0xff] (!%p11916_p12), %v10147_v0  ;;  %538 = vst [vmem:[#allocation2 + $0x18] sm:$0xff] (!%p11916_p12), %v10147_v0 }
  0xe9   : > { %s10530_s19 = scalar_lea.vmem %s11868_s0, %s8675_s18  ;;  %539 = vst [vmem:[#allocation2 + $0x20] sm:$0xff] (!%p11916_p12), %v10147_v0  ;;  %540 = vst [vmem:[#allocation2 + $0x28] sm:$0xff] (!%p11916_p12), %v10147_v0 }
  0xea   : > { %541 = vst [vmem:[#allocation2 + $0x30] sm:$0xff] (!%p11916_p12), %v10147_v0  ;;  %542 = vst [vmem:[#allocation2 + $0x38] sm:$0xff] (!%p11916_p12), %v10147_v0 }
  0xeb   : > { %543 = vst [vmem:[#allocation2 + $0x40] sm:$0xff] (!%p11916_p12), %v10147_v0  ;;  %544 = vst [vmem:[#allocation2 + $0x48] sm:$0xff] (!%p11916_p12), %v10147_v0 }
  0xec   : > { %545 = vst [vmem:[#allocation2 + $0x50] sm:$0xff] (!%p11916_p12), %v10147_v0  ;;  %546 = vst [vmem:[#allocation2 + $0x58] sm:$0xff] (!%p11916_p12), %v10147_v0 }
  0xed   : > { %547 = vst [vmem:[#allocation2 + $0x60] sm:$0xff] (!%p11916_p12), %v10147_v0  ;;  %548 = vst [vmem:[#allocation2 + $0x68] sm:$0xff] (!%p11916_p12), %v10147_v0 }
  0xee   : > { %549 = vst [vmem:[#allocation2 + $0x70] sm:$0xff] %v10147_v0  ;;  %550 = vst [vmem:[#allocation2 + $0x78] sm:$0xff] %v10147_v0 }
  0xef   : > { %551 = vst [vmem:[#allocation2 + $0x80] sm:$0xff] %v10147_v0  ;;  %552 = vst [vmem:[#allocation2 + $0x88] sm:$0xff] %v10147_v0 }
  0xf0   : > { %553 = vst [vmem:[#allocation2 + $0x90] sm:$0xff] %v10147_v0  ;;  %554 = vst [vmem:[#allocation2 + $0x98] sm:$0xff] %v10147_v0 }
  0xf1   : > { %555 = vst [vmem:[#allocation2 + $0xa0] sm:$0xff] %v10147_v0  ;;  %556 = vst [vmem:[#allocation2 + $0xa8] sm:$0xff] %v10147_v0 }
  0xf2   : > { %557 = vst [vmem:[#allocation2 + $0xb0] sm:$0xff] %v10147_v0  ;;  %558 = vst [vmem:[#allocation2 + $0xb8] sm:$0xff] %v10147_v0 }
  0xf3   : > { %559 = vst [vmem:[#allocation2 + $0xc0] sm:$0xff] %v10147_v0  ;;  %560 = vst [vmem:[#allocation2 + $0xc8] sm:$0xff] %v10147_v0 }
  0xf4   : > { %561 = vst [vmem:[#allocation2 + $0xd0] sm:$0xff] %v10147_v0  ;;  %562 = vst [vmem:[#allocation2 + $0xd8] sm:$0xff] %v10147_v0 }
  0xf5   : > { %563 = vst [vmem:[#allocation2 + $0xe0] sm:$0xff] %v10147_v0  ;;  %564 = vst [vmem:[#allocation2 + $0xe8] sm:$0xff] %v10147_v0 }
  0xf6   : > { %565 = vst [vmem:[#allocation2 + $0xf0] sm:$0xff] %v10147_v0  ;;  %566 = vst [vmem:[#allocation2 + $0xf8] sm:$0xff] %v10147_v0 }
  0xf7 PF: > { %v659_v1 = vld [vmem:[%s10530_s19] sm:$0x3]  ;;  %s10148_s2 = smov 76   ;;  %s10149_s11 = smov 4   ;;  %v660_v3 = vld [vmem:[%s10530_s19 + $0x2] sm:$0x3] }
  0xf8   : > { %v567_v2 = vld [vmem:[%s10530_s19] sm:$0x3]  ;;  %691 = vrot.lane.b32.xlu0 %v659_v1, %s10148_s2  ;;  %v7800_v4 = vld [vmem:[%s10530_s19 + $0x2] sm:$0x3]  ;;  %v7801_v5 = vld [vmem:[%s10530_s19 + $0x4] sm:$0x3] }
  0xf9   : > { %597 = vrot.lane.b32.xlu1 %v567_v2, %s10149_s11  ;;  %v661_v6 = vld [vmem:[%s10530_s19 + $0x4] sm:$0x3]  ;;  %s10150_s30 = smov 20   ;;  %v9003_v9 = vld [vmem:[%s10496_s14 + $0x48] sm:$0xff]   ;;  %v662_v10 = vld [vmem:[%s10530_s19 + $0x6] sm:$0x3] }
  0xfa   : > { %v9001_v7 = vld [vmem:[%s10496_s14 + $0x40] sm:$0xff]   ;;  %v9004_v11 = vld [vmem:[%s10496_s14 + $0x8] sm:$0xff]   ;;  %v9005_v13 = vld [vmem:[%s10496_s14 + $0x50] sm:$0xff]   ;;  %vm739_vm0 = vcmask 1042016   ;;  %vm741_vm1 = vcmask 91136   ;;  %vm643_vm2 = vcmask 549920  }
  0xfb   : > { %v9002_v8 = vld [vmem:[%s10496_s14] sm:$0xff]   ;;  %8676 = vmatprep.subr.bf16.mxu0 %v9001_v7  ;;  %v9006_v14 = vld [vmem:[%s10496_s14 + $0x10] sm:$0xff]   ;;  %v9007_v17 = vld [vmem:[%s10496_s14 + $0x58] sm:$0xff]   ;;  %vm849_vm3 = vcmask 681120   ;;  %p11917_p5 = scmp.ne.s32.totalorder %s10221_s13, 0 }
  0xfc   : > { %693 = vrot.lane.b32.xlu0 %v660_v3, %s10148_s2  ;;  %8677 = vmatpush3.bf16.msra.mxu0 %v9002_v8  ;;  %v568_v12 = vld [vmem:[%s10530_s19 + $0x2] sm:$0x3]  ;;  %v569_v15 = vld [vmem:[%s10530_s19 + $0x4] sm:$0x3]  ;;  %v7802_v16 = vld [vmem:[%s10530_s19 + $0x6] sm:$0x3] }
  0xfd   : > { %804 = vrot.lane.b32.xlu1 %v7800_v4, %s10150_s30  ;;  %8678 = vmatprep.subr.bf16.mxu0 %v9003_v9  ;;  %v7803_v18 = vld [vmem:[%s10530_s19 + $0x8] sm:$0x3]  ;;  %v9008_v19 = vld [vmem:[%s10496_s14 + $0x18] sm:$0xff]   ;;  %v9009_v21 = vld [vmem:[%s10496_s14 + $0x60] sm:$0xff]  }
  0xfe   : > { %v663_v20 = vld [vmem:[%s10530_s19 + $0x8] sm:$0x3]  ;;  %v664_v22 = vld [vmem:[%s10530_s19 + $0xa] sm:$0x3]  ;;  %v9010_v23 = vld [vmem:[%s10496_s14 + $0x20] sm:$0xff]  }
  0xff   : > { %v570_v24 = vld [vmem:[%s10530_s19 + $0x6] sm:$0x3]  ;;  %v9011_v25 = vld [vmem:[%s10496_s14 + $0x68] sm:$0xff]   ;;  %v9013_v29 = vld [vmem:[%s10496_s14 + $0x70] sm:$0xff]  }
 0x100   : > { %806 = vrot.lane.b32.xlu0 %v7801_v5, %s10150_s30  ;;  %8679 = vmatpush3.bf16.msra.mxu0 %v9004_v11  ;;  %v9012_v26 = vld [vmem:[%s10496_s14 + $0x28] sm:$0xff]   ;;  %v9014_v30 = vld [vmem:[%s10496_s14 + $0x30] sm:$0xff]   ;;  %v9015_v31 = vld [vmem:[%s10496_s14 + $0x78] sm:$0xff]  }
 0x101   : > { %695 = vrot.lane.b32.xlu1 %v661_v6, %s10148_s2  ;;  %8680 = vmatprep.subr.bf16.mxu0 %v9005_v13  ;;  %v571_v27 = vld [vmem:[%s10530_s19 + $0x8] sm:$0x3]  ;;  %v7804_v28 = vld [vmem:[%s10530_s19 + $0xa] sm:$0x3]  ;;  %v7805_v32 = vld [vmem:[%s10530_s19 + $0xc] sm:$0x3] }
 0x102   : > { %v665_v33 = vld [vmem:[%s10530_s19 + $0xc] sm:$0x3]  ;;  %v9016_v34 = vld [vmem:[%s10496_s14 + $0x38] sm:$0xff]   ;;  %v666_v35 = vld [vmem:[%s10530_s19 + $0xe] sm:$0x3] }
 0x103   : > { %v572_v36 = vld [vmem:[%s10530_s19 + $0xa] sm:$0x3]  ;;  %v9017_v37 = vld [vmem:[%s10510_s23 + $0x4] ss:$16 sps:$4 sm:$0xff]   ;;  %v9021_v38 = vld [vmem:[%s10510_s23 + $0xc] ss:$16 sps:$4 sm:$0xff]  }
 0x104   : > { %697 = vrot.lane.b32.xlu0 %v662_v10, %s10148_s2  ;;  %8681 = vmatpush3.bf16.msra.mxu0 %v9006_v14  ;;  %v9022_v39 = vld [vmem:[%s10510_s23] ss:$16 sps:$4 sm:$0xff]   ;;  %v9023_v40 = vld [vmem:[%s10510_s23 + $0x24] ss:$16 sps:$4 sm:$0xff]   ;;  %v573_v41 = vld [vmem:[%s10530_s19 + $0xc] sm:$0x3] }
 0x105   : > { %599 = vrot.lane.b32.xlu1 %v568_v12, %s10149_s11  ;;  %8682 = vmatprep.subr.bf16.mxu0 %v9007_v17  ;;  %v7806_v42 = vld [vmem:[%s10530_s19 + $0xe] sm:$0x3]  ;;  %v9028_v43 = vld [vmem:[%s10510_s23 + $0x20] ss:$16 sps:$4 sm:$0xff]   ;;  %v9029_v44 = vld [vmem:[%s10510_s23 + $0x44] ss:$16 sps:$4 sm:$0xff]  }
 0x106   : > { %4303 = vmatprep.subr.bf16.mxu1 %v9017_v37  ;;  %v7807_v45 = vld [vmem:[%s10530_s19 + $0x10] sm:$0x3]  ;;  %v9034_v47 = vld [vmem:[%s10510_s23 + $0x40] ss:$16 sps:$4 sm:$0xff]   ;;  %v9035_v48 = vld [vmem:[%s10510_s23 + $0x64] ss:$16 sps:$4 sm:$0xff]  }
 0x107   : > { %4304 = vmatpush1.bf16.msra.mxu1 %v9022_v39  ;;  %v667_v46 = vld [vmem:[%s10530_s19 + $0x10] sm:$0x3]  ;;  %v668_v49 = vld [vmem:[%s10530_s19 + $0x12] sm:$0x3]  ;;  %v574_v50 = vld [vmem:[%s10530_s19 + $0xe] sm:$0x3] }
 0x108   : > { %601 = vrot.lane.b32.xlu0 %v569_v15, %s10149_s11  ;;  %8683 = vmatpush3.bf16.msra.mxu0 %v9008_v19  ;;  %v9040_v51 = vld [vmem:[%s10510_s23 + $0x60] ss:$16 sps:$4 sm:$0xff]   ;;  %v9041_v52 = vld [vmem:[%s10510_s23 + $0x84] ss:$16 sps:$4 sm:$0xff]   ;;  %v575_v53 = vld [vmem:[%s10530_s19 + $0x10] sm:$0x3] }
 0x109   : > { %808 = vrot.lane.b32.xlu1 %v7802_v16, %s10150_s30  ;;  %8684 = vmatprep.subr.bf16.mxu0 %v9009_v21  ;;  %v7808_v54 = vld [vmem:[%s10530_s19 + $0x12] sm:$0x3]  ;;  %v9047_v56 = vld [vmem:[%s10510_s23 + $0xa4] ss:$16 sps:$4 sm:$0xff]   ;;  %v7809_v57 = vld [vmem:[%s10530_s19 + $0x14] sm:$0x3] }
 0x10a   : > { %4305 = vmatprep.subr.bf16.mxu1 %v9023_v40  ;;  %v9046_v55 = vld [vmem:[%s10510_s23 + $0x80] ss:$16 sps:$4 sm:$0xff]   ;;  %v9053_v60 = vld [vmem:[%s10510_s23 + $0xc4] ss:$16 sps:$4 sm:$0xff]   ;;  %v672_v9 = vld [vmem:[%s10530_s19 + $0x1a] sm:$0x3] }
 0x10b   : > { %4306 = vmatpush1.bf16.msra.mxu1 %v9028_v43  ;;  %v669_v58 = vld [vmem:[%s10530_s19 + $0x14] sm:$0x3]  ;;  %v670_v61 = vld [vmem:[%s10530_s19 + $0x16] sm:$0x3]  ;;  %v576_v62 = vld [vmem:[%s10530_s19 + $0x12] sm:$0x3] }
 0x10c   : > { %810 = vrot.lane.b32.xlu0 %v7803_v18, %s10150_s30  ;;  %8685 = vmatpush3.bf16.msra.mxu0 %v9010_v23  ;;  %v9052_v59 = vld [vmem:[%s10510_s23 + $0xa0] ss:$16 sps:$4 sm:$0xff]   ;;  %v9059_v0 = vld [vmem:[%s10510_s23 + $0xe4] ss:$16 sps:$4 sm:$0xff]   ;;  %v7812_v14 = vld [vmem:[%s10530_s19 + $0x1a] sm:$0x3] }
 0x10d   : > { %699 = vrot.lane.b32.xlu1 %v663_v20, %s10148_s2  ;;  %8686 = vmatprep.subr.bf16.mxu0 %v9011_v25  ;;  %v9058_v63 = vld [vmem:[%s10510_s23 + $0xc0] ss:$16 sps:$4 sm:$0xff]   ;;  %v7810_v2 = vld [vmem:[%s10530_s19 + $0x16] sm:$0x3]  ;;  %v7811_v5 = vld [vmem:[%s10530_s19 + $0x18] sm:$0x3] }
 0x10e   : > { %4307 = vmatprep.subr.bf16.mxu1 %v9029_v44  ;;  %v577_v1 = vld [vmem:[%s10530_s19 + $0x14] sm:$0x3]  ;;  %v9065_v4 = vld [vmem:[%s10510_s23 + $0x104] ss:$16 sps:$4 sm:$0xff]   ;;  %v7813_v17 = vld [vmem:[%s10530_s19 + $0x1c] sm:$0x3] }
 0x10f   : > { %4308 = vmatpush1.bf16.msra.mxu1 %v9034_v47  ;;  %v9064_v3 = vld [vmem:[%s10510_s23 + $0xe0] ss:$16 sps:$4 sm:$0xff]   ;;  %v671_v6 = vld [vmem:[%s10530_s19 + $0x18] sm:$0x3]  ;;  %v578_v10 = vld [vmem:[%s10530_s19 + $0x16] sm:$0x3] }
 0x110   : > { %701 = vrot.lane.b32.xlu0 %v664_v22, %s10148_s2  ;;  %8687 = vmatpush3.bf16.msra.mxu0 %v9012_v26  ;;  %v9070_v7 = vld [vmem:[%s10510_s23 + $0x100] ss:$16 sps:$4 sm:$0xff]   ;;  %v9071_v8 = vld [vmem:[%s10510_s23 + $0x124] ss:$16 sps:$4 sm:$0xff]   ;;  %v673_v18 = vld [vmem:[%s10530_s19 + $0x1c] sm:$0x3] }
 0x111   : > { %603 = vrot.lane.b32.xlu1 %v570_v24, %s10149_s11  ;;  %8688 = vmatprep.subr.bf16.mxu0 %v9013_v29  ;;  %v9076_v11 = vld [vmem:[%s10510_s23 + $0x120] ss:$16 sps:$4 sm:$0xff]   ;;  %v9077_v12 = vld [vmem:[%s10510_s23 + $0x144] ss:$16 sps:$4 sm:$0xff]   ;;  %v580_v21 = vld [vmem:[%s10530_s19 + $0x1a] sm:$0x3] }
 0x112   : > { %4309 = vmatprep.subr.bf16.mxu1 %v9035_v48  ;;  %v579_v13 = vld [vmem:[%s10530_s19 + $0x18] sm:$0x3]  ;;  %v9082_v15 = vld [vmem:[%s10510_s23 + $0x140] ss:$16 sps:$4 sm:$0xff]   ;;  %v581_v22 = vld [vmem:[%s10530_s19 + $0x1c] sm:$0x3] }
 0x113   : > { %4310 = vmatpush1.bf16.msra.mxu1 %v9040_v51  ;;  %v9083_v16 = vld [vmem:[%s10510_s23 + $0x164] ss:$16 sps:$4 sm:$0xff]   ;;  %v9088_v19 = vld [vmem:[%s10510_s23 + $0x160] ss:$16 sps:$4 sm:$0xff]   ;;  %v674_v24 = vld [vmem:[%s10530_s19 + $0x1e] sm:$0x3] }
 0x114   : > { %605 = vrot.lane.b32.xlu0 %v571_v27, %s10149_s11  ;;  %8689 = vmatpush3.bf16.msra.mxu0 %v9014_v30  ;;  %v9089_v20 = vld [vmem:[%s10510_s23 + $0x184] ss:$16 sps:$4 sm:$0xff]   ;;  %v9094_v23 = vld [vmem:[%s10510_s23 + $0x180] ss:$16 sps:$4 sm:$0xff]   ;;  %v7814_v25 = vld [vmem:[%s10530_s19 + $0x1e] sm:$0x3] }
 0x115   : > { %812 = vrot.lane.b32.xlu1 %v7804_v28, %s10150_s30  ;;  %8690 = vmatprep.subr.bf16.mxu0 %v9015_v31  ;;  %v9019_v37 = vld [vmem:[%s10510_s23 + $0x8] ss:$16 sps:$4 sm:$0xff]   ;;  %v9033_v47 = vld [vmem:[%s10510_s23 + $0x4c] ss:$16 sps:$4 sm:$0xff]  }
 0x116   : > { %4311 = vmatprep.subr.bf16.mxu1 %v9041_v52  ;;  %v9025_v44 = vld [vmem:[%s10510_s23 + $0x28] ss:$16 sps:$4 sm:$0xff]  }
 0x117   : > { %4312 = vmatpush1.bf16.msra.mxu1 %v9046_v55  ;;  %v9037_v55 = vld [vmem:[%s10510_s23 + $0x68] ss:$16 sps:$4 sm:$0xff]  }
 0x118   : > { %814 = vrot.lane.b32.xlu0 %v7805_v32, %s10150_s30  ;;  %8691 = vmatpush3.bf16.msra.mxu0 %v9016_v34 }
 0x119   : > { %703 = vrot.lane.b32.xlu1 %v665_v33, %s10148_s2  ;;  %4631 = vmatprep.subr.bf16.mxu0 %v9021_v38 }
 0x11a   : > { %4313 = vmatprep.subr.bf16.mxu1 %v9047_v56 }
 0x11b   : > { %4314 = vmatpush1.bf16.msra.mxu1 %v9052_v59 }
 0x11c   : > { %705 = vrot.lane.b32.xlu0 %v666_v35, %s10148_s2  ;;  %4315 = vmatprep.subr.bf16.mxu1 %v9053_v60  ;;  %v9045_v60 = vld [vmem:[%s10510_s23 + $0x8c] ss:$16 sps:$4 sm:$0xff]  }
 0x11d   : > { %607 = vrot.lane.b32.xlu1 %v572_v36, %s10149_s11 }
 0x11f   : > { %4316 = vmatpush1.bf16.msra.mxu1 %v9058_v63 }
 0x120   : > { %609 = vrot.lane.b32.xlu0 %v573_v41, %s10149_s11  ;;  %4317 = vmatprep.subr.bf16.mxu1 %v9059_v0  ;;  %v9027_v41 = vld [vmem:[%s10510_s23 + $0x2c] ss:$16 sps:$4 sm:$0xff]  }
 0x121   : > { %816 = vrot.lane.b32.xlu1 %v7806_v42, %s10150_s30 }
 0x123   : > { %4318 = vmatpush1.bf16.msra.mxu1 %v9064_v3  ;;  %v9049_v3 = vld [vmem:[%s10510_s23 + $0xa8] ss:$16 sps:$4 sm:$0xff]  }
 0x124   : > { %818 = vrot.lane.b32.xlu0 %v7807_v45, %s10150_s30  ;;  %4319 = vmatprep.subr.bf16.mxu1 %v9065_v4 }
 0x125   : > { %707 = vrot.lane.b32.xlu1 %v667_v46, %s10148_s2 }
 0x127   : > { %4320 = vmatpush1.bf16.msra.mxu1 %v9070_v7 }
 0x128   : > { %709 = vrot.lane.b32.xlu0 %v668_v49, %s10148_s2  ;;  %4321 = vmatprep.subr.bf16.mxu1 %v9071_v8  ;;  %v9031_v49 = vld [vmem:[%s10510_s23 + $0x48] ss:$16 sps:$4 sm:$0xff]  }
 0x129   : > { %611 = vrot.lane.b32.xlu1 %v574_v50, %s10149_s11 }
 0x12b   : > { %4322 = vmatpush1.bf16.msra.mxu1 %v9076_v11 }
 0x12c   : > { %613 = vrot.lane.b32.xlu0 %v575_v53, %s10149_s11  ;;  %4323 = vmatprep.subr.bf16.mxu1 %v9077_v12  ;;  %v9039_v53 = vld [vmem:[%s10510_s23 + $0x6c] ss:$16 sps:$4 sm:$0xff]  }
 0x12d   : > { %820 = vrot.lane.b32.xlu1 %v7808_v54, %s10150_s30 }
 0x12f   : > { %4324 = vmatpush1.bf16.msra.mxu1 %v9082_v15 }
 0x130   : > { %822 = vrot.lane.b32.xlu0 %v7809_v57, %s10150_s30  ;;  %4325 = vmatprep.subr.bf16.mxu1 %v9083_v16  ;;  %v9061_v16 = vld [vmem:[%s10510_s23 + $0xe8] ss:$16 sps:$4 sm:$0xff]  }
 0x131   : > { %711 = vrot.lane.b32.xlu1 %v669_v58, %s10148_s2 }
 0x133   : > { %4326 = vmatpush1.bf16.msra.mxu1 %v9088_v19  ;;  %v9069_v19 = vld [vmem:[%s10510_s23 + $0x10c] ss:$16 sps:$4 sm:$0xff]  }
 0x134   : > { %713 = vrot.lane.b32.xlu0 %v670_v61, %s10148_s2  ;;  %4327 = vmatprep.subr.bf16.mxu1 %v9089_v20 }
 0x135   : > { %615 = vrot.lane.b32.xlu1 %v576_v62, %s10149_s11  ;;  %v9043_v62 = vld [vmem:[%s10510_s23 + $0x88] ss:$16 sps:$4 sm:$0xff]  }
 0x137   : > { %4328 = vmatpush1.bf16.msra.mxu1 %v9094_v23  ;;  %v9075_v23 = vld [vmem:[%s10510_s23 + $0x12c] ss:$16 sps:$4 sm:$0xff]  }
 0x138   : > { %617 = vrot.lane.b32.xlu0 %v577_v1, %s10149_s11  ;;  %v9051_v1 = vld [vmem:[%s10510_s23 + $0xac] ss:$16 sps:$4 sm:$0xff]  }
 0x139   : > { %824 = vrot.lane.b32.xlu1 %v7810_v2, %s10150_s30 }
 0x13c   : > { %826 = vrot.lane.b32.xlu0 %v7811_v5, %s10150_s30 }
 0x13d   : > { %715 = vrot.lane.b32.xlu1 %v671_v6, %s10148_s2  ;;  %v9057_v6 = vld [vmem:[%s10510_s23 + $0xcc] ss:$16 sps:$4 sm:$0xff]  }
 0x140   : > { %717 = vrot.lane.b32.xlu0 %v672_v9, %s10148_s2  ;;  %v9055_v9 = vld [vmem:[%s10510_s23 + $0xc8] ss:$16 sps:$4 sm:$0xff]  }
 0x141   : > { %619 = vrot.lane.b32.xlu1 %v578_v10, %s10149_s11 }
 0x144   : > { %621 = vrot.lane.b32.xlu0 %v579_v13, %s10149_s11  ;;  %v9063_v13 = vld [vmem:[%s10510_s23 + $0xec] ss:$16 sps:$4 sm:$0xff]  }
 0x145   : > { %828 = vrot.lane.b32.xlu1 %v7812_v14, %s10150_s30 }
 0x148   : > { %830 = vrot.lane.b32.xlu0 %v7813_v17, %s10150_s30 }
 0x149   : > { %719 = vrot.lane.b32.xlu1 %v673_v18, %s10148_s2 }
 0x14c   : > { %623 = vrot.lane.b32.xlu0 %v580_v21, %s10149_s11  ;;  %v9067_v21 = vld [vmem:[%s10510_s23 + $0x108] ss:$16 sps:$4 sm:$0xff]  }
 0x14d   : > { %625 = vrot.lane.b32.xlu1 %v581_v22, %s10149_s11 }
 0x150   : > { %721 = vrot.lane.b32.xlu0 %v674_v24, %s10148_s2 }
 0x151   : > { %832 = vrot.lane.b32.xlu1 %v7814_v25, %s10150_s30 }
 0x16a   : > { %v692_v26 = vpop.permute.xlu0 %691 }
 0x16b   : > { %v598_v27 = vpop.permute.xlu1 %597  ;;  %740 = vst.msk [vmem:[#allocation2] sm:$0x3] %vm739_vm0, %v692_v26 }
 0x16c   : > { %742 = vst.msk [vmem:[#allocation2 + $0x8] sm:$0x3] %vm741_vm1, %v692_v26 }
 0x16d   : > { %644 = vst.msk [vmem:[#allocation2 + $0x10] sm:$0x3] %vm643_vm2, %v598_v27  ;;  %v9073_v27 = vld [vmem:[%s10510_s23 + $0x128] ss:$16 sps:$4 sm:$0xff]  }
 0x16e   : > { %v694_v28 = vpop.permute.xlu0 %693 }
 0x16f   : > { %v805_v29 = vpop.permute.xlu1 %804  ;;  %743 = vst.msk [vmem:[#allocation2 + $0x10] sm:$0x3] %vm739_vm0, %v694_v28 }
 0x170   : > { %744 = vst.msk [vmem:[#allocation2 + $0x18] sm:$0x3] %vm741_vm1, %v694_v28 }
 0x171   : > { %850 = vst.msk [vmem:[#allocation2 + $0x8] sm:$0x3] %vm849_vm3, %v805_v29 }
 0x172   : > { %v807_v30 = vpop.permute.xlu0 %806  ;;  %v865_v36 = vld [vmem:[#allocation2] sm:$0xff] }
 0x173   : > { %v696_v31 = vpop.permute.xlu1 %695  ;;  %851 = vst.msk [vmem:[#allocation2 + $0x18] sm:$0x3] %vm849_vm3, %v807_v30 }
 0x174   : > { %746 = vst.msk [vmem:[#allocation2 + $0x28] sm:$0x3] %vm741_vm1, %v696_v31 }
 0x176   : > { %v698_v33 = vpop.permute.xlu0 %697  ;;  %v867_v35 = vld [vmem:[#allocation2 + $0x10] sm:$0xff] }
 0x177   : > { %v600_v34 = vpop.permute.xlu1 %599  ;;  %748 = vst.msk [vmem:[#allocation2 + $0x38] sm:$0x3] %vm741_vm1, %v698_v33  ;;  %v897_v43 = vpack.c.bf16 %v867_v35, %v865_v36 }
 0x178   : > { %v866_v32 = vld [vmem:[#allocation2 + $0x8] sm:$0xff]  ;;  %645 = vst.msk [vmem:[#allocation2 + $0x20] sm:$0x3] %vm643_vm2, %v600_v34 }
 0x179   : > { %745 = vst.msk [vmem:[#allocation2 + $0x20] sm:$0x3] %vm739_vm0, %v696_v31  ;;  %v9081_v31 = vld [vmem:[%s10510_s23 + $0x14c] ss:$16 sps:$4 sm:$0xff]   ;;  %v9079_v34 = vld [vmem:[%s10510_s23 + $0x148] ss:$16 sps:$4 sm:$0xff]  }
 0x17a   : > { %v868_v38 = vld [vmem:[#allocation2 + $0x18] sm:$0xff]  ;;  %v602_v39 = vpop.permute.xlu0 %601 }
 0x17b   : > { %v809_v40 = vpop.permute.xlu1 %808  ;;  %v898_v42 = vpack.c.bf16 %v868_v38, %v866_v32  ;;  %646 = vst.msk [vmem:[#allocation2 + $0x30] sm:$0x3] %vm643_vm2, %v602_v39  ;;  %v9085_v39 = vld [vmem:[%s10510_s23 + $0x168] ss:$16 sps:$4 sm:$0xff]  }
 0x17c   : > { %852 = vst.msk [vmem:[#allocation2 + $0x28] sm:$0x3] %vm849_vm3, %v809_v40 }
 0x17d   : > { %747 = vst.msk [vmem:[#allocation2 + $0x30] sm:$0x3] %vm739_vm0, %v698_v33  ;;  %1080 = vmatprep.mubr.bf16.mxu0 %v898_v42 }
 0x17e   : > { %1081 = vmatmul.mubr.bf16.vlgmr.msra.gmra.mrb[0].mxu0 %v897_v43  ;;  %v811_v45 = vpop.permute.xlu0 %810 }
 0x17f   : > { %v700_v46 = vpop.permute.xlu1 %699  ;;  %853 = vst.msk [vmem:[#allocation2 + $0x38] sm:$0x3] %vm849_vm3, %v811_v45  ;;  %4632 = vmatpush1.bf16.msra.mxu0 %v9019_v37  ;;  %v9087_v37 = vld [vmem:[%s10510_s23 + $0x16c] ss:$16 sps:$4 sm:$0xff]   ;;  %v9091_v45 = vld [vmem:[%s10510_s23 + $0x188] ss:$16 sps:$4 sm:$0xff]  }
 0x180   : > { %750 = vst.msk [vmem:[#allocation2 + $0x48] sm:$0x3] %vm741_vm1, %v700_v46  ;;  %4633 = vmatprep.subr.bf16.mxu0 %v9027_v41  ;;  %v869_v48 = vld [vmem:[#allocation2 + $0x20] sm:$0xff] }
 0x181   : > { %v9093_v41 = vld [vmem:[%s10510_s23 + $0x18c] ss:$16 sps:$4 sm:$0xff]  }
 0x182   : > { %v702_v51 = vpop.permute.xlu0 %701 }
 0x183   : > { %v870_v50 = vld [vmem:[#allocation2 + $0x28] sm:$0xff]  ;;  %v604_v52 = vpop.permute.xlu1 %603  ;;  %752 = vst.msk [vmem:[#allocation2 + $0x58] sm:$0x3] %vm741_vm1, %v702_v51  ;;  %4634 = vmatpush1.bf16.msra.mxu0 %v9025_v44 }
 0x184   : > { %v871_v54 = vld [vmem:[#allocation2 + $0x30] sm:$0xff]  ;;  %647 = vst.msk [vmem:[#allocation2 + $0x40] sm:$0x3] %vm643_vm2, %v604_v52  ;;  %4635 = vmatprep.subr.bf16.mxu0 %v9033_v47 }
 0x185   : > { %749 = vst.msk [vmem:[#allocation2 + $0x40] sm:$0x3] %vm739_vm0, %v700_v46  ;;  %v899_v57 = vpack.c.bf16 %v871_v54, %v869_v48 }
 0x186   : > { %v872_v56 = vld [vmem:[#allocation2 + $0x38] sm:$0xff]  ;;  %v606_v58 = vpop.permute.xlu0 %605 }
 0x187   : > { %v813_v59 = vpop.permute.xlu1 %812  ;;  %v900_v61 = vpack.c.bf16 %v872_v56, %v870_v50  ;;  %648 = vst.msk [vmem:[#allocation2 + $0x50] sm:$0x3] %vm643_vm2, %v606_v58  ;;  %4636 = vmatpush1.bf16.msra.mxu0 %v9031_v49 }
 0x188   : > { %854 = vst.msk [vmem:[#allocation2 + $0x48] sm:$0x3] %vm849_vm3, %v813_v59  ;;  %4637 = vmatprep.subr.bf16.mxu0 %v9039_v53 }
 0x189   : > { %751 = vst.msk [vmem:[#allocation2 + $0x50] sm:$0x3] %vm739_vm0, %v702_v51  ;;  %1088 = vmatprep.mubr.bf16.mxu0 %v900_v61 }
 0x18a   : > { %1089 = vmatmul.mubr.bf16.gmra.mrb[4].mxu0 %v899_v57  ;;  %v815_v63 = vpop.permute.xlu0 %814 }
 0x18b   : > { %855 = vst.msk [vmem:[#allocation2 + $0x58] sm:$0x3] %vm849_vm3, %v815_v63  ;;  %v704_v0 = vpop.permute.xlu1 %703  ;;  %4638 = vmatpush1.bf16.msra.mxu0 %v9037_v55 }
 0x18c   : > { %754 = vst.msk [vmem:[#allocation2 + $0x68] sm:$0x3] %vm741_vm1, %v704_v0  ;;  %4639 = vmatprep.subr.bf16.mxu0 %v9045_v60  ;;  %v873_v2 = vld [vmem:[#allocation2 + $0x40] sm:$0xff] }
 0x18e   : > { %v706_v5 = vpop.permute.xlu0 %705 }
 0x18f   : > { %v874_v4 = vld [vmem:[#allocation2 + $0x48] sm:$0xff]  ;;  %756 = vst.msk [vmem:[#allocation2 + $0x78] sm:$0x3] %vm741_vm1, %v706_v5  ;;  %v608_v8 = vpop.permute.xlu1 %607  ;;  %4640 = vmatpush1.bf16.msra.mxu0 %v9043_v62 }
 0x190   : > { %v875_v7 = vld [vmem:[#allocation2 + $0x50] sm:$0xff]  ;;  %649 = vst.msk [vmem:[#allocation2 + $0x60] sm:$0x3] %vm643_vm2, %v608_v8  ;;  %4641 = vmatprep.subr.bf16.mxu0 %v9051_v1 }
 0x191   : > { %753 = vst.msk [vmem:[#allocation2 + $0x60] sm:$0x3] %vm739_vm0, %v704_v0  ;;  %v901_v11 = vpack.c.bf16 %v875_v7, %v873_v2 }
 0x192   : > { %v876_v10 = vld [vmem:[#allocation2 + $0x58] sm:$0xff]  ;;  %v610_v12 = vpop.permute.xlu0 %609 }
 0x193   : > { %v902_v14 = vpack.c.bf16 %v876_v10, %v874_v4  ;;  %650 = vst.msk [vmem:[#allocation2 + $0x70] sm:$0x3] %vm643_vm2, %v610_v12  ;;  %v817_v15 = vpop.permute.xlu1 %816  ;;  %4642 = vmatpush1.bf16.msra.mxu0 %v9049_v3  ;;  %v9099_v12 = vld [vmem:[%s10510_s23 + $0x1ac] ss:$16 sps:$4 sm:$0xff]  }
 0x194   : > { %755 = vst.msk [vmem:[#allocation2 + $0x70] sm:$0x3] %vm739_vm0, %v706_v5  ;;  %4643 = vmatprep.subr.bf16.mxu0 %v9057_v6 }
 0x195   : > { %856 = vst.msk [vmem:[#allocation2 + $0x68] sm:$0x3] %vm849_vm3, %v817_v15  ;;  %1096 = vmatprep.mubr.bf16.mxu0 %v902_v14  ;;  %v9100_v14 = vld [vmem:[%s10510_s23 + $0x1a0] ss:$16 sps:$4 sm:$0xff]  }
 0x196   : > { %1097 = vmatmul.mubr.bf16.gmra.mrb[8].mxu0 %v901_v11  ;;  %v819_v17 = vpop.permute.xlu0 %818  ;;  %v9095_v11 = vld [vmem:[%s10510_s23 + $0x1a4] ss:$16 sps:$4 sm:$0xff]  }
 0x197   : > { %857 = vst.msk [vmem:[#allocation2 + $0x78] sm:$0x3] %vm849_vm3, %v819_v17  ;;  %v708_v18 = vpop.permute.xlu1 %707  ;;  %4644 = vmatpush1.bf16.msra.mxu0 %v9055_v9  ;;  %4329 = vmatprep.subr.bf16.mxu1 %v9095_v11  ;;  %v9145_v11 = vld [vmem:[%s10510_s23 + $0x2a4] ss:$16 sps:$4 sm:$0xff]  }
 0x198   : > { %758 = vst.msk [vmem:[#allocation2 + $0x88] sm:$0x3] %vm741_vm1, %v708_v18  ;;  %4645 = vmatprep.subr.bf16.mxu0 %v9063_v13  ;;  %v877_v20 = vld [vmem:[#allocation2 + $0x60] sm:$0xff]  ;;  %v9097_v13 = vld [vmem:[%s10510_s23 + $0x1a8] ss:$16 sps:$4 sm:$0xff]   ;;  %4330 = vmatpush1.bf16.msra.mxu1 %v9100_v14 }
 0x19a   : > { %v710_v22 = vpop.permute.xlu0 %709 }
 0x19b   : > { %760 = vst.msk [vmem:[#allocation2 + $0x98] sm:$0x3] %vm741_vm1, %v710_v22  ;;  %v612_v24 = vpop.permute.xlu1 %611  ;;  %v879_v26 = vld [vmem:[#allocation2 + $0x70] sm:$0xff]  ;;  %4646 = vmatpush1.bf16.msra.mxu0 %v9061_v16 }
 0x19c   : > { %v878_v25 = vld [vmem:[#allocation2 + $0x68] sm:$0xff]  ;;  %651 = vst.msk [vmem:[#allocation2 + $0x80] sm:$0x3] %vm643_vm2, %v612_v24  ;;  %4647 = vmatprep.subr.bf16.mxu0 %v9069_v19  ;;  %v903_v30 = vpack.c.bf16 %v879_v26, %v877_v20 }
 0x19d   : > { %757 = vst.msk [vmem:[#allocation2 + $0x80] sm:$0x3] %vm739_vm0, %v708_v18  ;;  %v9101_v18 = vld [vmem:[%s10510_s23 + $0x1c4] ss:$16 sps:$4 sm:$0xff]   ;;  %v9105_v19 = vld [vmem:[%s10510_s23 + $0x1cc] ss:$16 sps:$4 sm:$0xff]  }
 0x19e   : > { %v614_v28 = vpop.permute.xlu0 %613  ;;  %v880_v29 = vld [vmem:[#allocation2 + $0x78] sm:$0xff]  ;;  %4331 = vmatprep.subr.bf16.mxu1 %v9101_v18 }
 0x19f   : > { %652 = vst.msk [vmem:[#allocation2 + $0x90] sm:$0x3] %vm643_vm2, %v614_v28  ;;  %v821_v32 = vpop.permute.xlu1 %820  ;;  %v904_v33 = vpack.c.bf16 %v880_v29, %v878_v25  ;;  %4648 = vmatpush1.bf16.msra.mxu0 %v9067_v21  ;;  %v9103_v21 = vld [vmem:[%s10510_s23 + $0x1c8] ss:$16 sps:$4 sm:$0xff]   ;;  %v9107_v25 = vld [vmem:[%s10510_s23 + $0x1e4] ss:$16 sps:$4 sm:$0xff]  }
 0x1a0   : > { %759 = vst.msk [vmem:[#allocation2 + $0x90] sm:$0x3] %vm739_vm0, %v710_v22  ;;  %4649 = vmatprep.subr.bf16.mxu0 %v9075_v23  ;;  %v9106_v23 = vld [vmem:[%s10510_s23 + $0x1c0] ss:$16 sps:$4 sm:$0xff]   ;;  %v9111_v26 = vld [vmem:[%s10510_s23 + $0x1ec] ss:$16 sps:$4 sm:$0xff]  }
 0x1a1   : > { %858 = vst.msk [vmem:[#allocation2 + $0x88] sm:$0x3] %vm849_vm3, %v821_v32  ;;  %1104 = vmatprep.mubr.bf16.mxu0 %v904_v33  ;;  %4332 = vmatpush1.bf16.msra.mxu1 %v9106_v23  ;;  %v9112_v28 = vld [vmem:[%s10510_s23 + $0x1e0] ss:$16 sps:$4 sm:$0xff]   ;;  %v9115_v29 = vld [vmem:[%s10510_s23 + $0x204] ss:$16 sps:$4 sm:$0xff]  }
 0x1a2   : > { %v823_v35 = vpop.permute.xlu0 %822  ;;  %1105 = vmatmul.mubr.bf16.gmra.mrb[12].mxu0 %v903_v30  ;;  %4333 = vmatprep.subr.bf16.mxu1 %v9107_v25  ;;  %v9118_v30 = vld [vmem:[%s10510_s23 + $0x20c] ss:$16 sps:$4 sm:$0xff]   ;;  %v9155_v23 = vld [vmem:[%s10510_s23 + $0x2e0] ss:$16 sps:$4 sm:$0xff]   ;;  %v9163_v25 = vld [vmem:[%s10510_s23 + $0x304] ss:$16 sps:$4 sm:$0xff]  }
 0x1a3   : > { %859 = vst.msk [vmem:[#allocation2 + $0x98] sm:$0x3] %vm849_vm3, %v823_v35  ;;  %v712_v36 = vpop.permute.xlu1 %711  ;;  %4650 = vmatpush1.bf16.msra.mxu0 %v9073_v27  ;;  %v9109_v27 = vld [vmem:[%s10510_s23 + $0x1e8] ss:$16 sps:$4 sm:$0xff]   ;;  %v10772_v32 = vld [vmem:[%s436_s16] ss:$0 sm:$0xff] }
 0x1a4   : > { %762 = vst.msk [vmem:[#allocation2 + $0xa8] sm:$0x3] %vm741_vm1, %v712_v36  ;;  %4651 = vmatprep.subr.bf16.mxu0 %v9081_v31  ;;  %v881_v38 = vld [vmem:[#allocation2 + $0x80] sm:$0xff] }
 0x1a5   : > { %4334 = vmatpush1.bf16.msra.mxu1 %v9112_v28  ;;  %v9154_v18 = vld [vmem:[%s10510_s23 + $0x2cc] ss:$16 sps:$4 sm:$0xff]   ;;  %v9164_v28 = vld [vmem:[%s10510_s23 + $0x308] ss:$16 sps:$4 sm:$0xff]  }
 0x1a6   : > { %v714_v40 = vpop.permute.xlu0 %713  ;;  %4344 = vmatprep.subr.bf16.mxu1 %v9115_v29  ;;  %v9169_v29 = vld [vmem:[%s10510_s23 + $0x324] ss:$16 sps:$4 sm:$0xff]  }
 0x1a7   : > { %764 = vst.msk [vmem:[#allocation2 + $0xb8] sm:$0x3] %vm741_vm1, %v714_v40  ;;  %v616_v42 = vpop.permute.xlu1 %615  ;;  %v883_v44 = vld [vmem:[#allocation2 + $0x90] sm:$0xff]  ;;  %4652 = vmatpush1.bf16.msra.mxu0 %v9079_v34 }
 0x1a8   : > { %v882_v43 = vld [vmem:[#allocation2 + $0x88] sm:$0xff]  ;;  %653 = vst.msk [vmem:[#allocation2 + $0xa0] sm:$0x3] %vm643_vm2, %v616_v42  ;;  %4653 = vmatprep.subr.bf16.mxu0 %v9087_v37  ;;  %v905_v48 = vpack.c.bf16 %v883_v44, %v881_v38 }
 0x1a9   : > { %761 = vst.msk [vmem:[#allocation2 + $0xa0] sm:$0x3] %vm739_vm0, %v712_v36  ;;  %v9116_v44 = vld [vmem:[%s10510_s23 + $0x208] ss:$16 sps:$4 sm:$0xff]  }
 0x1aa   : > { %v618_v46 = vpop.permute.xlu0 %617  ;;  %v884_v47 = vld [vmem:[#allocation2 + $0x98] sm:$0xff] }
 0x1ab   : > { %654 = vst.msk [vmem:[#allocation2 + $0xb0] sm:$0x3] %vm643_vm2, %v618_v46  ;;  %v825_v49 = vpop.permute.xlu1 %824  ;;  %v906_v50 = vpack.c.bf16 %v884_v47, %v882_v43  ;;  %4654 = vmatpush1.bf16.msra.mxu0 %v9085_v39  ;;  %v9113_v43 = vld [vmem:[%s10510_s23 + $0x200] ss:$16 sps:$4 sm:$0xff]   ;;  %v9121_v46 = vld [vmem:[%s10510_s23 + $0x224] ss:$16 sps:$4 sm:$0xff]  }
 0x1ac   : > { %763 = vst.msk [vmem:[#allocation2 + $0xb0] sm:$0x3] %vm739_vm0, %v714_v40  ;;  %4655 = vmatprep.subr.bf16.mxu0 %v9093_v41  ;;  %v9124_v47 = vld [vmem:[%s10510_s23 + $0x22c] ss:$16 sps:$4 sm:$0xff]  }
 0x1ad   : > { %860 = vst.msk [vmem:[#allocation2 + $0xa8] sm:$0x3] %vm849_vm3, %v825_v49  ;;  %1112 = vmatprep.mubr.bf16.mxu0 %v906_v50  ;;  %v9119_v50 = vld [vmem:[%s10510_s23 + $0x220] ss:$16 sps:$4 sm:$0xff]  }
 0x1ae   : > { %v827_v51 = vpop.permute.xlu0 %826  ;;  %1113 = vmatmul.mubr.bf16.gmra.mrb[16].mxu0 %v905_v48 }
 0x1af   : > { %861 = vst.msk [vmem:[#allocation2 + $0xb8] sm:$0x3] %vm849_vm3, %v827_v51  ;;  %v716_v52 = vpop.permute.xlu1 %715  ;;  %4656 = vmatpush1.bf16.msra.mxu0 %v9091_v45  ;;  %v9122_v51 = vld [vmem:[%s10510_s23 + $0x228] ss:$16 sps:$4 sm:$0xff]  }
 0x1b0   : > { %766 = vst.msk [vmem:[#allocation2 + $0xc8] sm:$0x3] %vm741_vm1, %v716_v52  ;;  %v885_v53 = vld [vmem:[#allocation2 + $0xa0] sm:$0xff]  ;;  %4657 = vmatprep.subr.bf16.mxu0 %v9099_v12 }
 0x1b1   : > { %v9148_v12 = vld [vmem:[%s10510_s23 + $0x2ac] ss:$16 sps:$4 sm:$0xff]  }
 0x1b2   : > { %v718_v54 = vpop.permute.xlu0 %717 }
 0x1b3   : > { %768 = vst.msk [vmem:[#allocation2 + $0xd8] sm:$0x3] %vm741_vm1, %v718_v54  ;;  %v620_v55 = vpop.permute.xlu1 %619  ;;  %v887_v57 = vld [vmem:[#allocation2 + $0xb0] sm:$0xff]  ;;  %4658 = vmatpush1.bf16.msra.mxu0 %v9097_v13 }
 0x1b4   : > { %v886_v56 = vld [vmem:[#allocation2 + $0xa8] sm:$0xff]  ;;  %655 = vst.msk [vmem:[#allocation2 + $0xc0] sm:$0x3] %vm643_vm2, %v620_v55  ;;  %v907_v60 = vpack.c.bf16 %v887_v57, %v885_v53  ;;  %4659 = vmatprep.subr.bf16.mxu0 %v9105_v19  ;;  %v9149_v19 = vld [vmem:[%s10510_s23 + $0x2c0] ss:$16 sps:$4 sm:$0xff]  }
 0x1b5   : > { %765 = vst.msk [vmem:[#allocation2 + $0xc0] sm:$0x3] %vm739_vm0, %v716_v52  ;;  %v9130_v55 = vld [vmem:[%s10510_s23 + $0x24c] ss:$16 sps:$4 sm:$0xff]  }
 0x1b6   : > { %v622_v58 = vpop.permute.xlu0 %621  ;;  %v888_v59 = vld [vmem:[#allocation2 + $0xb8] sm:$0xff] }
 0x1b7   : > { %656 = vst.msk [vmem:[#allocation2 + $0xd0] sm:$0x3] %vm643_vm2, %v622_v58  ;;  %v829_v61 = vpop.permute.xlu1 %828  ;;  %v908_v62 = vpack.c.bf16 %v888_v59, %v886_v56  ;;  %4660 = vmatpush1.bf16.msra.mxu0 %v9103_v21  ;;  %v9125_v58 = vld [vmem:[%s10510_s23 + $0x240] ss:$16 sps:$4 sm:$0xff]   ;;  %v9128_v59 = vld [vmem:[%s10510_s23 + $0x248] ss:$16 sps:$4 sm:$0xff]  }
 0x1b8   : > { %767 = vst.msk [vmem:[#allocation2 + $0xd0] sm:$0x3] %vm739_vm0, %v718_v54  ;;  %4661 = vmatprep.subr.bf16.mxu0 %v9111_v26  ;;  %v9127_v54 = vld [vmem:[%s10510_s23 + $0x244] ss:$16 sps:$4 sm:$0xff]   ;;  %v9166_v26 = vld [vmem:[%s10510_s23 + $0x30c] ss:$16 sps:$4 sm:$0xff]  }
 0x1b9   : > { %862 = vst.msk [vmem:[#allocation2 + $0xc8] sm:$0x3] %vm849_vm3, %v829_v61  ;;  %1120 = vmatprep.mubr.bf16.mxu0 %v908_v62  ;;  %v9133_v61 = vld [vmem:[%s10510_s23 + $0x264] ss:$16 sps:$4 sm:$0xff]   ;;  %v9136_v62 = vld [vmem:[%s10510_s23 + $0x26c] ss:$16 sps:$4 sm:$0xff]  }
 0x1ba   : > { %v831_v63 = vpop.permute.xlu0 %830  ;;  %1121 = vmatmul.mubr.bf16.gmra.mrb[20].mxu0 %v907_v60  ;;  %v9157_v21 = vld [vmem:[%s10510_s23 + $0x2e4] ss:$16 sps:$4 sm:$0xff]  }
 0x1bb   : > { %863 = vst.msk [vmem:[#allocation2 + $0xd8] sm:$0x3] %vm849_vm3, %v831_v63  ;;  %v720_v0 = vpop.permute.xlu1 %719  ;;  %4662 = vmatpush1.bf16.msra.mxu0 %v9109_v27  ;;  %v9161_v27 = vld [vmem:[%s10510_s23 + $0x300] ss:$16 sps:$4 sm:$0xff]  }
 0x1bc   : > { %770 = vst.msk [vmem:[#allocation2 + $0xe8] sm:$0x3] %vm741_vm1, %v720_v0  ;;  %v889_v1 = vld [vmem:[#allocation2 + $0xc0] sm:$0xff]  ;;  %4672 = vmatprep.subr.bf16.mxu0 %v9118_v30 }
 0x1bd   : > { %v9172_v30 = vld [vmem:[%s10510_s23 + $0x32c] ss:$16 sps:$4 sm:$0xff]  }
 0x1be   : > { %v624_v2 = vpop.permute.xlu0 %623 }
 0x1bf   : > { %657 = vst.msk [vmem:[#allocation2 + $0xe0] sm:$0x3] %vm643_vm2, %v624_v2  ;;  %v626_v3 = vpop.permute.xlu1 %625  ;;  %v891_v5 = vld [vmem:[#allocation2 + $0xd0] sm:$0xff] }
 0x1c0   : > { %v890_v4 = vld [vmem:[#allocation2 + $0xc8] sm:$0xff]  ;;  %769 = vst.msk [vmem:[#allocation2 + $0xe0] sm:$0x3] %vm739_vm0, %v720_v0  ;;  %v909_v8 = vpack.c.bf16 %v891_v5, %v889_v1  ;;  %v9131_v0 = vld [vmem:[%s10510_s23 + $0x260] ss:$16 sps:$4 sm:$0xff]  }
 0x1c1   : > { %658 = vst.msk [vmem:[#allocation2 + $0xf0] sm:$0x3] %vm643_vm2, %v626_v3  ;;  %v9134_v1 = vld [vmem:[%s10510_s23 + $0x268] ss:$16 sps:$4 sm:$0xff]   ;;  %v9139_v3 = vld [vmem:[%s10510_s23 + $0x284] ss:$16 sps:$4 sm:$0xff]  }
 0x1c2   : > { %v722_v6 = vpop.permute.xlu0 %721  ;;  %v892_v7 = vld [vmem:[#allocation2 + $0xd8] sm:$0xff] }
 0x1c3   : > { %771 = vst.msk [vmem:[#allocation2 + $0xf0] sm:$0x3] %vm739_vm0, %v722_v6  ;;  %v833_v9 = vpop.permute.xlu1 %832  ;;  %v910_v10 = vpack.c.bf16 %v892_v7, %v890_v4  ;;  %v9142_v4 = vld [vmem:[%s10510_s23 + $0x28c] ss:$16 sps:$4 sm:$0xff]   ;;  %v9137_v7 = vld [vmem:[%s10510_s23 + $0x280] ss:$16 sps:$4 sm:$0xff]  }
 0x1c4   : > { %772 = vst.msk [vmem:[#allocation2 + $0xf8] sm:$0x3] %vm741_vm1, %v722_v6 }
 0x1c5   : > { %864 = vst.msk [vmem:[#allocation2 + $0xe8] sm:$0x3] %vm849_vm3, %v833_v9  ;;  %1128 = vmatprep.mubr.bf16.mxu0 %v910_v10 }
 0x1c6   : > { %1129 = vmatmul.mubr.bf16.gmra.mrb[24].mxu0 %v909_v8  ;;  %v9140_v8 = vld [vmem:[%s10510_s23 + $0x288] ss:$16 sps:$4 sm:$0xff]  }
 0x1c7   : > { %v893_v20 = vld [vmem:[#allocation2 + $0xe0] sm:$0xff] }
 0x1ca   : > { %v895_v22 = vld [vmem:[#allocation2 + $0xf0] sm:$0xff] }
 0x1cb   : > { %v896_v16 = vld [vmem:[#allocation2 + $0xf8] sm:$0xff]  ;;  %v911_v24 = vpack.c.bf16 %v895_v22, %v893_v20 }
 0x1cc   : > { %v894_v15 = vld [vmem:[#allocation2 + $0xe8] sm:$0xff] }
 0x1cd   : > { %v912_v17 = vpack.c.bf16 %v896_v16, %v894_v15  ;;  %v9143_v15 = vld [vmem:[%s10510_s23 + $0x2a0] ss:$16 sps:$4 sm:$0xff]   ;;  %v9146_v16 = vld [vmem:[%s10510_s23 + $0x2a8] ss:$16 sps:$4 sm:$0xff]   ;;  %v9160_v22 = vld [vmem:[%s10510_s23 + $0x2ec] ss:$16 sps:$4 sm:$0xff]  }
 0x1ce   : > { %v9152_v20 = vld [vmem:[%s10510_s23 + $0x2c8] ss:$16 sps:$4 sm:$0xff]  }
 0x1cf   : > { %1136 = vmatprep.mubr.bf16.mxu0 %v912_v17  ;;  %v9151_v17 = vld [vmem:[%s10510_s23 + $0x2c4] ss:$16 sps:$4 sm:$0xff]  }
 0x1d0   : > { %1137 = vmatmul.mubr.bf16.gmra.mrb[28].mxu0 %v911_v24  ;;  %v9158_v24 = vld [vmem:[%s10510_s23 + $0x2e8] ss:$16 sps:$4 sm:$0xff]  }
 0x251   : > { %v8692_v31 = vpop.f32.mrb[0].mxu0 }
 0x252   : > { %v8693_v33 = vpop.f32.mrb[1].mxu0 }
 0x253   : > { %v8694_v34 = vadd.f32 %v8693_v33, %v8692_v31  ;;  %v8695_v35 = vpop.f32.mrb[2].mxu0  ;;  %v9167_v31 = vld [vmem:[%s10510_s23 + $0x320] ss:$16 sps:$4 sm:$0xff]   ;;  %v9170_v33 = vld [vmem:[%s10510_s23 + $0x328] ss:$16 sps:$4 sm:$0xff]  }
 0x254   : > { %v8696_v36 = vpop.f32.mrb[3].mxu0 }
 0x255   : > { %v1083_v37 = vadd.f32 %v8694_v34, %v10772_v32  ;;  %v8697_v38 = vadd.f32 %v8696_v36, %v8695_v35  ;;  %v9175_v34 = vld [vmem:[%s10510_s23 + $0x344] ss:$16 sps:$4 sm:$0xff]   ;;  %v9178_v35 = vld [vmem:[%s10510_s23 + $0x34c] ss:$16 sps:$4 sm:$0xff]   ;;  %v9173_v36 = vld [vmem:[%s10510_s23 + $0x340] ss:$16 sps:$4 sm:$0xff]  }
 0x257   : > { %v1086_v39 = vadd.f32 %v8697_v38, %v10772_v32  ;;  %v1145_v40 = vmax.f32 %v1083_v37, 0.0  ;;  %v9176_v37 = vld [vmem:[%s10510_s23 + $0x348] ss:$16 sps:$4 sm:$0xff]  }
 0x259   : > { %v1146_v41 = vmax.f32 %v1086_v39, 0.0  ;;  %v1193_v45 = vpack.c.bf16 %v1145_v40, %v1145_v40  ;;  %v9181_v39 = vld [vmem:[%s10510_s23 + $0x364] ss:$16 sps:$4 sm:$0xff]   ;;  %v9184_v40 = vld [vmem:[%s10510_s23 + $0x36c] ss:$16 sps:$4 sm:$0xff]  }
 0x25b   : > { %v1194_v42 = vpack.c.bf16 %v1146_v41, %v1146_v41 }
 0x25d   : > { %4335 = vmatprep.mubr.bf16.mxu1 %v1194_v42  ;;  %4663 = vmatprep.mubr.bf16.mxu0 %v1194_v42  ;;  %v8698_v48 = vpop.f32.mrb[4].mxu0 }
 0x25e   : > { %4336 = vmatmul.mubr.bf16.vlgmr.msra.gmra.mrb[0].mxu1 %v1193_v45  ;;  %4664 = vmatmul.mubr.bf16.vlgmr.msra.gmra.mrb[32].mxu0 %v1193_v45  ;;  %v8699_v49 = vpop.f32.mrb[5].mxu0 }
 0x25f   : > { %4345 = vmatpush1.bf16.msra.mxu1 %v9113_v43  ;;  %4673 = vmatpush1.bf16.msra.mxu0 %v9116_v44  ;;  %v10782_v52 = vadd.f32 %v8699_v49, %v8698_v48  ;;  %v8701_v53 = vpop.f32.mrb[6].mxu0  ;;  %v9179_v43 = vld [vmem:[%s10510_s23 + $0x360] ss:$16 sps:$4 sm:$0xff]   ;;  %v9182_v44 = vld [vmem:[%s10510_s23 + $0x368] ss:$16 sps:$4 sm:$0xff]  }
 0x260   : > { %4346 = vmatprep.subr.bf16.mxu1 %v9121_v46  ;;  %4674 = vmatprep.subr.bf16.mxu0 %v9124_v47  ;;  %v8702_v56 = vpop.f32.mrb[7].mxu0  ;;  %v9187_v46 = vld [vmem:[%s10510_s23 + $0x384] ss:$16 sps:$4 sm:$0xff]   ;;  %v9190_v47 = vld [vmem:[%s10510_s23 + $0x38c] ss:$16 sps:$4 sm:$0xff]  }
 0x261   : > { %v8703_v57 = vadd.f32 %v8702_v56, %v8701_v53  ;;  %v9193_v53 = vld [vmem:[%s10510_s23 + $0x3a4] ss:$16 sps:$4 sm:$0xff]   ;;  %v9194_v56 = vld [vmem:[%s10510_s23 + $0x3a8] ss:$16 sps:$4 sm:$0xff]  }
 0x263   : > { %4347 = vmatpush1.bf16.msra.mxu1 %v9119_v50  ;;  %4675 = vmatpush1.bf16.msra.mxu0 %v9122_v51  ;;  %v1094_v60 = vadd.f32 %v8703_v57, %v10772_v32  ;;  %v9185_v50 = vld [vmem:[%s10510_s23 + $0x380] ss:$16 sps:$4 sm:$0xff]   ;;  %v9188_v51 = vld [vmem:[%s10510_s23 + $0x388] ss:$16 sps:$4 sm:$0xff]   ;;  %v9199_v57 = vld [vmem:[%s10510_s23 + $0x3c4] ss:$16 sps:$4 sm:$0xff]  }
 0x264   : > { %4348 = vmatprep.subr.bf16.mxu1 %v9127_v54  ;;  %4676 = vmatprep.subr.bf16.mxu0 %v9130_v55  ;;  %v9196_v54 = vld [vmem:[%s10510_s23 + $0x3ac] ss:$16 sps:$4 sm:$0xff]   ;;  %v9191_v55 = vld [vmem:[%s10510_s23 + $0x3a0] ss:$16 sps:$4 sm:$0xff]  }
 0x265   : > { %v1148_v63 = vmax.f32 %v1094_v60, 0.0  ;;  %v9200_v60 = vld [vmem:[%s10510_s23 + $0x3c8] ss:$16 sps:$4 sm:$0xff]  }
 0x267   : > { %4349 = vmatpush1.bf16.msra.mxu1 %v9125_v58  ;;  %4677 = vmatpush1.bf16.msra.mxu0 %v9128_v59  ;;  %v1196_v2 = vpack.c.bf16 %v1148_v63, %v1148_v63  ;;  %v9202_v58 = vld [vmem:[%s10510_s23 + $0x3cc] ss:$16 sps:$4 sm:$0xff]   ;;  %v9197_v59 = vld [vmem:[%s10510_s23 + $0x3c0] ss:$16 sps:$4 sm:$0xff]  }
 0x268   : > { %4350 = vmatprep.subr.bf16.mxu1 %v9133_v61  ;;  %4678 = vmatprep.subr.bf16.mxu0 %v9136_v62  ;;  %v1091_v61 = vadd.f32 %v10782_v52, %v10772_v32  ;;  %v9205_v62 = vld [vmem:[%s10510_s23 + $0x3e4] ss:$16 sps:$4 sm:$0xff]   ;;  %v9208_v63 = vld [vmem:[%s10510_s23 + $0x3ec] ss:$16 sps:$4 sm:$0xff]  }
 0x269   : > { %4376 = vmatprep.mubr.bf16.mxu1 %v1196_v2  ;;  %4704 = vmatprep.mubr.bf16.mxu0 %v1196_v2  ;;  %v8704_v5 = vpop.f32.mrb[8].mxu0  ;;  %v9206_v2 = vld [vmem:[%s10510_s23 + $0x3e8] ss:$16 sps:$4 sm:$0xff]   ;;  %v9214_v52 = vld [vmem:[%s10510_s23 + $0x40c] ss:$16 sps:$4 sm:$0xff]  }
 0x26a   : > { %v8705_v6 = vpop.f32.mrb[9].mxu0 }
 0x26b   : > { %4351 = vmatpush1.bf16.msra.mxu1 %v9131_v0  ;;  %4679 = vmatpush1.bf16.msra.mxu0 %v9134_v1  ;;  %v10797_v9 = vadd.f32 %v8705_v6, %v8704_v5  ;;  %v8707_v10 = vpop.f32.mrb[10].mxu0  ;;  %v9203_v1 = vld [vmem:[%s10510_s23 + $0x3e0] ss:$16 sps:$4 sm:$0xff]  }
 0x26c   : > { %4352 = vmatprep.subr.bf16.mxu1 %v9139_v3  ;;  %4680 = vmatprep.subr.bf16.mxu0 %v9142_v4  ;;  %v8708_v13 = vpop.f32.mrb[11].mxu0  ;;  %v1147_v3 = vmax.f32 %v1091_v61, 0.0  ;;  %v9211_v4 = vld [vmem:[%s10510_s23 + $0x404] ss:$16 sps:$4 sm:$0xff]   ;;  %v9209_v6 = vld [vmem:[%s10510_s23 + $0x400] ss:$16 sps:$4 sm:$0xff]  }
 0x26d   : > { %v10801_v14 = vadd.f32 %v8708_v13, %v8707_v10  ;;  %v9217_v10 = vld [vmem:[%s10510_s23 + $0x424] ss:$16 sps:$4 sm:$0xff]   ;;  %v9215_v13 = vld [vmem:[%s10510_s23 + $0x420] ss:$16 sps:$4 sm:$0xff]  }
 0x26f   : > { %4353 = vmatpush1.bf16.msra.mxu1 %v9137_v7  ;;  %4681 = vmatpush1.bf16.msra.mxu0 %v9140_v8  ;;  %v1102_v0 = vadd.f32 %v10801_v14, %v10772_v32  ;;  %v9212_v7 = vld [vmem:[%s10510_s23 + $0x408] ss:$16 sps:$4 sm:$0xff]   ;;  %v1195_v8 = vpack.c.bf16 %v1147_v3, %v1147_v3 }
 0x270   : > { %4354 = vmatprep.subr.bf16.mxu1 %v9145_v11  ;;  %4682 = vmatprep.subr.bf16.mxu0 %v9148_v12  ;;  %v9220_v11 = vld [vmem:[%s10510_s23 + $0x42c] ss:$16 sps:$4 sm:$0xff]   ;;  %v9218_v14 = vld [vmem:[%s10510_s23 + $0x428] ss:$16 sps:$4 sm:$0xff]  }
 0x271   : > { %v1150_v5 = vmax.f32 %v1102_v0, 0.0  ;;  %v9278_v3 = vld [vmem:[%s10510_s23 + $0x568] ss:$16 sps:$4 sm:$0xff]  }
 0x273   : > { %4355 = vmatpush1.bf16.msra.mxu1 %v9143_v15  ;;  %4683 = vmatpush1.bf16.msra.mxu0 %v9146_v16  ;;  %v1198_v12 = vpack.c.bf16 %v1150_v5, %v1150_v5  ;;  %v9223_v15 = vld [vmem:[%s10510_s23 + $0x444] ss:$16 sps:$4 sm:$0xff]   ;;  %v9226_v16 = vld [vmem:[%s10510_s23 + $0x44c] ss:$16 sps:$4 sm:$0xff]  }
 0x274   : > { %4356 = vmatprep.subr.bf16.mxu1 %v9151_v17  ;;  %4684 = vmatprep.subr.bf16.mxu0 %v9154_v18  ;;  %v9221_v17 = vld [vmem:[%s10510_s23 + $0x440] ss:$16 sps:$4 sm:$0xff]   ;;  %v9224_v18 = vld [vmem:[%s10510_s23 + $0x448] ss:$16 sps:$4 sm:$0xff]   ;;  %v9286_v5 = vld [vmem:[%s10510_s23 + $0x58c] ss:$16 sps:$4 sm:$0xff]  }
 0x275   : > { %v8710_v38 = vpop.f32.mrb[12].mxu0 }
 0x276   : > { %v8711_v41 = vpop.f32.mrb[13].mxu0 }
 0x277   : > { %4357 = vmatpush1.bf16.msra.mxu1 %v9149_v19  ;;  %4685 = vmatpush1.bf16.msra.mxu0 %v9152_v20  ;;  %v10827_v42 = vadd.f32 %v8711_v41, %v8710_v38  ;;  %v8713_v45 = vpop.f32.mrb[14].mxu0  ;;  %v9229_v19 = vld [vmem:[%s10510_s23 + $0x464] ss:$16 sps:$4 sm:$0xff]   ;;  %v9232_v20 = vld [vmem:[%s10510_s23 + $0x46c] ss:$16 sps:$4 sm:$0xff]  }
 0x278   : > { %4358 = vmatprep.subr.bf16.mxu1 %v9157_v21  ;;  %4686 = vmatprep.subr.bf16.mxu0 %v9160_v22  ;;  %v8714_v48 = vpop.f32.mrb[15].mxu0  ;;  %v9227_v21 = vld [vmem:[%s10510_s23 + $0x460] ss:$16 sps:$4 sm:$0xff]   ;;  %v9230_v22 = vld [vmem:[%s10510_s23 + $0x468] ss:$16 sps:$4 sm:$0xff]  }
 0x279   : > { %v10833_v49 = vadd.f32 %v8714_v48, %v8713_v45  ;;  %v9251_v38 = vld [vmem:[%s10510_s23 + $0x4e0] ss:$16 sps:$4 sm:$0xff]   ;;  %v9259_v41 = vld [vmem:[%s10510_s23 + $0x504] ss:$16 sps:$4 sm:$0xff]  }
 0x27b   : > { %4359 = vmatpush1.bf16.msra.mxu1 %v9155_v23  ;;  %4687 = vmatpush1.bf16.msra.mxu0 %v9158_v24  ;;  %v9235_v23 = vld [vmem:[%s10510_s23 + $0x484] ss:$16 sps:$4 sm:$0xff]   ;;  %v9238_v24 = vld [vmem:[%s10510_s23 + $0x48c] ss:$16 sps:$4 sm:$0xff]  }
 0x27c   : > { %4360 = vmatprep.subr.bf16.mxu1 %v9163_v25  ;;  %4688 = vmatprep.subr.bf16.mxu0 %v9166_v26  ;;  %v9233_v25 = vld [vmem:[%s10510_s23 + $0x480] ss:$16 sps:$4 sm:$0xff]   ;;  %v9236_v26 = vld [vmem:[%s10510_s23 + $0x488] ss:$16 sps:$4 sm:$0xff]  }
 0x27f   : > { %4361 = vmatpush1.bf16.msra.mxu1 %v9161_v27  ;;  %4689 = vmatpush1.bf16.msra.mxu0 %v9164_v28  ;;  %v9241_v27 = vld [vmem:[%s10510_s23 + $0x4a4] ss:$16 sps:$4 sm:$0xff]   ;;  %v9244_v28 = vld [vmem:[%s10510_s23 + $0x4ac] ss:$16 sps:$4 sm:$0xff]  }
 0x280   : > { %4362 = vmatprep.subr.bf16.mxu1 %v9169_v29  ;;  %4690 = vmatprep.subr.bf16.mxu0 %v9172_v30  ;;  %v9239_v29 = vld [vmem:[%s10510_s23 + $0x4a0] ss:$16 sps:$4 sm:$0xff]   ;;  %v9242_v30 = vld [vmem:[%s10510_s23 + $0x4a8] ss:$16 sps:$4 sm:$0xff]  }
 0x283   : > { %4363 = vmatpush1.bf16.msra.mxu1 %v9167_v31  ;;  %4691 = vmatpush1.bf16.msra.mxu0 %v9170_v33  ;;  %v9247_v31 = vld [vmem:[%s10510_s23 + $0x4c4] ss:$16 sps:$4 sm:$0xff]   ;;  %v9250_v33 = vld [vmem:[%s10510_s23 + $0x4cc] ss:$16 sps:$4 sm:$0xff]  }
 0x284   : > { %4364 = vmatprep.subr.bf16.mxu1 %v9175_v34  ;;  %4692 = vmatprep.subr.bf16.mxu0 %v9178_v35  ;;  %v9245_v34 = vld [vmem:[%s10510_s23 + $0x4c0] ss:$16 sps:$4 sm:$0xff]   ;;  %v9248_v35 = vld [vmem:[%s10510_s23 + $0x4c8] ss:$16 sps:$4 sm:$0xff]  }
 0x287   : > { %4365 = vmatpush1.bf16.msra.mxu1 %v9173_v36  ;;  %4693 = vmatpush1.bf16.msra.mxu0 %v9176_v37  ;;  %v9253_v36 = vld [vmem:[%s10510_s23 + $0x4e4] ss:$16 sps:$4 sm:$0xff]   ;;  %v9256_v37 = vld [vmem:[%s10510_s23 + $0x4ec] ss:$16 sps:$4 sm:$0xff]  }
 0x288   : > { %4366 = vmatprep.subr.bf16.mxu1 %v9181_v39  ;;  %4694 = vmatprep.subr.bf16.mxu0 %v9184_v40  ;;  %v9254_v39 = vld [vmem:[%s10510_s23 + $0x4e8] ss:$16 sps:$4 sm:$0xff]   ;;  %v8716_v40 = vpop.f32.mrb[16].mxu0 }
 0x28b   : > { %4367 = vmatpush1.bf16.msra.mxu1 %v9179_v43  ;;  %4695 = vmatpush1.bf16.msra.mxu0 %v9182_v44  ;;  %v9262_v43 = vld [vmem:[%s10510_s23 + $0x50c] ss:$16 sps:$4 sm:$0xff]   ;;  %v8717_v44 = vpop.f32.mrb[17].mxu0 }
 0x28c   : > { %4368 = vmatprep.subr.bf16.mxu1 %v9187_v46  ;;  %4696 = vmatprep.subr.bf16.mxu0 %v9190_v47  ;;  %v10887_v45 = vadd.f32 %v8717_v44, %v8716_v40  ;;  %v9257_v46 = vld [vmem:[%s10510_s23 + $0x500] ss:$16 sps:$4 sm:$0xff]   ;;  %v9260_v47 = vld [vmem:[%s10510_s23 + $0x508] ss:$16 sps:$4 sm:$0xff]   ;;  %v8719_v48 = vpop.f32.mrb[18].mxu0 }
 0x28d   : > { %v9314_v44 = vld [vmem:[%s10510_s23 + $0x628] ss:$16 sps:$4 sm:$0xff]  }
 0x28f   : > { %4369 = vmatpush1.bf16.msra.mxu1 %v9185_v50  ;;  %4697 = vmatpush1.bf16.msra.mxu0 %v9188_v51  ;;  %v9265_v50 = vld [vmem:[%s10510_s23 + $0x524] ss:$16 sps:$4 sm:$0xff]   ;;  %v9268_v51 = vld [vmem:[%s10510_s23 + $0x52c] ss:$16 sps:$4 sm:$0xff]  }
 0x290   : > { %4370 = vmatprep.subr.bf16.mxu1 %v9193_v53  ;;  %4698 = vmatprep.subr.bf16.mxu0 %v9196_v54  ;;  %v8720_v53 = vpop.f32.mrb[19].mxu0 }
 0x291   : > { %v10893_v54 = vadd.f32 %v8720_v53, %v8719_v48  ;;  %v8722_v61 = vpop.f32.mrb[20].mxu0  ;;  %v9322_v48 = vld [vmem:[%s10510_s23 + $0x64c] ss:$16 sps:$4 sm:$0xff]  }
 0x292   : > { %v8723_v0 = vpop.f32.mrb[21].mxu0 }
 0x293   : > { %4371 = vmatpush1.bf16.msra.mxu1 %v9191_v55  ;;  %4699 = vmatpush1.bf16.msra.mxu0 %v9194_v56  ;;  %v9263_v55 = vld [vmem:[%s10510_s23 + $0x520] ss:$16 sps:$4 sm:$0xff]   ;;  %v9266_v56 = vld [vmem:[%s10510_s23 + $0x528] ss:$16 sps:$4 sm:$0xff]  }
 0x294   : > { %4372 = vmatprep.subr.bf16.mxu1 %v9199_v57  ;;  %4700 = vmatprep.subr.bf16.mxu0 %v9202_v58  ;;  %v9271_v57 = vld [vmem:[%s10510_s23 + $0x544] ss:$16 sps:$4 sm:$0xff]   ;;  %v9274_v58 = vld [vmem:[%s10510_s23 + $0x54c] ss:$16 sps:$4 sm:$0xff]  }
 0x297   : > { %4373 = vmatpush1.bf16.msra.mxu1 %v9197_v59  ;;  %4701 = vmatpush1.bf16.msra.mxu0 %v9200_v60  ;;  %v9269_v59 = vld [vmem:[%s10510_s23 + $0x540] ss:$16 sps:$4 sm:$0xff]   ;;  %v9272_v60 = vld [vmem:[%s10510_s23 + $0x548] ss:$16 sps:$4 sm:$0xff]  }
 0x298   : > { %4374 = vmatprep.subr.bf16.mxu1 %v9205_v62  ;;  %4702 = vmatprep.subr.bf16.mxu0 %v9208_v63  ;;  %v9277_v62 = vld [vmem:[%s10510_s23 + $0x564] ss:$16 sps:$4 sm:$0xff]   ;;  %v9280_v63 = vld [vmem:[%s10510_s23 + $0x56c] ss:$16 sps:$4 sm:$0xff]  }
 0x29b   : > { %4375 = vmatpush1.bf16.msra.mxu1 %v9203_v1  ;;  %4703 = vmatpush1.bf16.msra.mxu0 %v9206_v2  ;;  %v10903_v1 = vadd.f32 %v8723_v0, %v8722_v61  ;;  %v9275_v2 = vld [vmem:[%s10510_s23 + $0x560] ss:$16 sps:$4 sm:$0xff]   ;;  %v9331_v61 = vld [vmem:[%s10510_s23 + $0x684] ss:$16 sps:$4 sm:$0xff]   ;;  %v9332_v0 = vld [vmem:[%s10510_s23 + $0x688] ss:$16 sps:$4 sm:$0xff]  }
 0x29c   : > { %4385 = vmatprep.subr.bf16.mxu1 %v9211_v4  ;;  %4713 = vmatprep.subr.bf16.mxu0 %v9214_v52  ;;  %v8725_v4 = vpop.f32.mrb[22].mxu0  ;;  %v9283_v52 = vld [vmem:[%s10510_s23 + $0x584] ss:$16 sps:$4 sm:$0xff]  }
 0x29e   : > { %4377 = vmatmul.mubr.bf16.vlgmr.msra.gmra.mrb[0].mxu1 %v1195_v8  ;;  %4705 = vmatmul.mubr.bf16.vlgmr.msra.gmra.mrb[32].mxu0 %v1195_v8  ;;  %v9281_v8 = vld [vmem:[%s10510_s23 + $0x580] ss:$16 sps:$4 sm:$0xff]  }
 0x29f   : > { %4386 = vmatpush1.bf16.msra.mxu1 %v9209_v6  ;;  %4714 = vmatpush1.bf16.msra.mxu0 %v9212_v7  ;;  %v8726_v6 = vpop.f32.mrb[23].mxu0 }
 0x2a0   : > { %4387 = vmatprep.subr.bf16.mxu1 %v9217_v10  ;;  %4715 = vmatprep.subr.bf16.mxu0 %v9220_v11  ;;  %v10909_v7 = vadd.f32 %v8726_v6, %v8725_v4  ;;  %v9284_v10 = vld [vmem:[%s10510_s23 + $0x588] ss:$16 sps:$4 sm:$0xff]   ;;  %v9289_v11 = vld [vmem:[%s10510_s23 + $0x5a4] ss:$16 sps:$4 sm:$0xff]   ;;  %v9335_v4 = vld [vmem:[%s10510_s23 + $0x6a0] ss:$16 sps:$4 sm:$0xff]  }
 0x2a1   : > { %4417 = vmatprep.mubr.bf16.mxu1 %v1198_v12  ;;  %4745 = vmatprep.mubr.bf16.mxu0 %v1198_v12  ;;  %v9292_v12 = vld [vmem:[%s10510_s23 + $0x5ac] ss:$16 sps:$4 sm:$0xff]  }
 0x2a2   : > { %v9346_v6 = vld [vmem:[%s10510_s23 + $0x6cc] ss:$16 sps:$4 sm:$0xff]  }
 0x2a3   : > { %4388 = vmatpush1.bf16.msra.mxu1 %v9215_v13  ;;  %4716 = vmatpush1.bf16.msra.mxu0 %v9218_v14  ;;  %v9287_v13 = vld [vmem:[%s10510_s23 + $0x5a0] ss:$16 sps:$4 sm:$0xff]   ;;  %v9290_v14 = vld [vmem:[%s10510_s23 + $0x5a8] ss:$16 sps:$4 sm:$0xff]  }
 0x2a4   : > { %4389 = vmatprep.subr.bf16.mxu1 %v9223_v15  ;;  %4717 = vmatprep.subr.bf16.mxu0 %v9226_v16  ;;  %v8728_v15 = vpop.f32.mrb[24].mxu0  ;;  %v9295_v16 = vld [vmem:[%s10510_s23 + $0x5c4] ss:$16 sps:$4 sm:$0xff]  }
 0x2a7   : > { %4390 = vmatpush1.bf16.msra.mxu1 %v9221_v17  ;;  %4718 = vmatpush1.bf16.msra.mxu0 %v9224_v18  ;;  %v9298_v17 = vld [vmem:[%s10510_s23 + $0x5cc] ss:$16 sps:$4 sm:$0xff]   ;;  %v8729_v18 = vpop.f32.mrb[25].mxu0 }
 0x2a8   : > { %4391 = vmatprep.subr.bf16.mxu1 %v9229_v19  ;;  %4719 = vmatprep.subr.bf16.mxu0 %v9232_v20  ;;  %v10919_v19 = vadd.f32 %v8729_v18, %v8728_v15  ;;  %v9293_v20 = vld [vmem:[%s10510_s23 + $0x5c0] ss:$16 sps:$4 sm:$0xff]   ;;  %v9355_v15 = vld [vmem:[%s10510_s23 + $0x704] ss:$16 sps:$4 sm:$0xff]   ;;  %v9356_v18 = vld [vmem:[%s10510_s23 + $0x708] ss:$16 sps:$4 sm:$0xff]  }
 0x2ab   : > { %4392 = vmatpush1.bf16.msra.mxu1 %v9227_v21  ;;  %4720 = vmatpush1.bf16.msra.mxu0 %v9230_v22  ;;  %v9296_v21 = vld [vmem:[%s10510_s23 + $0x5c8] ss:$16 sps:$4 sm:$0xff]   ;;  %v8731_v22 = vpop.f32.mrb[26].mxu0 }
 0x2ac   : > { %4393 = vmatprep.subr.bf16.mxu1 %v9235_v23  ;;  %4721 = vmatprep.subr.bf16.mxu0 %v9238_v24  ;;  %v1099_v23 = vadd.f32 %v10797_v9, %v10772_v32  ;;  %v9301_v24 = vld [vmem:[%s10510_s23 + $0x5e4] ss:$16 sps:$4 sm:$0xff]  }
 0x2ae   : > { %v1149_v9 = vmax.f32 %v1099_v23, 0.0  ;;  %v9362_v23 = vld [vmem:[%s10510_s23 + $0x728] ss:$16 sps:$4 sm:$0xff]  }
 0x2af   : > { %4394 = vmatpush1.bf16.msra.mxu1 %v9233_v25  ;;  %4722 = vmatpush1.bf16.msra.mxu0 %v9236_v26  ;;  %v9304_v25 = vld [vmem:[%s10510_s23 + $0x5ec] ss:$16 sps:$4 sm:$0xff]   ;;  %v8732_v26 = vpop.f32.mrb[27].mxu0 }
 0x2b0   : > { %4395 = vmatprep.subr.bf16.mxu1 %v9241_v27  ;;  %4723 = vmatprep.subr.bf16.mxu0 %v9244_v28  ;;  %v1110_v27 = vadd.f32 %v10833_v49, %v10772_v32  ;;  %v10929_v28 = vadd.f32 %v8732_v26, %v8731_v22  ;;  %v9308_v49 = vld [vmem:[%s10510_s23 + $0x608] ss:$16 sps:$4 sm:$0xff]   ;;  %v9359_v22 = vld [vmem:[%s10510_s23 + $0x720] ss:$16 sps:$4 sm:$0xff]  }
 0x2b1   : > { %v9365_v26 = vld [vmem:[%s10510_s23 + $0x740] ss:$16 sps:$4 sm:$0xff]  }
 0x2b3   : > { %4396 = vmatpush1.bf16.msra.mxu1 %v9239_v29  ;;  %4724 = vmatpush1.bf16.msra.mxu0 %v9242_v30  ;;  %v9299_v29 = vld [vmem:[%s10510_s23 + $0x5e0] ss:$16 sps:$4 sm:$0xff]   ;;  %v9302_v30 = vld [vmem:[%s10510_s23 + $0x5e8] ss:$16 sps:$4 sm:$0xff]  }
 0x2b4   : > { %4397 = vmatprep.subr.bf16.mxu1 %v9247_v31  ;;  %4725 = vmatprep.subr.bf16.mxu0 %v9250_v33  ;;  %v9307_v31 = vld [vmem:[%s10510_s23 + $0x604] ss:$16 sps:$4 sm:$0xff]   ;;  %v9310_v33 = vld [vmem:[%s10510_s23 + $0x60c] ss:$16 sps:$4 sm:$0xff]  }
 0x2b7   : > { %4398 = vmatpush1.bf16.msra.mxu1 %v9245_v34  ;;  %4726 = vmatpush1.bf16.msra.mxu0 %v9248_v35  ;;  %v1152_v34 = vmax.f32 %v1110_v27, 0.0  ;;  %v9305_v35 = vld [vmem:[%s10510_s23 + $0x600] ss:$16 sps:$4 sm:$0xff]   ;;  %v9368_v27 = vld [vmem:[%s10510_s23 + $0x748] ss:$16 sps:$4 sm:$0xff]  }
 0x2b8   : > { %4399 = vmatprep.subr.bf16.mxu1 %v9253_v36  ;;  %4727 = vmatprep.subr.bf16.mxu0 %v9256_v37  ;;  %v8734_v36 = vpop.f32.mrb[28].mxu0  ;;  %v1197_v37 = vpack.c.bf16 %v1149_v9, %v1149_v9  ;;  %v9371_v9 = vld [vmem:[%s10510_s23 + $0x760] ss:$16 sps:$4 sm:$0xff]  }
 0x2b9   : > { %v1200_v40 = vpack.c.bf16 %v1152_v34, %v1152_v34  ;;  %v9382_v34 = vld [vmem:[%s10510_s23 + $0x78c] ss:$16 sps:$4 sm:$0xff]  }
 0x2bb   : > { %4400 = vmatpush1.bf16.msra.mxu1 %v9251_v38  ;;  %4728 = vmatpush1.bf16.msra.mxu0 %v9254_v39  ;;  %v9313_v38 = vld [vmem:[%s10510_s23 + $0x624] ss:$16 sps:$4 sm:$0xff]   ;;  %v9316_v39 = vld [vmem:[%s10510_s23 + $0x62c] ss:$16 sps:$4 sm:$0xff]  }
 0x2bc   : > { %4401 = vmatprep.subr.bf16.mxu1 %v9259_v41  ;;  %4729 = vmatprep.subr.bf16.mxu0 %v9262_v43  ;;  %v8735_v41 = vpop.f32.mrb[29].mxu0  ;;  %v9311_v43 = vld [vmem:[%s10510_s23 + $0x620] ss:$16 sps:$4 sm:$0xff]  }
 0x2bf   : > { %4402 = vmatpush1.bf16.msra.mxu1 %v9257_v46  ;;  %4730 = vmatpush1.bf16.msra.mxu0 %v9260_v47  ;;  %v10941_v46 = vadd.f32 %v8735_v41, %v8734_v36  ;;  %v9319_v47 = vld [vmem:[%s10510_s23 + $0x644] ss:$16 sps:$4 sm:$0xff]   ;;  %v9394_v41 = vld [vmem:[%s10510_s23 + $0x7cc] ss:$16 sps:$4 sm:$0xff]  }
 0x2c0   : > { %4403 = vmatprep.subr.bf16.mxu1 %v9265_v50  ;;  %4731 = vmatprep.subr.bf16.mxu0 %v9268_v51  ;;  %v8737_v50 = vpop.f32.mrb[30].mxu0  ;;  %v9385_v36 = vld [vmem:[%s10510_s23 + $0x7a4] ss:$16 sps:$4 sm:$0xff]  }
 0x2c1   : > { %v8738_v51 = vpop.f32.mrb[31].mxu0 }
 0x2c2   : > { %v10945_v53 = vadd.f32 %v8738_v51, %v8737_v50  ;;  %v9400_v50 = vld [vmem:[%s10510_s23 + $0x7ec] ss:$16 sps:$4 sm:$0xff]   ;;  %v1118_v51 = vadd.f32 %v10893_v54, %v10772_v32  ;;  %v9409_v54 = vld [vmem:[%s10510_s23 + $0x824] ss:$16 sps:$4 sm:$0xff]  }
 0x2c3   : > { %4404 = vmatpush1.bf16.msra.mxu1 %v9263_v55  ;;  %4732 = vmatpush1.bf16.msra.mxu0 %v9266_v56  ;;  %v9317_v55 = vld [vmem:[%s10510_s23 + $0x640] ss:$16 sps:$4 sm:$0xff]   ;;  %v9320_v56 = vld [vmem:[%s10510_s23 + $0x648] ss:$16 sps:$4 sm:$0xff]  }
 0x2c4   : > { %4405 = vmatprep.subr.bf16.mxu1 %v9271_v57  ;;  %4733 = vmatprep.subr.bf16.mxu0 %v9274_v58  ;;  %v9325_v57 = vld [vmem:[%s10510_s23 + $0x664] ss:$16 sps:$4 sm:$0xff]   ;;  %v9328_v58 = vld [vmem:[%s10510_s23 + $0x66c] ss:$16 sps:$4 sm:$0xff]  }
 0x2c7   : > { %4406 = vmatpush1.bf16.msra.mxu1 %v9269_v59  ;;  %4734 = vmatpush1.bf16.msra.mxu0 %v9272_v60  ;;  %v9323_v59 = vld [vmem:[%s10510_s23 + $0x660] ss:$16 sps:$4 sm:$0xff]   ;;  %v9326_v60 = vld [vmem:[%s10510_s23 + $0x668] ss:$16 sps:$4 sm:$0xff]  }
 0x2c8   : > { %4407 = vmatprep.subr.bf16.mxu1 %v9277_v62  ;;  %4735 = vmatprep.subr.bf16.mxu0 %v9280_v63  ;;  %v9334_v62 = vld [vmem:[%s10510_s23 + $0x68c] ss:$16 sps:$4 sm:$0xff]   ;;  %v9329_v63 = vld [vmem:[%s10510_s23 + $0x680] ss:$16 sps:$4 sm:$0xff]  }
 0x2cb   : > { %4408 = vmatpush1.bf16.msra.mxu1 %v9275_v2  ;;  %4736 = vmatpush1.bf16.msra.mxu0 %v9278_v3  ;;  %v9337_v2 = vld [vmem:[%s10510_s23 + $0x6a4] ss:$16 sps:$4 sm:$0xff]   ;;  %v9340_v3 = vld [vmem:[%s10510_s23 + $0x6ac] ss:$16 sps:$4 sm:$0xff]  }
 0x2cc   : > { %4409 = vmatprep.subr.bf16.mxu1 %v9283_v52  ;;  %4737 = vmatprep.subr.bf16.mxu0 %v9286_v5  ;;  %v9338_v52 = vld [vmem:[%s10510_s23 + $0x6a8] ss:$16 sps:$4 sm:$0xff]   ;;  %v9343_v5 = vld [vmem:[%s10510_s23 + $0x6c4] ss:$16 sps:$4 sm:$0xff]  }
 0x2cf   : > { %4410 = vmatpush1.bf16.msra.mxu1 %v9281_v8  ;;  %4738 = vmatpush1.bf16.msra.mxu0 %v9284_v10  ;;  %v9341_v8 = vld [vmem:[%s10510_s23 + $0x6c0] ss:$16 sps:$4 sm:$0xff]   ;;  %v9344_v10 = vld [vmem:[%s10510_s23 + $0x6c8] ss:$16 sps:$4 sm:$0xff]  }
 0x2d0   : > { %4411 = vmatprep.subr.bf16.mxu1 %v9289_v11  ;;  %4739 = vmatprep.subr.bf16.mxu0 %v9292_v12  ;;  %v9349_v11 = vld [vmem:[%s10510_s23 + $0x6e4] ss:$16 sps:$4 sm:$0xff]   ;;  %v9352_v12 = vld [vmem:[%s10510_s23 + $0x6ec] ss:$16 sps:$4 sm:$0xff]  }
 0x2d3   : > { %4412 = vmatpush1.bf16.msra.mxu1 %v9287_v13  ;;  %4740 = vmatpush1.bf16.msra.mxu0 %v9290_v14  ;;  %v9347_v13 = vld [vmem:[%s10510_s23 + $0x6e0] ss:$16 sps:$4 sm:$0xff]   ;;  %v9350_v14 = vld [vmem:[%s10510_s23 + $0x6e8] ss:$16 sps:$4 sm:$0xff]  }
 0x2d4   : > { %4413 = vmatprep.subr.bf16.mxu1 %v9295_v16  ;;  %4741 = vmatprep.subr.bf16.mxu0 %v9298_v17  ;;  %v9358_v16 = vld [vmem:[%s10510_s23 + $0x70c] ss:$16 sps:$4 sm:$0xff]   ;;  %v9353_v17 = vld [vmem:[%s10510_s23 + $0x700] ss:$16 sps:$4 sm:$0xff]  }
 0x2d7   : > { %4414 = vmatpush1.bf16.msra.mxu1 %v9293_v20  ;;  %4742 = vmatpush1.bf16.msra.mxu0 %v9296_v21  ;;  %v9361_v20 = vld [vmem:[%s10510_s23 + $0x724] ss:$16 sps:$4 sm:$0xff]   ;;  %v9364_v21 = vld [vmem:[%s10510_s23 + $0x72c] ss:$16 sps:$4 sm:$0xff]  }
 0x2d8   : > { %4415 = vmatprep.subr.bf16.mxu1 %v9301_v24  ;;  %4743 = vmatprep.subr.bf16.mxu0 %v9304_v25  ;;  %v9367_v24 = vld [vmem:[%s10510_s23 + $0x744] ss:$16 sps:$4 sm:$0xff]   ;;  %v9370_v25 = vld [vmem:[%s10510_s23 + $0x74c] ss:$16 sps:$4 sm:$0xff]  }
 0x2db   : > { %4416 = vmatpush1.bf16.msra.mxu1 %v9299_v29  ;;  %4744 = vmatpush1.bf16.msra.mxu0 %v9302_v30  ;;  %v9373_v29 = vld [vmem:[%s10510_s23 + $0x764] ss:$16 sps:$4 sm:$0xff]   ;;  %v9376_v30 = vld [vmem:[%s10510_s23 + $0x76c] ss:$16 sps:$4 sm:$0xff]  }
 0x2dc   : > { %4426 = vmatprep.subr.bf16.mxu1 %v9307_v31  ;;  %4754 = vmatprep.subr.bf16.mxu0 %v9310_v33  ;;  %v9374_v31 = vld [vmem:[%s10510_s23 + $0x768] ss:$16 sps:$4 sm:$0xff]   ;;  %v9379_v33 = vld [vmem:[%s10510_s23 + $0x784] ss:$16 sps:$4 sm:$0xff]  }
 0x2de   : > { %4418 = vmatmul.mubr.bf16.vlgmr.msra.gmra.mrb[0].mxu1 %v1197_v37  ;;  %4746 = vmatmul.mubr.bf16.vlgmr.msra.gmra.mrb[32].mxu0 %v1197_v37  ;;  %v9388_v37 = vld [vmem:[%s10510_s23 + $0x7ac] ss:$16 sps:$4 sm:$0xff]  }
 0x2df   : > { %4427 = vmatpush1.bf16.msra.mxu1 %v9305_v35  ;;  %4755 = vmatpush1.bf16.msra.mxu0 %v9308_v49  ;;  %v9377_v35 = vld [vmem:[%s10510_s23 + $0x780] ss:$16 sps:$4 sm:$0xff]   ;;  %v9380_v49 = vld [vmem:[%s10510_s23 + $0x788] ss:$16 sps:$4 sm:$0xff]  }
 0x2e0   : > { %4428 = vmatprep.subr.bf16.mxu1 %v9313_v38  ;;  %4756 = vmatprep.subr.bf16.mxu0 %v9316_v39  ;;  %v9383_v38 = vld [vmem:[%s10510_s23 + $0x7a0] ss:$16 sps:$4 sm:$0xff]   ;;  %v9386_v39 = vld [vmem:[%s10510_s23 + $0x7a8] ss:$16 sps:$4 sm:$0xff]  }
 0x2e1   : > { %4458 = vmatprep.mubr.bf16.mxu1 %v1200_v40  ;;  %4786 = vmatprep.mubr.bf16.mxu0 %v1200_v40  ;;  %v9391_v40 = vld [vmem:[%s10510_s23 + $0x7c4] ss:$16 sps:$4 sm:$0xff]  }
 0x2e3   : > { %4429 = vmatpush1.bf16.msra.mxu1 %v9311_v43  ;;  %4757 = vmatpush1.bf16.msra.mxu0 %v9314_v44  ;;  %v9389_v43 = vld [vmem:[%s10510_s23 + $0x7c0] ss:$16 sps:$4 sm:$0xff]   ;;  %v9392_v44 = vld [vmem:[%s10510_s23 + $0x7c8] ss:$16 sps:$4 sm:$0xff]  }
 0x2e4   : > { %4430 = vmatprep.subr.bf16.mxu1 %v9319_v47  ;;  %4758 = vmatprep.subr.bf16.mxu0 %v9322_v48  ;;  %v1107_v47 = vadd.f32 %v10827_v42, %v10772_v32  ;;  %v9397_v48 = vld [vmem:[%s10510_s23 + $0x7e4] ss:$16 sps:$4 sm:$0xff]   ;;  %v9406_v42 = vld [vmem:[%s10510_s23 + $0x80c] ss:$16 sps:$4 sm:$0xff]  }
 0x2e7   : > { %4431 = vmatpush1.bf16.msra.mxu1 %v9317_v55  ;;  %4759 = vmatpush1.bf16.msra.mxu0 %v9320_v56  ;;  %v9395_v55 = vld [vmem:[%s10510_s23 + $0x7e0] ss:$16 sps:$4 sm:$0xff]   ;;  %v9398_v56 = vld [vmem:[%s10510_s23 + $0x7e8] ss:$16 sps:$4 sm:$0xff]  }
 0x2e8   : > { %4432 = vmatprep.subr.bf16.mxu1 %v9325_v57  ;;  %4760 = vmatprep.subr.bf16.mxu0 %v9328_v58  ;;  %v1151_v57 = vmax.f32 %v1107_v47, 0.0  ;;  %v9403_v58 = vld [vmem:[%s10510_s23 + $0x804] ss:$16 sps:$4 sm:$0xff]   ;;  %v9470_v47 = vld [vmem:[%s10510_s23 + $0x968] ss:$16 sps:$4 sm:$0xff]  }
 0x2ea   : > { %v1199_v32 = vpack.c.bf16 %v1151_v57, %v1151_v57  ;;  %v9484_v57 = vld [vmem:[%s10510_s23 + $0x9ac] ss:$16 sps:$4 sm:$0xff]  }
 0x2eb   : > { %4433 = vmatpush1.bf16.msra.mxu1 %v9323_v59  ;;  %4761 = vmatpush1.bf16.msra.mxu0 %v9326_v60  ;;  %v1154_v59 = vmax.f32 %v1118_v51, 0.0  ;;  %v9401_v60 = vld [vmem:[%s10510_s23 + $0x800] ss:$16 sps:$4 sm:$0xff]  }
 0x2ec   : > { %4434 = vmatprep.subr.bf16.mxu1 %v9331_v61  ;;  %4762 = vmatprep.subr.bf16.mxu0 %v9334_v62  ;;  %v9404_v61 = vld [vmem:[%s10510_s23 + $0x808] ss:$16 sps:$4 sm:$0xff]   ;;  %v9412_v62 = vld [vmem:[%s10510_s23 + $0x82c] ss:$16 sps:$4 sm:$0xff]   ;;  %v9473_v51 = vld [vmem:[%s10510_s23 + $0x980] ss:$16 sps:$4 sm:$0xff]  }
 0x2ef   : > { %4435 = vmatpush1.bf16.msra.mxu1 %v9329_v63  ;;  %4763 = vmatpush1.bf16.msra.mxu0 %v9332_v0  ;;  %v1202_v63 = vpack.c.bf16 %v1154_v59, %v1154_v59  ;;  %v9407_v0 = vld [vmem:[%s10510_s23 + $0x820] ss:$16 sps:$4 sm:$0xff]   ;;  %v9487_v59 = vld [vmem:[%s10510_s23 + $0x9c4] ss:$16 sps:$4 sm:$0xff]  }
 0x2f0   : > { %4436 = vmatprep.subr.bf16.mxu1 %v9337_v2  ;;  %4764 = vmatprep.subr.bf16.mxu0 %v9340_v3  ;;  %v9410_v2 = vld [vmem:[%s10510_s23 + $0x828] ss:$16 sps:$4 sm:$0xff]   ;;  %v9415_v3 = vld [vmem:[%s10510_s23 + $0x844] ss:$16 sps:$4 sm:$0xff]  }
 0x2f3   : > { %4437 = vmatpush1.bf16.msra.mxu1 %v9335_v4  ;;  %4765 = vmatpush1.bf16.msra.mxu0 %v9338_v52  ;;  %v9418_v4 = vld [vmem:[%s10510_s23 + $0x84c] ss:$16 sps:$4 sm:$0xff]   ;;  %v9413_v52 = vld [vmem:[%s10510_s23 + $0x840] ss:$16 sps:$4 sm:$0xff]  }
 0x2f4   : > { %4438 = vmatprep.subr.bf16.mxu1 %v9343_v5  ;;  %4766 = vmatprep.subr.bf16.mxu0 %v9346_v6  ;;  %v9416_v5 = vld [vmem:[%s10510_s23 + $0x848] ss:$16 sps:$4 sm:$0xff]   ;;  %v9421_v6 = vld [vmem:[%s10510_s23 + $0x864] ss:$16 sps:$4 sm:$0xff]  }
 0x2f7   : > { %4439 = vmatpush1.bf16.msra.mxu1 %v9341_v8  ;;  %4767 = vmatpush1.bf16.msra.mxu0 %v9344_v10  ;;  %v9424_v8 = vld [vmem:[%s10510_s23 + $0x86c] ss:$16 sps:$4 sm:$0xff]   ;;  %v9419_v10 = vld [vmem:[%s10510_s23 + $0x860] ss:$16 sps:$4 sm:$0xff]  }
 0x2f8   : > { %4440 = vmatprep.subr.bf16.mxu1 %v9349_v11  ;;  %4768 = vmatprep.subr.bf16.mxu0 %v9352_v12  ;;  %v9422_v11 = vld [vmem:[%s10510_s23 + $0x868] ss:$16 sps:$4 sm:$0xff]   ;;  %v9427_v12 = vld [vmem:[%s10510_s23 + $0x884] ss:$16 sps:$4 sm:$0xff]  }
 0x2fb   : > { %4441 = vmatpush1.bf16.msra.mxu1 %v9347_v13  ;;  %4769 = vmatpush1.bf16.msra.mxu0 %v9350_v14  ;;  %v9430_v13 = vld [vmem:[%s10510_s23 + $0x88c] ss:$16 sps:$4 sm:$0xff]   ;;  %v9425_v14 = vld [vmem:[%s10510_s23 + $0x880] ss:$16 sps:$4 sm:$0xff]  }
 0x2fc   : > { %4442 = vmatprep.subr.bf16.mxu1 %v9355_v15  ;;  %4770 = vmatprep.subr.bf16.mxu0 %v9358_v16  ;;  %v9428_v15 = vld [vmem:[%s10510_s23 + $0x888] ss:$16 sps:$4 sm:$0xff]   ;;  %v9433_v16 = vld [vmem:[%s10510_s23 + $0x8a4] ss:$16 sps:$4 sm:$0xff]  }
 0x2ff   : > { %4443 = vmatpush1.bf16.msra.mxu1 %v9353_v17  ;;  %4771 = vmatpush1.bf16.msra.mxu0 %v9356_v18  ;;  %v9436_v17 = vld [vmem:[%s10510_s23 + $0x8ac] ss:$16 sps:$4 sm:$0xff]   ;;  %v9431_v18 = vld [vmem:[%s10510_s23 + $0x8a0] ss:$16 sps:$4 sm:$0xff]  }
 0x300   : > { %4444 = vmatprep.subr.bf16.mxu1 %v9361_v20  ;;  %4772 = vmatprep.subr.bf16.mxu0 %v9364_v21  ;;  %v9434_v20 = vld [vmem:[%s10510_s23 + $0x8a8] ss:$16 sps:$4 sm:$0xff]   ;;  %v9439_v21 = vld [vmem:[%s10510_s23 + $0x8c4] ss:$16 sps:$4 sm:$0xff]  }
 0x303   : > { %4445 = vmatpush1.bf16.msra.mxu1 %v9359_v22  ;;  %4773 = vmatpush1.bf16.msra.mxu0 %v9362_v23  ;;  %v9442_v22 = vld [vmem:[%s10510_s23 + $0x8cc] ss:$16 sps:$4 sm:$0xff]   ;;  %v9437_v23 = vld [vmem:[%s10510_s23 + $0x8c0] ss:$16 sps:$4 sm:$0xff]  }
 0x304   : > { %4446 = vmatprep.subr.bf16.mxu1 %v9367_v24  ;;  %4774 = vmatprep.subr.bf16.mxu0 %v9370_v25  ;;  %v9440_v24 = vld [vmem:[%s10510_s23 + $0x8c8] ss:$16 sps:$4 sm:$0xff]   ;;  %v9445_v25 = vld [vmem:[%s10510_s23 + $0x8e4] ss:$16 sps:$4 sm:$0xff]  }
 0x307   : > { %4447 = vmatpush1.bf16.msra.mxu1 %v9365_v26  ;;  %4775 = vmatpush1.bf16.msra.mxu0 %v9368_v27  ;;  %v9448_v26 = vld [vmem:[%s10510_s23 + $0x8ec] ss:$16 sps:$4 sm:$0xff]   ;;  %v9443_v27 = vld [vmem:[%s10510_s23 + $0x8e0] ss:$16 sps:$4 sm:$0xff]  }
 0x308   : > { %4448 = vmatprep.subr.bf16.mxu1 %v9373_v29  ;;  %4776 = vmatprep.subr.bf16.mxu0 %v9376_v30  ;;  %v9446_v29 = vld [vmem:[%s10510_s23 + $0x8e8] ss:$16 sps:$4 sm:$0xff]   ;;  %v9451_v30 = vld [vmem:[%s10510_s23 + $0x904] ss:$16 sps:$4 sm:$0xff]  }
 0x30b   : > { %4449 = vmatpush1.bf16.msra.mxu1 %v9371_v9  ;;  %4777 = vmatpush1.bf16.msra.mxu0 %v9374_v31  ;;  %v9454_v9 = vld [vmem:[%s10510_s23 + $0x90c] ss:$16 sps:$4 sm:$0xff]   ;;  %v9449_v31 = vld [vmem:[%s10510_s23 + $0x900] ss:$16 sps:$4 sm:$0xff]  }
 0x30c   : > { %4450 = vmatprep.subr.bf16.mxu1 %v9379_v33  ;;  %4778 = vmatprep.subr.bf16.mxu0 %v9382_v34  ;;  %v9452_v33 = vld [vmem:[%s10510_s23 + $0x908] ss:$16 sps:$4 sm:$0xff]   ;;  %v9457_v34 = vld [vmem:[%s10510_s23 + $0x924] ss:$16 sps:$4 sm:$0xff]  }
 0x30f   : > { %4451 = vmatpush1.bf16.msra.mxu1 %v9377_v35  ;;  %4779 = vmatpush1.bf16.msra.mxu0 %v9380_v49  ;;  %v9460_v35 = vld [vmem:[%s10510_s23 + $0x92c] ss:$16 sps:$4 sm:$0xff]   ;;  %v9455_v49 = vld [vmem:[%s10510_s23 + $0x920] ss:$16 sps:$4 sm:$0xff]  }
 0x310   : > { %4452 = vmatprep.subr.bf16.mxu1 %v9385_v36  ;;  %4780 = vmatprep.subr.bf16.mxu0 %v9388_v37  ;;  %v9458_v36 = vld [vmem:[%s10510_s23 + $0x928] ss:$16 sps:$4 sm:$0xff]   ;;  %v9463_v37 = vld [vmem:[%s10510_s23 + $0x944] ss:$16 sps:$4 sm:$0xff]  }
 0x313   : > { %4453 = vmatpush1.bf16.msra.mxu1 %v9383_v38  ;;  %4781 = vmatpush1.bf16.msra.mxu0 %v9386_v39  ;;  %v9466_v38 = vld [vmem:[%s10510_s23 + $0x94c] ss:$16 sps:$4 sm:$0xff]   ;;  %v9461_v39 = vld [vmem:[%s10510_s23 + $0x940] ss:$16 sps:$4 sm:$0xff]  }
 0x314   : > { %4454 = vmatprep.subr.bf16.mxu1 %v9391_v40  ;;  %4782 = vmatprep.subr.bf16.mxu0 %v9394_v41  ;;  %v9464_v40 = vld [vmem:[%s10510_s23 + $0x948] ss:$16 sps:$4 sm:$0xff]   ;;  %v9469_v41 = vld [vmem:[%s10510_s23 + $0x964] ss:$16 sps:$4 sm:$0xff]  }
 0x317   : > { %4455 = vmatpush1.bf16.msra.mxu1 %v9389_v43  ;;  %4783 = vmatpush1.bf16.msra.mxu0 %v9392_v44  ;;  %v9472_v43 = vld [vmem:[%s10510_s23 + $0x96c] ss:$16 sps:$4 sm:$0xff]   ;;  %v9467_v44 = vld [vmem:[%s10510_s23 + $0x960] ss:$16 sps:$4 sm:$0xff]  }
 0x318   : > { %4456 = vmatprep.subr.bf16.mxu1 %v9397_v48  ;;  %4784 = vmatprep.subr.bf16.mxu0 %v9400_v50  ;;  %v9475_v48 = vld [vmem:[%s10510_s23 + $0x984] ss:$16 sps:$4 sm:$0xff]   ;;  %v9478_v50 = vld [vmem:[%s10510_s23 + $0x98c] ss:$16 sps:$4 sm:$0xff]  }
 0x31b   : > { %4457 = vmatpush1.bf16.msra.mxu1 %v9395_v55  ;;  %4785 = vmatpush1.bf16.msra.mxu0 %v9398_v56  ;;  %v9476_v55 = vld [vmem:[%s10510_s23 + $0x988] ss:$16 sps:$4 sm:$0xff]   ;;  %v9481_v56 = vld [vmem:[%s10510_s23 + $0x9a4] ss:$16 sps:$4 sm:$0xff]  }
 0x31c   : > { %4467 = vmatprep.subr.bf16.mxu1 %v9403_v58  ;;  %4795 = vmatprep.subr.bf16.mxu0 %v9406_v42  ;;  %v9479_v58 = vld [vmem:[%s10510_s23 + $0x9a0] ss:$16 sps:$4 sm:$0xff]   ;;  %v9482_v42 = vld [vmem:[%s10510_s23 + $0x9a8] ss:$16 sps:$4 sm:$0xff]  }
 0x31e   : > { %4459 = vmatmul.mubr.bf16.vlgmr.msra.gmra.mrb[0].mxu1 %v1199_v32  ;;  %4787 = vmatmul.mubr.bf16.vlgmr.msra.gmra.mrb[32].mxu0 %v1199_v32  ;;  %v9488_v32 = vld [vmem:[%s10510_s23 + $0x9c8] ss:$16 sps:$4 sm:$0xff]  }
 0x31f   : > { %4468 = vmatpush1.bf16.msra.mxu1 %v9401_v60  ;;  %4796 = vmatpush1.bf16.msra.mxu0 %v9404_v61  ;;  %v9490_v60 = vld [vmem:[%s10510_s23 + $0x9cc] ss:$16 sps:$4 sm:$0xff]   ;;  %v9485_v61 = vld [vmem:[%s10510_s23 + $0x9c0] ss:$16 sps:$4 sm:$0xff]  }
 0x320   : > { %4469 = vmatprep.subr.bf16.mxu1 %v9409_v54  ;;  %4797 = vmatprep.subr.bf16.mxu0 %v9412_v62  ;;  %v11067_v54 = vld [vmem:[%s436_s16] ss:$0 sm:$0xff] }
 0x321   : > { %4499 = vmatprep.mubr.bf16.mxu1 %v1202_v63  ;;  %4827 = vmatprep.mubr.bf16.mxu0 %v1202_v63  ;;  %v1115_v62 = vadd.f32 %v11067_v54, %v10887_v45  ;;  %v9493_v63 = vld [vmem:[%s10510_s23 + $0x9e4] ss:$16 sps:$4 sm:$0xff]   ;;  %v9502_v45 = vld [vmem:[%s10510_s23 + $0xa0c] ss:$16 sps:$4 sm:$0xff]  }
 0x323   : > { %4470 = vmatpush1.bf16.msra.mxu1 %v9407_v0  ;;  %4798 = vmatpush1.bf16.msra.mxu0 %v9410_v2  ;;  %v9496_v0 = vld [vmem:[%s10510_s23 + $0x9ec] ss:$16 sps:$4 sm:$0xff]   ;;  %v1126_v2 = vadd.f32 %v11067_v54, %v10909_v7 }
 0x324   : > { %4471 = vmatprep.subr.bf16.mxu1 %v9415_v3  ;;  %4799 = vmatprep.subr.bf16.mxu0 %v9418_v4  ;;  %v9491_v3 = vld [vmem:[%s10510_s23 + $0x9e0] ss:$16 sps:$4 sm:$0xff]   ;;  %v9494_v4 = vld [vmem:[%s10510_s23 + $0x9e8] ss:$16 sps:$4 sm:$0xff]  }
 0x327   : > { %4472 = vmatpush1.bf16.msra.mxu1 %v9413_v52  ;;  %4800 = vmatpush1.bf16.msra.mxu0 %v9416_v5  ;;  %v1153_v52 = vmax.f32 %v1115_v62, 0.0  ;;  %v9499_v5 = vld [vmem:[%s10510_s23 + $0xa04] ss:$16 sps:$4 sm:$0xff]  }
 0x328   : > { %4473 = vmatprep.subr.bf16.mxu1 %v9421_v6  ;;  %4801 = vmatprep.subr.bf16.mxu0 %v9424_v8  ;;  %v1156_v6 = vmax.f32 %v1126_v2, 0.0  ;;  %v9497_v8 = vld [vmem:[%s10510_s23 + $0xa00] ss:$16 sps:$4 sm:$0xff]   ;;  %v9571_v62 = vld [vmem:[%s10510_s23 + $0xb84] ss:$16 sps:$4 sm:$0xff]  }
 0x329   : > { %v1201_v7 = vpack.c.bf16 %v1153_v52, %v1153_v52  ;;  %v9572_v2 = vld [vmem:[%s10510_s23 + $0xb88] ss:$16 sps:$4 sm:$0xff]   ;;  %v9575_v52 = vld [vmem:[%s10510_s23 + $0xba0] ss:$16 sps:$4 sm:$0xff]  }
 0x32b   : > { %4474 = vmatpush1.bf16.msra.mxu1 %v9419_v10  ;;  %4802 = vmatpush1.bf16.msra.mxu0 %v9422_v11  ;;  %v9500_v10 = vld [vmem:[%s10510_s23 + $0xa08] ss:$16 sps:$4 sm:$0xff]   ;;  %v1204_v11 = vpack.c.bf16 %v1156_v6, %v1156_v6  ;;  %v9586_v6 = vld [vmem:[%s10510_s23 + $0xbcc] ss:$16 sps:$4 sm:$0xff]  }
 0x32c   : > { %4475 = vmatprep.subr.bf16.mxu1 %v9427_v12  ;;  %4803 = vmatprep.subr.bf16.mxu0 %v9430_v13  ;;  %v9505_v12 = vld [vmem:[%s10510_s23 + $0xa24] ss:$16 sps:$4 sm:$0xff]   ;;  %v9508_v13 = vld [vmem:[%s10510_s23 + $0xa2c] ss:$16 sps:$4 sm:$0xff]  }
 0x32f   : > { %4476 = vmatpush1.bf16.msra.mxu1 %v9425_v14  ;;  %4804 = vmatpush1.bf16.msra.mxu0 %v9428_v15  ;;  %v9503_v14 = vld [vmem:[%s10510_s23 + $0xa20] ss:$16 sps:$4 sm:$0xff]   ;;  %v9506_v15 = vld [vmem:[%s10510_s23 + $0xa28] ss:$16 sps:$4 sm:$0xff]  }
 0x330   : > { %4477 = vmatprep.subr.bf16.mxu1 %v9433_v16  ;;  %4805 = vmatprep.subr.bf16.mxu0 %v9436_v17  ;;  %v9511_v16 = vld [vmem:[%s10510_s23 + $0xa44] ss:$16 sps:$4 sm:$0xff]   ;;  %v9514_v17 = vld [vmem:[%s10510_s23 + $0xa4c] ss:$16 sps:$4 sm:$0xff]  }
 0x333   : > { %4478 = vmatpush1.bf16.msra.mxu1 %v9431_v18  ;;  %4806 = vmatpush1.bf16.msra.mxu0 %v9434_v20  ;;  %v9509_v18 = vld [vmem:[%s10510_s23 + $0xa40] ss:$16 sps:$4 sm:$0xff]   ;;  %v9512_v20 = vld [vmem:[%s10510_s23 + $0xa48] ss:$16 sps:$4 sm:$0xff]  }
 0x334   : > { %4479 = vmatprep.subr.bf16.mxu1 %v9439_v21  ;;  %4807 = vmatprep.subr.bf16.mxu0 %v9442_v22  ;;  %v9517_v21 = vld [vmem:[%s10510_s23 + $0xa64] ss:$16 sps:$4 sm:$0xff]   ;;  %v9520_v22 = vld [vmem:[%s10510_s23 + $0xa6c] ss:$16 sps:$4 sm:$0xff]  }
 0x337   : > { %4480 = vmatpush1.bf16.msra.mxu1 %v9437_v23  ;;  %4808 = vmatpush1.bf16.msra.mxu0 %v9440_v24  ;;  %v9515_v23 = vld [vmem:[%s10510_s23 + $0xa60] ss:$16 sps:$4 sm:$0xff]   ;;  %v9518_v24 = vld [vmem:[%s10510_s23 + $0xa68] ss:$16 sps:$4 sm:$0xff]  }
 0x338   : > { %4481 = vmatprep.subr.bf16.mxu1 %v9445_v25  ;;  %4809 = vmatprep.subr.bf16.mxu0 %v9448_v26  ;;  %v9523_v25 = vld [vmem:[%s10510_s23 + $0xa84] ss:$16 sps:$4 sm:$0xff]   ;;  %v9526_v26 = vld [vmem:[%s10510_s23 + $0xa8c] ss:$16 sps:$4 sm:$0xff]  }
 0x33b   : > { %4482 = vmatpush1.bf16.msra.mxu1 %v9443_v27  ;;  %4810 = vmatpush1.bf16.msra.mxu0 %v9446_v29  ;;  %v9521_v27 = vld [vmem:[%s10510_s23 + $0xa80] ss:$16 sps:$4 sm:$0xff]   ;;  %v9524_v29 = vld [vmem:[%s10510_s23 + $0xa88] ss:$16 sps:$4 sm:$0xff]  }
 0x33c   : > { %4483 = vmatprep.subr.bf16.mxu1 %v9451_v30  ;;  %4811 = vmatprep.subr.bf16.mxu0 %v9454_v9  ;;  %v9529_v30 = vld [vmem:[%s10510_s23 + $0xaa4] ss:$16 sps:$4 sm:$0xff]   ;;  %v9532_v9 = vld [vmem:[%s10510_s23 + $0xaac] ss:$16 sps:$4 sm:$0xff]  }
 0x33f   : > { %4484 = vmatpush1.bf16.msra.mxu1 %v9449_v31  ;;  %4812 = vmatpush1.bf16.msra.mxu0 %v9452_v33  ;;  %v9527_v31 = vld [vmem:[%s10510_s23 + $0xaa0] ss:$16 sps:$4 sm:$0xff]   ;;  %v9530_v33 = vld [vmem:[%s10510_s23 + $0xaa8] ss:$16 sps:$4 sm:$0xff]  }
 0x340   : > { %4485 = vmatprep.subr.bf16.mxu1 %v9457_v34  ;;  %4813 = vmatprep.subr.bf16.mxu0 %v9460_v35  ;;  %v9535_v34 = vld [vmem:[%s10510_s23 + $0xac4] ss:$16 sps:$4 sm:$0xff]   ;;  %v9538_v35 = vld [vmem:[%s10510_s23 + $0xacc] ss:$16 sps:$4 sm:$0xff]  }
 0x343   : > { %4486 = vmatpush1.bf16.msra.mxu1 %v9455_v49  ;;  %4814 = vmatpush1.bf16.msra.mxu0 %v9458_v36  ;;  %v9533_v49 = vld [vmem:[%s10510_s23 + $0xac0] ss:$16 sps:$4 sm:$0xff]   ;;  %v9536_v36 = vld [vmem:[%s10510_s23 + $0xac8] ss:$16 sps:$4 sm:$0xff]  }
 0x344   : > { %4487 = vmatprep.subr.bf16.mxu1 %v9463_v37  ;;  %4815 = vmatprep.subr.bf16.mxu0 %v9466_v38  ;;  %v9541_v37 = vld [vmem:[%s10510_s23 + $0xae4] ss:$16 sps:$4 sm:$0xff]   ;;  %v9544_v38 = vld [vmem:[%s10510_s23 + $0xaec] ss:$16 sps:$4 sm:$0xff]  }
 0x347   : > { %4488 = vmatpush1.bf16.msra.mxu1 %v9461_v39  ;;  %4816 = vmatpush1.bf16.msra.mxu0 %v9464_v40  ;;  %v9539_v39 = vld [vmem:[%s10510_s23 + $0xae0] ss:$16 sps:$4 sm:$0xff]   ;;  %v9542_v40 = vld [vmem:[%s10510_s23 + $0xae8] ss:$16 sps:$4 sm:$0xff]  }
 0x348   : > { %4489 = vmatprep.subr.bf16.mxu1 %v9469_v41  ;;  %4817 = vmatprep.subr.bf16.mxu0 %v9472_v43  ;;  %v9547_v41 = vld [vmem:[%s10510_s23 + $0xb04] ss:$16 sps:$4 sm:$0xff]   ;;  %v9550_v43 = vld [vmem:[%s10510_s23 + $0xb0c] ss:$16 sps:$4 sm:$0xff]  }
 0x34b   : > { %4490 = vmatpush1.bf16.msra.mxu1 %v9467_v44  ;;  %4818 = vmatpush1.bf16.msra.mxu0 %v9470_v47  ;;  %v9545_v44 = vld [vmem:[%s10510_s23 + $0xb00] ss:$16 sps:$4 sm:$0xff]   ;;  %v9548_v47 = vld [vmem:[%s10510_s23 + $0xb08] ss:$16 sps:$4 sm:$0xff]  }
 0x34c   : > { %4491 = vmatprep.subr.bf16.mxu1 %v9475_v48  ;;  %4819 = vmatprep.subr.bf16.mxu0 %v9478_v50  ;;  %v9553_v48 = vld [vmem:[%s10510_s23 + $0xb24] ss:$16 sps:$4 sm:$0xff]   ;;  %v9556_v50 = vld [vmem:[%s10510_s23 + $0xb2c] ss:$16 sps:$4 sm:$0xff]  }
 0x34f   : > { %4492 = vmatpush1.bf16.msra.mxu1 %v9473_v51  ;;  %4820 = vmatpush1.bf16.msra.mxu0 %v9476_v55  ;;  %v9551_v51 = vld [vmem:[%s10510_s23 + $0xb20] ss:$16 sps:$4 sm:$0xff]   ;;  %v9554_v55 = vld [vmem:[%s10510_s23 + $0xb28] ss:$16 sps:$4 sm:$0xff]  }
 0x350   : > { %4493 = vmatprep.subr.bf16.mxu1 %v9481_v56  ;;  %4821 = vmatprep.subr.bf16.mxu0 %v9484_v57  ;;  %v9559_v56 = vld [vmem:[%s10510_s23 + $0xb44] ss:$16 sps:$4 sm:$0xff]   ;;  %v9562_v57 = vld [vmem:[%s10510_s23 + $0xb4c] ss:$16 sps:$4 sm:$0xff]  }
 0x353   : > { %4494 = vmatpush1.bf16.msra.mxu1 %v9479_v58  ;;  %4822 = vmatpush1.bf16.msra.mxu0 %v9482_v42  ;;  %v9557_v58 = vld [vmem:[%s10510_s23 + $0xb40] ss:$16 sps:$4 sm:$0xff]   ;;  %v9560_v42 = vld [vmem:[%s10510_s23 + $0xb48] ss:$16 sps:$4 sm:$0xff]  }
 0x354   : > { %4495 = vmatprep.subr.bf16.mxu1 %v9487_v59  ;;  %4823 = vmatprep.subr.bf16.mxu0 %v9490_v60  ;;  %v9565_v59 = vld [vmem:[%s10510_s23 + $0xb64] ss:$16 sps:$4 sm:$0xff]   ;;  %v9568_v60 = vld [vmem:[%s10510_s23 + $0xb6c] ss:$16 sps:$4 sm:$0xff]  }
 0x357   : > { %4496 = vmatpush1.bf16.msra.mxu1 %v9485_v61  ;;  %4824 = vmatpush1.bf16.msra.mxu0 %v9488_v32  ;;  %v9563_v61 = vld [vmem:[%s10510_s23 + $0xb60] ss:$16 sps:$4 sm:$0xff]   ;;  %v9566_v32 = vld [vmem:[%s10510_s23 + $0xb68] ss:$16 sps:$4 sm:$0xff]  }
 0x358   : > { %4497 = vmatprep.subr.bf16.mxu1 %v9493_v63  ;;  %4825 = vmatprep.subr.bf16.mxu0 %v9496_v0  ;;  %v9574_v63 = vld [vmem:[%s10510_s23 + $0xb8c] ss:$16 sps:$4 sm:$0xff]   ;;  %v9569_v0 = vld [vmem:[%s10510_s23 + $0xb80] ss:$16 sps:$4 sm:$0xff]  }
 0x35b   : > { %4498 = vmatpush1.bf16.msra.mxu1 %v9491_v3  ;;  %4826 = vmatpush1.bf16.msra.mxu0 %v9494_v4  ;;  %v9577_v3 = vld [vmem:[%s10510_s23 + $0xba4] ss:$16 sps:$4 sm:$0xff]   ;;  %v9580_v4 = vld [vmem:[%s10510_s23 + $0xbac] ss:$16 sps:$4 sm:$0xff]  }
 0x35c   : > { %4508 = vmatprep.subr.bf16.mxu1 %v9499_v5  ;;  %4836 = vmatprep.subr.bf16.mxu0 %v9502_v45  ;;  %v9578_v5 = vld [vmem:[%s10510_s23 + $0xba8] ss:$16 sps:$4 sm:$0xff]   ;;  %v9583_v45 = vld [vmem:[%s10510_s23 + $0xbc4] ss:$16 sps:$4 sm:$0xff]  }
 0x35e   : > { %4500 = vmatmul.mubr.bf16.vlgmr.msra.gmra.mrb[0].mxu1 %v1201_v7  ;;  %4828 = vmatmul.mubr.bf16.vlgmr.msra.gmra.mrb[32].mxu0 %v1201_v7  ;;  %v1123_v7 = vadd.f32 %v11067_v54, %v10903_v1  ;;  %v9590_v1 = vld [vmem:[%s10510_s23 + $0xbe8] ss:$16 sps:$4 sm:$0xff]  }
 0x35f   : > { %4509 = vmatpush1.bf16.msra.mxu1 %v9497_v8  ;;  %4540 = vmatprep.mubr.bf16.mxu1 %v1204_v11  ;;  %v9581_v8 = vld [vmem:[%s10510_s23 + $0xbc0] ss:$16 sps:$4 sm:$0xff]  }
 0x360   : > { %4837 = vmatpush1.bf16.msra.mxu0 %v9500_v10  ;;  %4868 = vmatprep.mubr.bf16.mxu0 %v1204_v11  ;;  %v9584_v10 = vld [vmem:[%s10510_s23 + $0xbc8] ss:$16 sps:$4 sm:$0xff]   ;;  %v9589_v11 = vld [vmem:[%s10510_s23 + $0xbe4] ss:$16 sps:$4 sm:$0xff]  }
 0x361   : > { %4510 = vmatprep.subr.bf16.mxu1 %v9505_v12  ;;  %4838 = vmatprep.subr.bf16.mxu0 %v9508_v13  ;;  %v9592_v12 = vld [vmem:[%s10510_s23 + $0xbec] ss:$16 sps:$4 sm:$0xff]   ;;  %v1134_v13 = vadd.f32 %v11067_v54, %v10929_v28  ;;  %v9596_v28 = vld [vmem:[%s10510_s23 + $0xc08] ss:$16 sps:$4 sm:$0xff]  }
 0x363   : > { %4511 = vmatpush1.bf16.msra.mxu1 %v9503_v14  ;;  %v9587_v14 = vld [vmem:[%s10510_s23 + $0xbe0] ss:$16 sps:$4 sm:$0xff]  }
 0x364   : > { %4839 = vmatpush1.bf16.msra.mxu0 %v9506_v15  ;;  %4512 = vmatprep.subr.bf16.mxu1 %v9511_v16  ;;  %v1155_v15 = vmax.f32 %v1123_v7, 0.0  ;;  %v9595_v16 = vld [vmem:[%s10510_s23 + $0xc04] ss:$16 sps:$4 sm:$0xff]   ;;  %v9670_v7 = vld [vmem:[%s10510_s23 + $0xd8c] ss:$16 sps:$4 sm:$0xff]  }
 0x365   : > { %4840 = vmatprep.subr.bf16.mxu0 %v9514_v17  ;;  %v9598_v17 = vld [vmem:[%s10510_s23 + $0xc0c] ss:$16 sps:$4 sm:$0xff]  }
 0x367   : > { %4513 = vmatpush1.bf16.msra.mxu1 %v9509_v18  ;;  %v1158_v18 = vmax.f32 %v1134_v13, 0.0  ;;  %v9676_v13 = vld [vmem:[%s10510_s23 + $0xdac] ss:$16 sps:$4 sm:$0xff]  }
 0x368   : > { %4841 = vmatpush1.bf16.msra.mxu0 %v9512_v20  ;;  %4514 = vmatprep.subr.bf16.mxu1 %v9517_v21  ;;  %v9593_v20 = vld [vmem:[%s10510_s23 + $0xc00] ss:$16 sps:$4 sm:$0xff]   ;;  %v1203_v21 = vpack.c.bf16 %v1155_v15, %v1155_v15  ;;  %v9674_v15 = vld [vmem:[%s10510_s23 + $0xda8] ss:$16 sps:$4 sm:$0xff]  }
 0x369   : > { %4842 = vmatprep.subr.bf16.mxu0 %v9520_v22  ;;  %v9601_v22 = vld [vmem:[%s10510_s23 + $0xc24] ss:$16 sps:$4 sm:$0xff]  }
 0x36b   : > { %4515 = vmatpush1.bf16.msra.mxu1 %v9515_v23  ;;  %v1206_v23 = vpack.c.bf16 %v1158_v18, %v1158_v18  ;;  %v1131_v18 = vadd.f32 %v11067_v54, %v10919_v19  ;;  %v9686_v19 = vld [vmem:[%s10510_s23 + $0xde8] ss:$16 sps:$4 sm:$0xff]  }
 0x36c   : > { %4843 = vmatpush1.bf16.msra.mxu0 %v9518_v24  ;;  %4516 = vmatprep.subr.bf16.mxu1 %v9523_v25  ;;  %v9604_v24 = vld [vmem:[%s10510_s23 + $0xc2c] ss:$16 sps:$4 sm:$0xff]   ;;  %v9599_v25 = vld [vmem:[%s10510_s23 + $0xc20] ss:$16 sps:$4 sm:$0xff]  }
 0x36d   : > { %4844 = vmatprep.subr.bf16.mxu0 %v9526_v26  ;;  %v9602_v26 = vld [vmem:[%s10510_s23 + $0xc28] ss:$16 sps:$4 sm:$0xff]  }
 0x36f   : > { %4517 = vmatpush1.bf16.msra.mxu1 %v9521_v27  ;;  %v9607_v27 = vld [vmem:[%s10510_s23 + $0xc44] ss:$16 sps:$4 sm:$0xff]  }
 0x370   : > { %4845 = vmatpush1.bf16.msra.mxu0 %v9524_v29  ;;  %4518 = vmatprep.subr.bf16.mxu1 %v9529_v30  ;;  %v9610_v29 = vld [vmem:[%s10510_s23 + $0xc4c] ss:$16 sps:$4 sm:$0xff]   ;;  %v9605_v30 = vld [vmem:[%s10510_s23 + $0xc40] ss:$16 sps:$4 sm:$0xff]  }
 0x371   : > { %4846 = vmatprep.subr.bf16.mxu0 %v9532_v9  ;;  %v9608_v9 = vld [vmem:[%s10510_s23 + $0xc48] ss:$16 sps:$4 sm:$0xff]  }
 0x373   : > { %4519 = vmatpush1.bf16.msra.mxu1 %v9527_v31  ;;  %v9613_v31 = vld [vmem:[%s10510_s23 + $0xc64] ss:$16 sps:$4 sm:$0xff]  }
 0x374   : > { %4847 = vmatpush1.bf16.msra.mxu0 %v9530_v33  ;;  %4520 = vmatprep.subr.bf16.mxu1 %v9535_v34  ;;  %v9616_v33 = vld [vmem:[%s10510_s23 + $0xc6c] ss:$16 sps:$4 sm:$0xff]   ;;  %v9611_v34 = vld [vmem:[%s10510_s23 + $0xc60] ss:$16 sps:$4 sm:$0xff]  }
 0x375   : > { %4848 = vmatprep.subr.bf16.mxu0 %v9538_v35  ;;  %v9614_v35 = vld [vmem:[%s10510_s23 + $0xc68] ss:$16 sps:$4 sm:$0xff]  }
 0x377   : > { %4521 = vmatpush1.bf16.msra.mxu1 %v9533_v49  ;;  %v9619_v49 = vld [vmem:[%s10510_s23 + $0xc84] ss:$16 sps:$4 sm:$0xff]  }
 0x378   : > { %4849 = vmatpush1.bf16.msra.mxu0 %v9536_v36  ;;  %4522 = vmatprep.subr.bf16.mxu1 %v9541_v37  ;;  %v9622_v36 = vld [vmem:[%s10510_s23 + $0xc8c] ss:$16 sps:$4 sm:$0xff]   ;;  %v9617_v37 = vld [vmem:[%s10510_s23 + $0xc80] ss:$16 sps:$4 sm:$0xff]  }
 0x379   : > { %4850 = vmatprep.subr.bf16.mxu0 %v9544_v38  ;;  %v9620_v38 = vld [vmem:[%s10510_s23 + $0xc88] ss:$16 sps:$4 sm:$0xff]  }
 0x37b   : > { %4523 = vmatpush1.bf16.msra.mxu1 %v9539_v39  ;;  %v9625_v39 = vld [vmem:[%s10510_s23 + $0xca4] ss:$16 sps:$4 sm:$0xff]  }
 0x37c   : > { %4851 = vmatpush1.bf16.msra.mxu0 %v9542_v40  ;;  %4524 = vmatprep.subr.bf16.mxu1 %v9547_v41  ;;  %v9628_v40 = vld [vmem:[%s10510_s23 + $0xcac] ss:$16 sps:$4 sm:$0xff]   ;;  %v9623_v41 = vld [vmem:[%s10510_s23 + $0xca0] ss:$16 sps:$4 sm:$0xff]  }
 0x37d   : > { %4852 = vmatprep.subr.bf16.mxu0 %v9550_v43  ;;  %v9626_v43 = vld [vmem:[%s10510_s23 + $0xca8] ss:$16 sps:$4 sm:$0xff]  }
 0x37f   : > { %4525 = vmatpush1.bf16.msra.mxu1 %v9545_v44  ;;  %v9631_v44 = vld [vmem:[%s10510_s23 + $0xcc4] ss:$16 sps:$4 sm:$0xff]  }
 0x380   : > { %4853 = vmatpush1.bf16.msra.mxu0 %v9548_v47  ;;  %4526 = vmatprep.subr.bf16.mxu1 %v9553_v48  ;;  %v9634_v47 = vld [vmem:[%s10510_s23 + $0xccc] ss:$16 sps:$4 sm:$0xff]   ;;  %v9629_v48 = vld [vmem:[%s10510_s23 + $0xcc0] ss:$16 sps:$4 sm:$0xff]  }
 0x381   : > { %4854 = vmatprep.subr.bf16.mxu0 %v9556_v50  ;;  %v9632_v50 = vld [vmem:[%s10510_s23 + $0xcc8] ss:$16 sps:$4 sm:$0xff]  }
 0x383   : > { %4527 = vmatpush1.bf16.msra.mxu1 %v9551_v51  ;;  %v9637_v51 = vld [vmem:[%s10510_s23 + $0xce4] ss:$16 sps:$4 sm:$0xff]  }
 0x384   : > { %4855 = vmatpush1.bf16.msra.mxu0 %v9554_v55  ;;  %4528 = vmatprep.subr.bf16.mxu1 %v9559_v56  ;;  %v9640_v55 = vld [vmem:[%s10510_s23 + $0xcec] ss:$16 sps:$4 sm:$0xff]   ;;  %v9635_v56 = vld [vmem:[%s10510_s23 + $0xce0] ss:$16 sps:$4 sm:$0xff]  }
 0x385   : > { %4856 = vmatprep.subr.bf16.mxu0 %v9562_v57  ;;  %v9638_v57 = vld [vmem:[%s10510_s23 + $0xce8] ss:$16 sps:$4 sm:$0xff]  }
 0x387   : > { %4529 = vmatpush1.bf16.msra.mxu1 %v9557_v58  ;;  %v9643_v58 = vld [vmem:[%s10510_s23 + $0xd04] ss:$16 sps:$4 sm:$0xff]  }
 0x388   : > { %4857 = vmatpush1.bf16.msra.mxu0 %v9560_v42  ;;  %4530 = vmatprep.subr.bf16.mxu1 %v9565_v59  ;;  %v9646_v42 = vld [vmem:[%s10510_s23 + $0xd0c] ss:$16 sps:$4 sm:$0xff]   ;;  %v9641_v59 = vld [vmem:[%s10510_s23 + $0xd00] ss:$16 sps:$4 sm:$0xff]  }
 0x389   : > { %4858 = vmatprep.subr.bf16.mxu0 %v9568_v60  ;;  %v9644_v60 = vld [vmem:[%s10510_s23 + $0xd08] ss:$16 sps:$4 sm:$0xff]  }
 0x38b   : > { %4531 = vmatpush1.bf16.msra.mxu1 %v9563_v61  ;;  %v9649_v61 = vld [vmem:[%s10510_s23 + $0xd24] ss:$16 sps:$4 sm:$0xff]  }
 0x38c   : > { %4859 = vmatpush1.bf16.msra.mxu0 %v9566_v32  ;;  %4532 = vmatprep.subr.bf16.mxu1 %v9571_v62  ;;  %v9652_v32 = vld [vmem:[%s10510_s23 + $0xd2c] ss:$16 sps:$4 sm:$0xff]   ;;  %v9647_v62 = vld [vmem:[%s10510_s23 + $0xd20] ss:$16 sps:$4 sm:$0xff]  }
 0x38d   : > { %4860 = vmatprep.subr.bf16.mxu0 %v9574_v63  ;;  %v9650_v63 = vld [vmem:[%s10510_s23 + $0xd28] ss:$16 sps:$4 sm:$0xff]  }
 0x38f   : > { %4533 = vmatpush1.bf16.msra.mxu1 %v9569_v0  ;;  %v9655_v0 = vld [vmem:[%s10510_s23 + $0xd44] ss:$16 sps:$4 sm:$0xff]  }
 0x390   : > { %4861 = vmatpush1.bf16.msra.mxu0 %v9572_v2  ;;  %4534 = vmatprep.subr.bf16.mxu1 %v9577_v3  ;;  %v9658_v2 = vld [vmem:[%s10510_s23 + $0xd4c] ss:$16 sps:$4 sm:$0xff]   ;;  %v9653_v3 = vld [vmem:[%s10510_s23 + $0xd40] ss:$16 sps:$4 sm:$0xff]  }
 0x391   : > { %4862 = vmatprep.subr.bf16.mxu0 %v9580_v4  ;;  %v9656_v4 = vld [vmem:[%s10510_s23 + $0xd48] ss:$16 sps:$4 sm:$0xff]  }
 0x393   : > { %4535 = vmatpush1.bf16.msra.mxu1 %v9575_v52  ;;  %v9661_v52 = vld [vmem:[%s10510_s23 + $0xd64] ss:$16 sps:$4 sm:$0xff]  }
 0x394   : > { %4863 = vmatpush1.bf16.msra.mxu0 %v9578_v5  ;;  %4536 = vmatprep.subr.bf16.mxu1 %v9583_v45  ;;  %v9664_v5 = vld [vmem:[%s10510_s23 + $0xd6c] ss:$16 sps:$4 sm:$0xff]   ;;  %v9659_v45 = vld [vmem:[%s10510_s23 + $0xd60] ss:$16 sps:$4 sm:$0xff]  }
 0x395   : > { %4864 = vmatprep.subr.bf16.mxu0 %v9586_v6  ;;  %v9662_v6 = vld [vmem:[%s10510_s23 + $0xd68] ss:$16 sps:$4 sm:$0xff]  }
 0x397   : > { %4537 = vmatpush1.bf16.msra.mxu1 %v9581_v8  ;;  %v9667_v8 = vld [vmem:[%s10510_s23 + $0xd84] ss:$16 sps:$4 sm:$0xff]  }
 0x398   : > { %4865 = vmatpush1.bf16.msra.mxu0 %v9584_v10  ;;  %4538 = vmatprep.subr.bf16.mxu1 %v9589_v11  ;;  %v9665_v10 = vld [vmem:[%s10510_s23 + $0xd80] ss:$16 sps:$4 sm:$0xff]   ;;  %v9668_v11 = vld [vmem:[%s10510_s23 + $0xd88] ss:$16 sps:$4 sm:$0xff]  }
 0x399   : > { %4866 = vmatprep.subr.bf16.mxu0 %v9592_v12  ;;  %v9673_v12 = vld [vmem:[%s10510_s23 + $0xda4] ss:$16 sps:$4 sm:$0xff]  }
 0x39b   : > { %4539 = vmatpush1.bf16.msra.mxu1 %v9587_v14  ;;  %v9671_v14 = vld [vmem:[%s10510_s23 + $0xda0] ss:$16 sps:$4 sm:$0xff]  }
 0x39c   : > { %4867 = vmatpush1.bf16.msra.mxu0 %v9590_v1  ;;  %4549 = vmatprep.subr.bf16.mxu1 %v9595_v16  ;;  %v9679_v1 = vld [vmem:[%s10510_s23 + $0xdc4] ss:$16 sps:$4 sm:$0xff]   ;;  %v9682_v16 = vld [vmem:[%s10510_s23 + $0xdcc] ss:$16 sps:$4 sm:$0xff]  }
 0x39d   : > { %4877 = vmatprep.subr.bf16.mxu0 %v9598_v17  ;;  %v9677_v17 = vld [vmem:[%s10510_s23 + $0xdc0] ss:$16 sps:$4 sm:$0xff]  }
 0x39e   : > { %4541 = vmatmul.mubr.bf16.vlgmr.msra.gmra.mrb[0].mxu1 %v1203_v21 }
 0x39f   : > { %4869 = vmatmul.mubr.bf16.vlgmr.msra.gmra.mrb[32].mxu0 %v1203_v21  ;;  %4550 = vmatpush1.bf16.msra.mxu1 %v9593_v20  ;;  %v9680_v20 = vld [vmem:[%s10510_s23 + $0xdc8] ss:$16 sps:$4 sm:$0xff]   ;;  %v9685_v21 = vld [vmem:[%s10510_s23 + $0xde4] ss:$16 sps:$4 sm:$0xff]  }
 0x3a0   : > { %4581 = vmatprep.mubr.bf16.mxu1 %v1206_v23  ;;  %4878 = vmatpush1.bf16.msra.mxu0 %v9596_v28  ;;  %v9688_v28 = vld [vmem:[%s10510_s23 + $0xdec] ss:$16 sps:$4 sm:$0xff]  }
 0x3a1   : > { %4909 = vmatprep.mubr.bf16.mxu0 %v1206_v23  ;;  %4551 = vmatprep.subr.bf16.mxu1 %v9601_v22  ;;  %v1142_v22 = vadd.f32 %v11067_v54, %v10945_v53  ;;  %v9683_v23 = vld [vmem:[%s10510_s23 + $0xde0] ss:$16 sps:$4 sm:$0xff]   ;;  %v9692_v53 = vld [vmem:[%s10510_s23 + $0xe08] ss:$16 sps:$4 sm:$0xff]  }
 0x3a2   : > { %4879 = vmatprep.subr.bf16.mxu0 %v9604_v24  ;;  %v1157_v24 = vmax.f32 %v1131_v18, 0.0  ;;  %v9764_v18 = vld [vmem:[%s10510_s23 + $0xf88] ss:$16 sps:$4 sm:$0xff]  }
 0x3a3   : > { %4552 = vmatpush1.bf16.msra.mxu1 %v9599_v25  ;;  %v9691_v25 = vld [vmem:[%s10510_s23 + $0xe04] ss:$16 sps:$4 sm:$0xff]  }
 0x3a4   : > { %4880 = vmatpush1.bf16.msra.mxu0 %v9602_v26  ;;  %4553 = vmatprep.subr.bf16.mxu1 %v9607_v27  ;;  %v9694_v26 = vld [vmem:[%s10510_s23 + $0xe0c] ss:$16 sps:$4 sm:$0xff]   ;;  %v1160_v27 = vmax.f32 %v1142_v22, 0.0  ;;  %v9770_v22 = vld [vmem:[%s10510_s23 + $0xfa8] ss:$16 sps:$4 sm:$0xff]  }
 0x3a5   : > { %4881 = vmatprep.subr.bf16.mxu0 %v9610_v29  ;;  %v9689_v29 = vld [vmem:[%s10510_s23 + $0xe00] ss:$16 sps:$4 sm:$0xff]  }
 0x3a7   : > { %4554 = vmatpush1.bf16.msra.mxu1 %v9605_v30  ;;  %v1205_v30 = vpack.c.bf16 %v1157_v24, %v1157_v24  ;;  %v9778_v24 = vld [vmem:[%s10510_s23 + $0xfcc] ss:$16 sps:$4 sm:$0xff]  }
 0x3a8   : > { %4882 = vmatpush1.bf16.msra.mxu0 %v9608_v9  ;;  %4555 = vmatprep.subr.bf16.mxu1 %v9613_v31  ;;  %v9697_v9 = vld [vmem:[%s10510_s23 + $0xe24] ss:$16 sps:$4 sm:$0xff]   ;;  %v1208_v31 = vpack.c.bf16 %v1160_v27, %v1160_v27 }
 0x3a9   : > { %4883 = vmatprep.subr.bf16.mxu0 %v9616_v33  ;;  %v9700_v33 = vld [vmem:[%s10510_s23 + $0xe2c] ss:$16 sps:$4 sm:$0xff]   ;;  %v9781_v27 = vld [vmem:[%s10510_s23 + $0xfe4] ss:$16 sps:$4 sm:$0xff]  }
 0x3ab   : > { %4556 = vmatpush1.bf16.msra.mxu1 %v9611_v34  ;;  %v9695_v34 = vld [vmem:[%s10510_s23 + $0xe20] ss:$16 sps:$4 sm:$0xff]  }
 0x3ac   : > { %4884 = vmatpush1.bf16.msra.mxu0 %v9614_v35  ;;  %4557 = vmatprep.subr.bf16.mxu1 %v9619_v49  ;;  %v9698_v35 = vld [vmem:[%s10510_s23 + $0xe28] ss:$16 sps:$4 sm:$0xff]   ;;  %v9703_v49 = vld [vmem:[%s10510_s23 + $0xe44] ss:$16 sps:$4 sm:$0xff]  }
 0x3ad   : > { %4885 = vmatprep.subr.bf16.mxu0 %v9622_v36  ;;  %v9706_v36 = vld [vmem:[%s10510_s23 + $0xe4c] ss:$16 sps:$4 sm:$0xff]  }
 0x3af   : > { %4558 = vmatpush1.bf16.msra.mxu1 %v9617_v37  ;;  %v9701_v37 = vld [vmem:[%s10510_s23 + $0xe40] ss:$16 sps:$4 sm:$0xff]  }
 0x3b0   : > { %4886 = vmatpush1.bf16.msra.mxu0 %v9620_v38  ;;  %4559 = vmatprep.subr.bf16.mxu1 %v9625_v39  ;;  %v9704_v38 = vld [vmem:[%s10510_s23 + $0xe48] ss:$16 sps:$4 sm:$0xff]   ;;  %v9709_v39 = vld [vmem:[%s10510_s23 + $0xe64] ss:$16 sps:$4 sm:$0xff]  }
 0x3b1   : > { %4887 = vmatprep.subr.bf16.mxu0 %v9628_v40  ;;  %v9712_v40 = vld [vmem:[%s10510_s23 + $0xe6c] ss:$16 sps:$4 sm:$0xff]  }
 0x3b3   : > { %4560 = vmatpush1.bf16.msra.mxu1 %v9623_v41  ;;  %v9707_v41 = vld [vmem:[%s10510_s23 + $0xe60] ss:$16 sps:$4 sm:$0xff]  }
 0x3b4   : > { %4888 = vmatpush1.bf16.msra.mxu0 %v9626_v43  ;;  %4561 = vmatprep.subr.bf16.mxu1 %v9631_v44  ;;  %v9710_v43 = vld [vmem:[%s10510_s23 + $0xe68] ss:$16 sps:$4 sm:$0xff]   ;;  %v9715_v44 = vld [vmem:[%s10510_s23 + $0xe84] ss:$16 sps:$4 sm:$0xff]  }
 0x3b5   : > { %4889 = vmatprep.subr.bf16.mxu0 %v9634_v47  ;;  %v9718_v47 = vld [vmem:[%s10510_s23 + $0xe8c] ss:$16 sps:$4 sm:$0xff]  }
 0x3b7   : > { %4562 = vmatpush1.bf16.msra.mxu1 %v9629_v48  ;;  %v9713_v48 = vld [vmem:[%s10510_s23 + $0xe80] ss:$16 sps:$4 sm:$0xff]  }
 0x3b8   : > { %4890 = vmatpush1.bf16.msra.mxu0 %v9632_v50  ;;  %4563 = vmatprep.subr.bf16.mxu1 %v9637_v51  ;;  %v9716_v50 = vld [vmem:[%s10510_s23 + $0xe88] ss:$16 sps:$4 sm:$0xff]   ;;  %v9721_v51 = vld [vmem:[%s10510_s23 + $0xea4] ss:$16 sps:$4 sm:$0xff]  }
 0x3b9   : > { %4891 = vmatprep.subr.bf16.mxu0 %v9640_v55  ;;  %v9724_v55 = vld [vmem:[%s10510_s23 + $0xeac] ss:$16 sps:$4 sm:$0xff]  }
 0x3bb   : > { %4564 = vmatpush1.bf16.msra.mxu1 %v9635_v56  ;;  %v9719_v56 = vld [vmem:[%s10510_s23 + $0xea0] ss:$16 sps:$4 sm:$0xff]  }
 0x3bc   : > { %4892 = vmatpush1.bf16.msra.mxu0 %v9638_v57  ;;  %4565 = vmatprep.subr.bf16.mxu1 %v9643_v58  ;;  %v9722_v57 = vld [vmem:[%s10510_s23 + $0xea8] ss:$16 sps:$4 sm:$0xff]   ;;  %v9727_v58 = vld [vmem:[%s10510_s23 + $0xec4] ss:$16 sps:$4 sm:$0xff]  }
 0x3bd   : > { %4893 = vmatprep.subr.bf16.mxu0 %v9646_v42  ;;  %v9730_v42 = vld [vmem:[%s10510_s23 + $0xecc] ss:$16 sps:$4 sm:$0xff]  }
 0x3bf   : > { %4566 = vmatpush1.bf16.msra.mxu1 %v9641_v59  ;;  %v9725_v59 = vld [vmem:[%s10510_s23 + $0xec0] ss:$16 sps:$4 sm:$0xff]  }
 0x3c0   : > { %4894 = vmatpush1.bf16.msra.mxu0 %v9644_v60  ;;  %4567 = vmatprep.subr.bf16.mxu1 %v9649_v61  ;;  %v9728_v60 = vld [vmem:[%s10510_s23 + $0xec8] ss:$16 sps:$4 sm:$0xff]   ;;  %v9733_v61 = vld [vmem:[%s10510_s23 + $0xee4] ss:$16 sps:$4 sm:$0xff]  }
 0x3c1   : > { %4895 = vmatprep.subr.bf16.mxu0 %v9652_v32  ;;  %v9736_v32 = vld [vmem:[%s10510_s23 + $0xeec] ss:$16 sps:$4 sm:$0xff]  }
 0x3c3   : > { %4568 = vmatpush1.bf16.msra.mxu1 %v9647_v62  ;;  %v9731_v62 = vld [vmem:[%s10510_s23 + $0xee0] ss:$16 sps:$4 sm:$0xff]  }
 0x3c4   : > { %4896 = vmatpush1.bf16.msra.mxu0 %v9650_v63  ;;  %4569 = vmatprep.subr.bf16.mxu1 %v9655_v0  ;;  %v9734_v63 = vld [vmem:[%s10510_s23 + $0xee8] ss:$16 sps:$4 sm:$0xff]   ;;  %v9739_v0 = vld [vmem:[%s10510_s23 + $0xf04] ss:$16 sps:$4 sm:$0xff]  }
 0x3c5   : > { %4897 = vmatprep.subr.bf16.mxu0 %v9658_v2  ;;  %v9742_v2 = vld [vmem:[%s10510_s23 + $0xf0c] ss:$16 sps:$4 sm:$0xff]  }
 0x3c7   : > { %4570 = vmatpush1.bf16.msra.mxu1 %v9653_v3  ;;  %v9737_v3 = vld [vmem:[%s10510_s23 + $0xf00] ss:$16 sps:$4 sm:$0xff]  }
 0x3c8   : > { %4898 = vmatpush1.bf16.msra.mxu0 %v9656_v4  ;;  %4571 = vmatprep.subr.bf16.mxu1 %v9661_v52  ;;  %v9740_v4 = vld [vmem:[%s10510_s23 + $0xf08] ss:$16 sps:$4 sm:$0xff]   ;;  %v9745_v52 = vld [vmem:[%s10510_s23 + $0xf24] ss:$16 sps:$4 sm:$0xff]  }
 0x3c9   : > { %4899 = vmatprep.subr.bf16.mxu0 %v9664_v5  ;;  %v9748_v5 = vld [vmem:[%s10510_s23 + $0xf2c] ss:$16 sps:$4 sm:$0xff]  }
 0x3cb   : > { %4572 = vmatpush1.bf16.msra.mxu1 %v9659_v45  ;;  %v9743_v45 = vld [vmem:[%s10510_s23 + $0xf20] ss:$16 sps:$4 sm:$0xff]  }
 0x3cc   : > { %4900 = vmatpush1.bf16.msra.mxu0 %v9662_v6  ;;  %4573 = vmatprep.subr.bf16.mxu1 %v9667_v8  ;;  %v9746_v6 = vld [vmem:[%s10510_s23 + $0xf28] ss:$16 sps:$4 sm:$0xff]   ;;  %v9751_v8 = vld [vmem:[%s10510_s23 + $0xf44] ss:$16 sps:$4 sm:$0xff]  }
 0x3cd   : > { %4901 = vmatprep.subr.bf16.mxu0 %v9670_v7  ;;  %v9754_v7 = vld [vmem:[%s10510_s23 + $0xf4c] ss:$16 sps:$4 sm:$0xff]  }
 0x3cf   : > { %4574 = vmatpush1.bf16.msra.mxu1 %v9665_v10  ;;  %v9749_v10 = vld [vmem:[%s10510_s23 + $0xf40] ss:$16 sps:$4 sm:$0xff]  }
 0x3d0   : > { %4902 = vmatpush1.bf16.msra.mxu0 %v9668_v11  ;;  %4575 = vmatprep.subr.bf16.mxu1 %v9673_v12  ;;  %v9752_v11 = vld [vmem:[%s10510_s23 + $0xf48] ss:$16 sps:$4 sm:$0xff]   ;;  %v9757_v12 = vld [vmem:[%s10510_s23 + $0xf64] ss:$16 sps:$4 sm:$0xff]  }
 0x3d1   : > { %4903 = vmatprep.subr.bf16.mxu0 %v9676_v13  ;;  %v9760_v13 = vld [vmem:[%s10510_s23 + $0xf6c] ss:$16 sps:$4 sm:$0xff]  }
 0x3d3   : > { %4576 = vmatpush1.bf16.msra.mxu1 %v9671_v14  ;;  %v9755_v14 = vld [vmem:[%s10510_s23 + $0xf60] ss:$16 sps:$4 sm:$0xff]  }
 0x3d4   : > { %4904 = vmatpush1.bf16.msra.mxu0 %v9674_v15  ;;  %4577 = vmatprep.subr.bf16.mxu1 %v9679_v1  ;;  %v9758_v15 = vld [vmem:[%s10510_s23 + $0xf68] ss:$16 sps:$4 sm:$0xff]   ;;  %v9763_v1 = vld [vmem:[%s10510_s23 + $0xf84] ss:$16 sps:$4 sm:$0xff]  }
 0x3d5   : > { %4905 = vmatprep.subr.bf16.mxu0 %v9682_v16  ;;  %v9766_v16 = vld [vmem:[%s10510_s23 + $0xf8c] ss:$16 sps:$4 sm:$0xff]  }
 0x3d7   : > { %4578 = vmatpush1.bf16.msra.mxu1 %v9677_v17  ;;  %v9761_v17 = vld [vmem:[%s10510_s23 + $0xf80] ss:$16 sps:$4 sm:$0xff]  }
 0x3d8   : > { %4906 = vmatpush1.bf16.msra.mxu0 %v9680_v20  ;;  %4579 = vmatprep.subr.bf16.mxu1 %v9685_v21  ;;  %v9769_v20 = vld [vmem:[%s10510_s23 + $0xfa4] ss:$16 sps:$4 sm:$0xff]   ;;  %v9772_v21 = vld [vmem:[%s10510_s23 + $0xfac] ss:$16 sps:$4 sm:$0xff]  }
 0x3d9   : > { %4907 = vmatprep.subr.bf16.mxu0 %v9688_v28  ;;  %v9767_v28 = vld [vmem:[%s10510_s23 + $0xfa0] ss:$16 sps:$4 sm:$0xff]  }
 0x3db   : > { %4580 = vmatpush1.bf16.msra.mxu1 %v9683_v23  ;;  %v9775_v23 = vld [vmem:[%s10510_s23 + $0xfc4] ss:$16 sps:$4 sm:$0xff]  }
 0x3dc   : > { %4908 = vmatpush1.bf16.msra.mxu0 %v9686_v19  ;;  %4590 = vmatprep.subr.bf16.mxu1 %v9691_v25  ;;  %v9773_v19 = vld [vmem:[%s10510_s23 + $0xfc0] ss:$16 sps:$4 sm:$0xff]   ;;  %v1139_v25 = vadd.f32 %v11067_v54, %v10941_v46  ;;  %v9782_v46 = vld [vmem:[%s10510_s23 + $0xfe8] ss:$16 sps:$4 sm:$0xff]  }
 0x3dd   : > { %4918 = vmatprep.subr.bf16.mxu0 %v9694_v26  ;;  %v9776_v26 = vld [vmem:[%s10510_s23 + $0xfc8] ss:$16 sps:$4 sm:$0xff]  }
 0x3de   : > { %4582 = vmatmul.mubr.bf16.vlgmr.msra.gmra.mrb[0].mxu1 %v1205_v30 }
 0x3df   : > { %4910 = vmatmul.mubr.bf16.vlgmr.msra.gmra.mrb[32].mxu0 %v1205_v30  ;;  %4591 = vmatpush1.bf16.msra.mxu1 %v9689_v29  ;;  %v9784_v29 = vld [vmem:[%s10510_s23 + $0xfec] ss:$16 sps:$4 sm:$0xff]  }
 0x3e0   : > { %4622 = vmatprep.mubr.bf16.mxu1 %v1208_v31  ;;  %4919 = vmatpush1.bf16.msra.mxu0 %v9692_v53  ;;  %v4967_v30 = vld [vmem:[%s10519_s29] sm:$0xff] }
 0x3e1   : > { %4950 = vmatprep.mubr.bf16.mxu0 %v1208_v31  ;;  %4592 = vmatprep.subr.bf16.mxu1 %v9697_v9  ;;  %v4971_v53 = vld [vmem:[%s10519_s29 + $0x20] sm:$0xff]  ;;  %v4968_v9 = vld [vmem:[%s10519_s29 + $0x8] sm:$0xff] }
 0x3e2   : > { %4920 = vmatprep.subr.bf16.mxu0 %v9700_v33  ;;  %v4972_v31 = vld [vmem:[%s10519_s29 + $0x28] sm:$0xff]  ;;  %v8345_v54 = vcombine.high %v4967_v30, %v4971_v53 }
 0x3e3   : > { %4593 = vmatpush1.bf16.msra.mxu1 %v9695_v34  ;;  %v9779_v33 = vld [vmem:[%s10510_s23 + $0xfe0] ss:$16 sps:$4 sm:$0xff]   ;;  %v1159_v34 = vmax.f32 %v1139_v25, 0.0 }
 0x3e4   : > { %4921 = vmatpush1.bf16.msra.mxu0 %v9698_v35  ;;  %4594 = vmatprep.subr.bf16.mxu1 %v9703_v49  ;;  %v8347_v35 = vcombine.high %v4968_v9, %v4972_v31  ;;  %v4975_v49 = vld [vmem:[%s10519_s29 + $0x40] sm:$0xff]  ;;  %v5024_v25 = vld [vmem:[%s10519_s29 + $0x1c8] sm:$0xff] }
 0x3e5   : > { %4922 = vmatprep.subr.bf16.mxu0 %v9706_v36  ;;  %v4979_v36 = vld [vmem:[%s10519_s29 + $0x60] sm:$0xff] }
 0x3e7   : > { %4595 = vmatpush1.bf16.msra.mxu1 %v9701_v37  ;;  %v4976_v37 = vld [vmem:[%s10519_s29 + $0x48] sm:$0xff] }
 0x3e8   : > { %4923 = vmatpush1.bf16.msra.mxu0 %v9704_v38  ;;  %4596 = vmatprep.subr.bf16.mxu1 %v9709_v39  ;;  %v4980_v38 = vld [vmem:[%s10519_s29 + $0x68] sm:$0xff]  ;;  %v8344_v39 = vcombine.low %v4967_v30, %v4971_v53 }
 0x3e9   : > { %4924 = vmatprep.subr.bf16.mxu0 %v9712_v40  ;;  %v1207_v40 = vpack.c.bf16 %v1159_v34, %v1159_v34  ;;  %v5036_v34 = vld [vmem:[%s10519_s29 + $0x228] sm:$0xff] }
 0x3eb   : > { %4597 = vmatpush1.bf16.msra.mxu1 %v9707_v41  ;;  %v8346_v41 = vcombine.low %v4968_v9, %v4972_v31  ;;  %v5031_v9 = vld [vmem:[%s10519_s29 + $0x200] sm:$0xff] }
 0x3ec   : > { %4925 = vmatpush1.bf16.msra.mxu0 %v9710_v43  ;;  %4598 = vmatprep.subr.bf16.mxu1 %v9715_v44  ;;  %v8353_v43 = vcombine.high %v4975_v49, %v4979_v36  ;;  %v8355_v44 = vcombine.high %v4976_v37, %v4980_v38  ;;  %v5035_v31 = vld [vmem:[%s10519_s29 + $0x220] sm:$0xff] }
 0x3ed   : > { %4926 = vmatprep.subr.bf16.mxu0 %v9718_v47  ;;  %v4983_v47 = vld [vmem:[%s10519_s29 + $0x80] sm:$0xff] }
 0x3ef   : > { %4599 = vmatpush1.bf16.msra.mxu1 %v9713_v48  ;;  %v4987_v48 = vld [vmem:[%s10519_s29 + $0xa0] sm:$0xff] }
 0x3f0   : > { %4927 = vmatpush1.bf16.msra.mxu0 %v9716_v50  ;;  %4600 = vmatprep.subr.bf16.mxu1 %v9721_v51  ;;  %v4984_v50 = vld [vmem:[%s10519_s29 + $0x88] sm:$0xff] }
 0x3f1   : > { %4928 = vmatprep.subr.bf16.mxu0 %v9724_v55  ;;  %v4988_v51 = vld [vmem:[%s10519_s29 + $0xa8] sm:$0xff]  ;;  %v8352_v55 = vcombine.low %v4975_v49, %v4979_v36  ;;  %v5039_v36 = vld [vmem:[%s10519_s29 + $0x240] sm:$0xff] }
 0x3f3   : > { %4601 = vmatpush1.bf16.msra.mxu1 %v9719_v56  ;;  %v8354_v56 = vcombine.low %v4976_v37, %v4980_v38  ;;  %v5043_v37 = vld [vmem:[%s10519_s29 + $0x260] sm:$0xff]  ;;  %v5040_v38 = vld [vmem:[%s10519_s29 + $0x248] sm:$0xff] }
 0x3f4   : > { %4929 = vmatpush1.bf16.msra.mxu0 %v9722_v57  ;;  %4602 = vmatprep.subr.bf16.mxu1 %v9727_v58  ;;  %v8361_v57 = vcombine.high %v4983_v47, %v4987_v48  ;;  %v8363_v58 = vcombine.high %v4984_v50, %v4988_v51 }
 0x3f5   : > { %4930 = vmatprep.subr.bf16.mxu0 %v9730_v42  ;;  %v4991_v42 = vld [vmem:[%s10519_s29 + $0xc0] sm:$0xff] }
 0x3f7   : > { %4603 = vmatpush1.bf16.msra.mxu1 %v9725_v59  ;;  %v4995_v59 = vld [vmem:[%s10519_s29 + $0xe0] sm:$0xff] }
 0x3f8   : > { %4931 = vmatpush1.bf16.msra.mxu0 %v9728_v60  ;;  %4604 = vmatprep.subr.bf16.mxu1 %v9733_v61  ;;  %v4992_v60 = vld [vmem:[%s10519_s29 + $0xc8] sm:$0xff] }
 0x3f9   : > { %4932 = vmatprep.subr.bf16.mxu0 %v9736_v32  ;;  %v4996_v61 = vld [vmem:[%s10519_s29 + $0xe8] sm:$0xff]  ;;  %v8360_v32 = vcombine.low %v4983_v47, %v4987_v48  ;;  %v5047_v47 = vld [vmem:[%s10519_s29 + $0x280] sm:$0xff] }
 0x3fa   : > { %v5051_v48 = vld [vmem:[%s10519_s29 + $0x2a0] sm:$0xff] }
 0x3fb   : > { %4605 = vmatpush1.bf16.msra.mxu1 %v9731_v62  ;;  %v8362_v62 = vcombine.low %v4984_v50, %v4988_v51  ;;  %v5048_v50 = vld [vmem:[%s10519_s29 + $0x288] sm:$0xff] }
 0x3fc   : > { %4933 = vmatpush1.bf16.msra.mxu0 %v9734_v63  ;;  %4606 = vmatprep.subr.bf16.mxu1 %v9739_v0  ;;  %v8369_v63 = vcombine.high %v4991_v42, %v4995_v59  ;;  %v8371_v0 = vcombine.high %v4992_v60, %v4996_v61  ;;  %v5052_v51 = vld [vmem:[%s10519_s29 + $0x2a8] sm:$0xff] }
 0x3fd   : > { %4934 = vmatprep.subr.bf16.mxu0 %v9742_v2  ;;  %v4999_v2 = vld [vmem:[%s10519_s29 + $0x100] sm:$0xff] }
 0x3ff   : > { %4607 = vmatpush1.bf16.msra.mxu1 %v9737_v3  ;;  %v5003_v3 = vld [vmem:[%s10519_s29 + $0x120] sm:$0xff] }
 0x400   : > { %4935 = vmatpush1.bf16.msra.mxu0 %v9740_v4  ;;  %4608 = vmatprep.subr.bf16.mxu1 %v9745_v52  ;;  %v5000_v4 = vld [vmem:[%s10519_s29 + $0x108] sm:$0xff] }
 0x401   : > { %4936 = vmatprep.subr.bf16.mxu0 %v9748_v5  ;;  %v5004_v52 = vld [vmem:[%s10519_s29 + $0x128] sm:$0xff]  ;;  %v8368_v5 = vcombine.low %v4991_v42, %v4995_v59  ;;  %v5055_v42 = vld [vmem:[%s10519_s29 + $0x2c0] sm:$0xff] }
 0x402   : > { %v5059_v59 = vld [vmem:[%s10519_s29 + $0x2e0] sm:$0xff] }
 0x403   : > { %4609 = vmatpush1.bf16.msra.mxu1 %v9743_v45  ;;  %v8370_v45 = vcombine.low %v4992_v60, %v4996_v61  ;;  %v5056_v60 = vld [vmem:[%s10519_s29 + $0x2c8] sm:$0xff] }
 0x404   : > { %4937 = vmatpush1.bf16.msra.mxu0 %v9746_v6  ;;  %4610 = vmatprep.subr.bf16.mxu1 %v9751_v8  ;;  %v8377_v6 = vcombine.high %v4999_v2, %v5003_v3  ;;  %v8379_v8 = vcombine.high %v5000_v4, %v5004_v52  ;;  %v5060_v61 = vld [vmem:[%s10519_s29 + $0x2e8] sm:$0xff] }
 0x405   : > { %4938 = vmatprep.subr.bf16.mxu0 %v9754_v7  ;;  %v5007_v7 = vld [vmem:[%s10519_s29 + $0x140] sm:$0xff] }
 0x407   : > { %4611 = vmatpush1.bf16.msra.mxu1 %v9749_v10  ;;  %v5011_v10 = vld [vmem:[%s10519_s29 + $0x160] sm:$0xff] }
 0x408   : > { %4939 = vmatpush1.bf16.msra.mxu0 %v9752_v11  ;;  %4612 = vmatprep.subr.bf16.mxu1 %v9757_v12  ;;  %v5008_v11 = vld [vmem:[%s10519_s29 + $0x148] sm:$0xff] }
 0x409   : > { %4940 = vmatprep.subr.bf16.mxu0 %v9760_v13  ;;  %v5012_v12 = vld [vmem:[%s10519_s29 + $0x168] sm:$0xff]  ;;  %v8376_v13 = vcombine.low %v4999_v2, %v5003_v3  ;;  %v5063_v2 = vld [vmem:[%s10519_s29 + $0x300] sm:$0xff] }
 0x40a   : > { %v5067_v3 = vld [vmem:[%s10519_s29 + $0x320] sm:$0xff] }
 0x40b   : > { %4613 = vmatpush1.bf16.msra.mxu1 %v9755_v14  ;;  %v8378_v14 = vcombine.low %v5000_v4, %v5004_v52  ;;  %v5064_v4 = vld [vmem:[%s10519_s29 + $0x308] sm:$0xff] }
 0x40c   : > { %4941 = vmatpush1.bf16.msra.mxu0 %v9758_v15  ;;  %4614 = vmatprep.subr.bf16.mxu1 %v9763_v1  ;;  %v8385_v15 = vcombine.high %v5007_v7, %v5011_v10  ;;  %v8387_v1 = vcombine.high %v5008_v11, %v5012_v12  ;;  %v5068_v52 = vld [vmem:[%s10519_s29 + $0x328] sm:$0xff] }
 0x40d   : > { %4942 = vmatprep.subr.bf16.mxu0 %v9766_v16  ;;  %v5015_v16 = vld [vmem:[%s10519_s29 + $0x180] sm:$0xff] }
 0x40f   : > { %4615 = vmatpush1.bf16.msra.mxu1 %v9761_v17  ;;  %v5019_v17 = vld [vmem:[%s10519_s29 + $0x1a0] sm:$0xff] }
 0x410   : > { %4943 = vmatpush1.bf16.msra.mxu0 %v9764_v18  ;;  %4616 = vmatprep.subr.bf16.mxu1 %v9769_v20  ;;  %v5016_v18 = vld [vmem:[%s10519_s29 + $0x188] sm:$0xff] }
 0x411   : > { %4944 = vmatprep.subr.bf16.mxu0 %v9772_v21  ;;  %v5020_v20 = vld [vmem:[%s10519_s29 + $0x1a8] sm:$0xff]  ;;  %v8384_v21 = vcombine.low %v5007_v7, %v5011_v10  ;;  %v5071_v7 = vld [vmem:[%s10519_s29 + $0x340] sm:$0xff] }
 0x412   : > { %v5075_v10 = vld [vmem:[%s10519_s29 + $0x360] sm:$0xff] }
 0x413   : > { %4617 = vmatpush1.bf16.msra.mxu1 %v9767_v28  ;;  %v8386_v28 = vcombine.low %v5008_v11, %v5012_v12  ;;  %v5072_v11 = vld [vmem:[%s10519_s29 + $0x348] sm:$0xff] }
 0x414   : > { %4945 = vmatpush1.bf16.msra.mxu0 %v9770_v22  ;;  %4618 = vmatprep.subr.bf16.mxu1 %v9775_v23  ;;  %v8393_v22 = vcombine.high %v5015_v16, %v5019_v17  ;;  %v8395_v23 = vcombine.high %v5016_v18, %v5020_v20  ;;  %v5076_v12 = vld [vmem:[%s10519_s29 + $0x368] sm:$0xff] }
 0x415   : > { %4946 = vmatprep.subr.bf16.mxu0 %v9778_v24  ;;  %v5023_v24 = vld [vmem:[%s10519_s29 + $0x1c0] sm:$0xff] }
 0x417   : > { %4619 = vmatpush1.bf16.msra.mxu1 %v9773_v19  ;;  %v5027_v19 = vld [vmem:[%s10519_s29 + $0x1e0] sm:$0xff] }
 0x418   : > { %4947 = vmatpush1.bf16.msra.mxu0 %v9776_v26  ;;  %4620 = vmatprep.subr.bf16.mxu1 %v9781_v27  ;;  %v5028_v26 = vld [vmem:[%s10519_s29 + $0x1e8] sm:$0xff]  ;;  %v8392_v27 = vcombine.low %v5015_v16, %v5019_v17  ;;  %v8401_v30 = vcombine.high %v5023_v24, %v5027_v19  ;;  %v8448_v16 = vcombine.low %v5071_v7, %v5075_v10 }
 0x419   : > { %4948 = vmatprep.subr.bf16.mxu0 %v9784_v29  ;;  %v8394_v29 = vcombine.low %v5016_v18, %v5020_v20  ;;  %v8403_v53 = vcombine.high %v5024_v25, %v5028_v26  ;;  %v8450_v17 = vcombine.low %v5072_v11, %v5076_v12  ;;  %v5079_v18 = vld [vmem:[%s10519_s29 + $0x380] sm:$0xff] }
 0x41a   : > { %v5083_v20 = vld [vmem:[%s10519_s29 + $0x3a0] sm:$0xff] }
 0x41b   : > { %4621 = vmatpush1.bf16.msra.mxu1 %v9779_v33  ;;  %v5032_v33 = vld [vmem:[%s10519_s29 + $0x208] sm:$0xff] }
 0x41c   : > { %4949 = vmatpush1.bf16.msra.mxu0 %v9782_v46  ;;  %6503 = vmatprep.subr.bf16.mxu1 %v8345_v54  ;;  %v8400_v46 = vcombine.low %v5023_v24, %v5027_v19  ;;  %v8402_v54 = vcombine.low %v5024_v25, %v5028_v26  ;;  %v8411_v49 = vcombine.high %v5032_v33, %v5036_v34  ;;  %v5087_v25 = vld [vmem:[%s10519_s29 + $0x3c0] sm:$0xff] }
 0x41d   : > { %6585 = vmatprep.subr.bf16.mxu0 %v8347_v35  ;;  %v8409_v35 = vcombine.high %v5031_v9, %v5035_v31  ;;  %v5091_v26 = vld [vmem:[%s10519_s29 + $0x3e0] sm:$0xff] }
 0x41e   : > { %4623 = vmatmul.mubr.bf16.vlgmr.msra.gmra.mrb[0].mxu1 %v1207_v40 }
 0x41f   : > { %4951 = vmatmul.mubr.bf16.vlgmr.msra.gmra.mrb[32].mxu0 %v1207_v40  ;;  %6504 = vmatpush1.bf16.msra.mxu1 %v8344_v39  ;;  %v5044_v39 = vld [vmem:[%s10519_s29 + $0x268] sm:$0xff]  ;;  %v8408_v40 = vcombine.low %v5031_v9, %v5035_v31 }
 0x420   : > { %6586 = vmatpush1.bf16.msra.mxu0 %v8346_v41  ;;  %6505 = vmatprep.subr.bf16.mxu1 %v8353_v43  ;;  %v8410_v41 = vcombine.low %v5032_v33, %v5036_v34  ;;  %v8417_v43 = vcombine.high %v5039_v36, %v5043_v37  ;;  %v5095_v33 = vld [vmem:[%s10519_s29 + $0x400] sm:$0xff] }
 0x421   : > { %6587 = vmatprep.subr.bf16.mxu0 %v8355_v44  ;;  %v8419_v44 = vcombine.high %v5040_v38, %v5044_v39  ;;  %v5099_v34 = vld [vmem:[%s10519_s29 + $0x420] sm:$0xff] }
 0x423   : > { %6506 = vmatpush1.bf16.msra.mxu1 %v8352_v55  ;;  %v8416_v55 = vcombine.low %v5039_v36, %v5043_v37 }
 0x424   : > { %6588 = vmatpush1.bf16.msra.mxu0 %v8354_v56  ;;  %6507 = vmatprep.subr.bf16.mxu1 %v8361_v57  ;;  %v8418_v56 = vcombine.low %v5040_v38, %v5044_v39  ;;  %v8425_v57 = vcombine.high %v5047_v47, %v5051_v48  ;;  %v1723_v38 = vlaneseq }
 0x425   : > { %6589 = vmatprep.subr.bf16.mxu0 %v8363_v58  ;;  %v8427_v58 = vcombine.high %v5048_v50, %v5052_v51 }
 0x426   : > { %v11347_v39 = vshrl.u32 %v1723_v38, 7  ;;  %v5143_v38 = vld [vmem:[%s10519_s29 + $0x580] sm:$0xff] }
 0x427   : > { %6508 = vmatpush1.bf16.msra.mxu1 %v8360_v32  ;;  %v8424_v32 = vcombine.low %v5047_v47, %v5051_v48 }
 0x428   : > { %6590 = vmatpush1.bf16.msra.mxu0 %v8362_v62  ;;  %6509 = vmatprep.subr.bf16.mxu1 %v8369_v63  ;;  %v8426_v62 = vcombine.low %v5048_v50, %v5052_v51  ;;  %v8433_v63 = vcombine.high %v5055_v42, %v5059_v59 }
 0x429   : > { %6591 = vmatprep.subr.bf16.mxu0 %v8371_v0  ;;  %v8435_v0 = vcombine.high %v5056_v60, %v5060_v61 }
 0x42b   : > { %6510 = vmatpush1.bf16.msra.mxu1 %v8368_v5  ;;  %v8432_v5 = vcombine.low %v5055_v42, %v5059_v59 }
 0x42c   : > { %6592 = vmatpush1.bf16.msra.mxu0 %v8370_v45  ;;  %6511 = vmatprep.subr.bf16.mxu1 %v8377_v6  ;;  %v8434_v45 = vcombine.low %v5056_v60, %v5060_v61  ;;  %v8441_v6 = vcombine.high %v5063_v2, %v5067_v3 }
 0x42d   : > { %6593 = vmatprep.subr.bf16.mxu0 %v8379_v8  ;;  %v8443_v8 = vcombine.high %v5064_v4, %v5068_v52 }
 0x42f   : > { %6512 = vmatpush1.bf16.msra.mxu1 %v8376_v13  ;;  %v8440_v13 = vcombine.low %v5063_v2, %v5067_v3  ;;  %v5103_v2 = vld [vmem:[%s10519_s29 + $0x440] sm:$0xff] }
 0x430   : > { %6594 = vmatpush1.bf16.msra.mxu0 %v8378_v14  ;;  %6513 = vmatprep.subr.bf16.mxu1 %v8385_v15  ;;  %v8442_v14 = vcombine.low %v5064_v4, %v5068_v52  ;;  %v8449_v15 = vcombine.high %v5071_v7, %v5075_v10  ;;  %v5107_v4 = vld [vmem:[%s10519_s29 + $0x460] sm:$0xff]  ;;  %v5104_v52 = vld [vmem:[%s10519_s29 + $0x448] sm:$0xff] }
 0x431   : > { %6595 = vmatprep.subr.bf16.mxu0 %v8387_v1  ;;  %v8451_v1 = vcombine.high %v5072_v11, %v5076_v12  ;;  %v8481_v7 = vcombine.high %v5103_v2, %v5107_v4  ;;  %v5115_v11 = vld [vmem:[%s10519_s29 + $0x4a0] sm:$0xff]  ;;  %v5112_v12 = vld [vmem:[%s10519_s29 + $0x488] sm:$0xff] }
 0x433   : > { %6514 = vmatpush1.bf16.msra.mxu1 %v8384_v21  ;;  %v5080_v21 = vld [vmem:[%s10519_s29 + $0x388] sm:$0xff] }
 0x434   : > { %6596 = vmatpush1.bf16.msra.mxu0 %v8386_v28  ;;  %6515 = vmatprep.subr.bf16.mxu1 %v8393_v22  ;;  %v8457_v28 = vcombine.high %v5079_v18, %v5083_v20  ;;  %v5084_v22 = vld [vmem:[%s10519_s29 + $0x3a8] sm:$0xff] }
 0x435   : > { %6597 = vmatprep.subr.bf16.mxu0 %v8395_v23  ;;  %v8456_v23 = vcombine.low %v5079_v18, %v5083_v20  ;;  %v8458_v24 = vcombine.low %v5080_v21, %v5084_v22  ;;  %v8459_v19 = vcombine.high %v5080_v21, %v5084_v22  ;;  %v5119_v18 = vld [vmem:[%s10519_s29 + $0x4c0] sm:$0xff]  ;;  %v5120_v21 = vld [vmem:[%s10519_s29 + $0x4c8] sm:$0xff] }
 0x436   : > { %v5123_v20 = vld [vmem:[%s10519_s29 + $0x4e0] sm:$0xff] }
 0x437   : > { %6516 = vmatpush1.bf16.msra.mxu1 %v8392_v27  ;;  %v5088_v27 = vld [vmem:[%s10519_s29 + $0x3c8] sm:$0xff] }
 0x438   : > { %6598 = vmatpush1.bf16.msra.mxu0 %v8394_v29  ;;  %6517 = vmatprep.subr.bf16.mxu1 %v8401_v30  ;;  %v8465_v29 = vcombine.high %v5087_v25, %v5091_v26  ;;  %v5092_v30 = vld [vmem:[%s10519_s29 + $0x3e8] sm:$0xff] }
 0x439   : > { %6599 = vmatprep.subr.bf16.mxu0 %v8403_v53  ;;  %v8464_v53 = vcombine.low %v5087_v25, %v5091_v26  ;;  %v8466_v9 = vcombine.low %v5088_v27, %v5092_v30  ;;  %v8467_v31 = vcombine.high %v5088_v27, %v5092_v30  ;;  %v5127_v25 = vld [vmem:[%s10519_s29 + $0x500] sm:$0xff]  ;;  %v5128_v27 = vld [vmem:[%s10519_s29 + $0x508] sm:$0xff]  ;;  %v8496_v30 = vcombine.low %v5119_v18, %v5123_v20 }
 0x43a   : > { %v5131_v26 = vld [vmem:[%s10519_s29 + $0x520] sm:$0xff] }
 0x43b   : > { %6518 = vmatpush1.bf16.msra.mxu1 %v8400_v46  ;;  %v5096_v46 = vld [vmem:[%s10519_s29 + $0x408] sm:$0xff] }
 0x43c   : > { %6600 = vmatpush1.bf16.msra.mxu0 %v8402_v54  ;;  %6519 = vmatprep.subr.bf16.mxu1 %v8409_v35  ;;  %v8472_v54 = vcombine.low %v5095_v33, %v5099_v34  ;;  %v8473_v35 = vcombine.high %v5095_v33, %v5099_v34  ;;  %v5135_v33 = vld [vmem:[%s10519_s29 + $0x540] sm:$0xff] }
 0x43d   : > { %6601 = vmatprep.subr.bf16.mxu0 %v8411_v49  ;;  %v5100_v49 = vld [vmem:[%s10519_s29 + $0x428] sm:$0xff]  ;;  %v5139_v34 = vld [vmem:[%s10519_s29 + $0x560] sm:$0xff] }
 0x43e   : > { %v8474_v36 = vcombine.low %v5096_v46, %v5100_v49  ;;  %v8475_v37 = vcombine.high %v5096_v46, %v5100_v49  ;;  %v5136_v46 = vld [vmem:[%s10519_s29 + $0x548] sm:$0xff] }
 0x43f   : > { %6520 = vmatpush1.bf16.msra.mxu1 %v8408_v40  ;;  %v1725_v40 = vsub.s32 0, %v11347_v39 }
 0x440   : > { %6602 = vmatpush1.bf16.msra.mxu0 %v8410_v41  ;;  %6521 = vmatprep.subr.bf16.mxu1 %v8417_v43  ;;  %v11351_v41 = vld [vmem:[%s10512_s27] sm:$0xf]  ;;  %v1729_v43 = vsub.s32 1, %v11347_v39 }
 0x441   : > { %6603 = vmatprep.subr.bf16.mxu0 %v8419_v44  ;;  %v1737_v44 = vsub.s32 3, %v11347_v39  ;;  %v1726_v47 = vrot.slane %v11351_v41, %v1725_v40 }
 0x442   : > { %v1730_v48 = vrot.slane %v11351_v41, %v1729_v43 }
 0x443   : > { %6522 = vmatpush1.bf16.msra.mxu1 %v8416_v55  ;;  %v1738_v50 = vrot.slane %v11351_v41, %v1737_v44 }
 0x444   : > { %6604 = vmatpush1.bf16.msra.mxu0 %v8418_v56  ;;  %6523 = vmatprep.subr.bf16.mxu1 %v8425_v57 }
 0x445   : > { %6605 = vmatprep.subr.bf16.mxu0 %v8427_v58 }
 0x447   : > { %6524 = vmatpush1.bf16.msra.mxu1 %v8424_v32 }
 0x448   : > { %6606 = vmatpush1.bf16.msra.mxu0 %v8426_v62  ;;  %6525 = vmatprep.subr.bf16.mxu1 %v8433_v63 }
 0x449   : > { %6607 = vmatprep.subr.bf16.mxu0 %v8435_v0 }
 0x44b   : > { %6526 = vmatpush1.bf16.msra.mxu1 %v8432_v5  ;;  %v5108_v5 = vld [vmem:[%s10519_s29 + $0x468] sm:$0xff] }
 0x44c   : > { %6608 = vmatpush1.bf16.msra.mxu0 %v8434_v45  ;;  %6527 = vmatprep.subr.bf16.mxu1 %v8441_v6  ;;  %v8483_v10 = vcombine.high %v5104_v52, %v5108_v5 }
 0x44d   : > { %6609 = vmatprep.subr.bf16.mxu0 %v8443_v8  ;;  %v5111_v8 = vld [vmem:[%s10519_s29 + $0x480] sm:$0xff] }
 0x44e   : > { %v8488_v22 = vcombine.low %v5111_v8, %v5115_v11 }
 0x44f   : > { %6528 = vmatpush1.bf16.msra.mxu1 %v8440_v13  ;;  %v5116_v13 = vld [vmem:[%s10519_s29 + $0x4a8] sm:$0xff] }
 0x450   : > { %6610 = vmatpush1.bf16.msra.mxu0 %v8442_v14  ;;  %6529 = vmatprep.subr.bf16.mxu1 %v8449_v15  ;;  %v8480_v15 = vcombine.low %v5103_v2, %v5107_v4  ;;  %v5159_v2 = vld [vmem:[%s10519_s29 + $0x600] sm:$0xff]  ;;  %v5160_v4 = vld [vmem:[%s10519_s29 + $0x608] sm:$0xff] }
 0x451   : > { %6611 = vmatprep.subr.bf16.mxu0 %v8451_v1  ;;  %v8482_v1 = vcombine.low %v5104_v52, %v5108_v5  ;;  %v5164_v52 = vld [vmem:[%s10519_s29 + $0x628] sm:$0xff] }
 0x453   : > { %6530 = vmatpush1.bf16.msra.mxu1 %v8448_v16  ;;  %v8489_v16 = vcombine.high %v5111_v8, %v5115_v11  ;;  %v5167_v11 = vld [vmem:[%s10519_s29 + $0x640] sm:$0xff] }
 0x454   : > { %6612 = vmatpush1.bf16.msra.mxu0 %v8450_v17  ;;  %6531 = vmatprep.subr.bf16.mxu1 %v8457_v28  ;;  %v8491_v17 = vcombine.high %v5112_v12, %v5116_v13  ;;  %v5124_v28 = vld [vmem:[%s10519_s29 + $0x4e8] sm:$0xff] }
 0x455   : > { %6613 = vmatprep.subr.bf16.mxu0 %v8459_v19  ;;  %v8499_v19 = vcombine.high %v5120_v21, %v5124_v28 }
 0x457   : > { %6532 = vmatpush1.bf16.msra.mxu1 %v8456_v23  ;;  %v8490_v23 = vcombine.low %v5112_v12, %v5116_v13  ;;  %v5171_v12 = vld [vmem:[%s10519_s29 + $0x660] sm:$0xff]  ;;  %v5168_v13 = vld [vmem:[%s10519_s29 + $0x648] sm:$0xff] }
 0x458   : > { %6614 = vmatpush1.bf16.msra.mxu0 %v8458_v24  ;;  %6533 = vmatprep.subr.bf16.mxu1 %v8465_v29  ;;  %v8497_v24 = vcombine.high %v5119_v18, %v5123_v20  ;;  %v5132_v29 = vld [vmem:[%s10519_s29 + $0x528] sm:$0xff]  ;;  %v5175_v20 = vld [vmem:[%s10519_s29 + $0x680] sm:$0xff] }
 0x459   : > { %6615 = vmatprep.subr.bf16.mxu0 %v8467_v31  ;;  %v8507_v31 = vcombine.high %v5128_v27, %v5132_v29  ;;  %v8506_v49 = vcombine.low %v5128_v27, %v5132_v29  ;;  %v5187_v27 = vld [vmem:[%s10519_s29 + $0x6e0] sm:$0xff]  ;;  %v5184_v29 = vld [vmem:[%s10519_s29 + $0x6c8] sm:$0xff] }
 0x45b   : > { %6534 = vmatpush1.bf16.msra.mxu1 %v8464_v53  ;;  %v8498_v53 = vcombine.low %v5120_v21, %v5124_v28  ;;  %v5179_v21 = vld [vmem:[%s10519_s29 + $0x6a0] sm:$0xff]  ;;  %v5176_v28 = vld [vmem:[%s10519_s29 + $0x688] sm:$0xff] }
 0x45c   : > { %6616 = vmatpush1.bf16.msra.mxu0 %v8466_v9  ;;  %6544 = vmatprep.subr.bf16.mxu1 %v8473_v35  ;;  %v8505_v9 = vcombine.high %v5127_v25, %v5131_v26  ;;  %v8504_v35 = vcombine.low %v5127_v25, %v5131_v26  ;;  %v5183_v26 = vld [vmem:[%s10519_s29 + $0x6c0] sm:$0xff] }
 0x45d   : > { %6626 = vmatprep.subr.bf16.mxu0 %v8475_v37 }
 0x4f1   : > { %v4624_v51 = vpop.f32.mrb[0].mxu1 }
 0x4f2   : > { %v8828_v55 = vadd.f32 %v4624_v51, %v1726_v47  ;;  %v11364_v56 = vpop.f32.mrb[32].mxu0  ;;  %v4626_v57 = vpop.f32.mrb[1].mxu1  ;;  %v5147_v47 = vld [vmem:[%s10519_s29 + $0x5a0] sm:$0xff]  ;;  %v8512_v51 = vcombine.low %v5135_v33, %v5139_v34 }
 0x4f3   : > { %v8829_v58 = vadd.f32 %v4626_v57, %v1730_v48  ;;  %v4954_v42 = vpop.f32.mrb[33].mxu0  ;;  %v4628_v59 = vpop.f32.mrb[2].mxu1  ;;  %v5144_v48 = vld [vmem:[%s10519_s29 + $0x588] sm:$0xff]  ;;  %v8521_v57 = vcombine.high %v5143_v38, %v5147_v47 }
 0x4f4   : > { %v4959_v60 = vmax.f32 %v8828_v55, 0.0  ;;  %v8831_v61 = vadd.f32 %v4954_v42, %v1738_v50  ;;  %v4956_v32 = vpop.f32.mrb[34].mxu0  ;;  %v4629_v62 = vpop.f32.mrb[3].mxu1  ;;  %v5148_v50 = vld [vmem:[%s10519_s29 + $0x5a8] sm:$0xff]  ;;  %v5151_v42 = vld [vmem:[%s10519_s29 + $0x5c0] sm:$0xff] }
 0x4f5   : > { %v4960_v63 = vmax.f32 %v8829_v58, 0.0  ;;  %v4957_v0 = vpop.f32.mrb[35].mxu0  ;;  %v8523_v58 = vcombine.high %v5144_v48, %v5148_v50  ;;  %v5155_v59 = vld [vmem:[%s10519_s29 + $0x5e0] sm:$0xff]  ;;  %v8520_v32 = vcombine.low %v5143_v38, %v5147_v47  ;;  %v8522_v62 = vcombine.low %v5144_v48, %v5148_v50  ;;  %v5200_v50 = vld [vmem:[%s10519_s29 + $0x748] sm:$0xff] }
 0x4f6   : > { %v4962_v3 = vmax.f32 %v8831_v61, 0.0  ;;  %v11372_v6 = vpack.c.bf16 %v4959_v60, %v4959_v60  ;;  %v5152_v60 = vld [vmem:[%s10519_s29 + $0x5c8] sm:$0xff]  ;;  %v8528_v5 = vcombine.low %v5151_v42, %v5155_v59  ;;  %v5199_v47 = vld [vmem:[%s10519_s29 + $0x740] sm:$0xff] }
 0x4f7   : > { %v11370_v45 = vpack.c.bf16 %v4960_v63, %v4960_v63  ;;  %v5156_v61 = vld [vmem:[%s10519_s29 + $0x5e8] sm:$0xff]  ;;  %v8529_v63 = vcombine.high %v5151_v42, %v5155_v59  ;;  %v5203_v48 = vld [vmem:[%s10519_s29 + $0x760] sm:$0xff] }
 0x4f8   : > { %v11380_v14 = vpack.c.bf16 %v4962_v3, %v4962_v3  ;;  %v8531_v0 = vcombine.high %v5152_v60, %v5156_v61  ;;  %v5163_v3 = vld [vmem:[%s10519_s29 + $0x620] sm:$0xff]  ;;  %v8530_v8 = vcombine.low %v5152_v60, %v5156_v61  ;;  %v8577_v42 = vcombine.high %v5199_v47, %v5203_v48 }
 0x4f9   : > { %6535 = vmatprep.mubr.bf16.mxu1 %v11370_v45  ;;  %6617 = vmatprep.mubr.bf16.mxu0 %v11370_v45  ;;  %v5207_v60 = vld [vmem:[%s10519_s29 + $0x780] sm:$0xff] }
 0x4fa   : > { %6536 = vmatmul.mubr.bf16.vlgmr.msra.gmra.mrb[4].mxu1 %v11372_v6  ;;  %6618 = vmatmul.mubr.bf16.vlgmr.msra.gmra.mrb[36].mxu0 %v11372_v6  ;;  %v5211_v61 = vld [vmem:[%s10519_s29 + $0x7a0] sm:$0xff] }
 0x4fb   : > { %6545 = vmatpush1.bf16.msra.mxu1 %v8472_v54  ;;  %6627 = vmatpush1.bf16.msra.mxu0 %v8474_v36  ;;  %v5140_v54 = vld [vmem:[%s10519_s29 + $0x568] sm:$0xff]  ;;  %v8513_v36 = vcombine.high %v5135_v33, %v5139_v34  ;;  %v5191_v34 = vld [vmem:[%s10519_s29 + $0x700] sm:$0xff] }
 0x4fc   : > { %6576 = vmatprep.mubr.bf16.mxu1 %v11380_v14  ;;  %6658 = vmatprep.mubr.bf16.mxu0 %v11380_v14  ;;  %v8515_v37 = vcombine.high %v5136_v46, %v5140_v54  ;;  %v8514_v55 = vcombine.low %v5136_v46, %v5140_v54  ;;  %v5195_v46 = vld [vmem:[%s10519_s29 + $0x720] sm:$0xff]  ;;  %v5192_v54 = vld [vmem:[%s10519_s29 + $0x708] sm:$0xff] }
 0x4fd   : > { %6546 = vmatprep.subr.bf16.mxu1 %v8481_v7  ;;  %6628 = vmatprep.subr.bf16.mxu0 %v8483_v10  ;;  %v8537_v7 = vcombine.high %v5159_v2, %v5163_v3  ;;  %v8539_v10 = vcombine.high %v5160_v4, %v5164_v52 }
 0x4ff   : > { %6547 = vmatpush1.bf16.msra.mxu1 %v8480_v15  ;;  %6629 = vmatpush1.bf16.msra.mxu0 %v8482_v1  ;;  %v5172_v15 = vld [vmem:[%s10519_s29 + $0x668] sm:$0xff]  ;;  %v8536_v1 = vcombine.low %v5159_v2, %v5163_v3  ;;  %v8585_v3 = vcombine.high %v5207_v60, %v5211_v61 }
 0x500   : > { %6548 = vmatprep.subr.bf16.mxu1 %v8489_v16  ;;  %6630 = vmatprep.subr.bf16.mxu0 %v8491_v17  ;;  %v8538_v16 = vcombine.low %v5160_v4, %v5164_v52  ;;  %v8545_v17 = vcombine.high %v5167_v11, %v5171_v12  ;;  %v8547_v18 = vcombine.high %v5168_v13, %v5172_v15  ;;  %v5215_v52 = vld [vmem:[%s10519_s29 + $0x7c0] sm:$0xff] }
 0x503   : > { %6549 = vmatpush1.bf16.msra.mxu1 %v8488_v22  ;;  %6631 = vmatpush1.bf16.msra.mxu0 %v8490_v23  ;;  %v5180_v22 = vld [vmem:[%s10519_s29 + $0x6a8] sm:$0xff]  ;;  %v8544_v23 = vcombine.low %v5167_v11, %v5171_v12 }
 0x504   : > { %6550 = vmatprep.subr.bf16.mxu1 %v8497_v24  ;;  %6632 = vmatprep.subr.bf16.mxu0 %v8499_v19  ;;  %v8546_v24 = vcombine.low %v5168_v13, %v5172_v15  ;;  %v8553_v19 = vcombine.high %v5175_v20, %v5179_v21  ;;  %v8555_v25 = vcombine.high %v5176_v28, %v5180_v22  ;;  %v4969_v15 = vld [vmem:[%s10519_s29 + $0x10] sm:$0xff] }
 0x507   : > { %6551 = vmatpush1.bf16.msra.mxu1 %v8496_v30  ;;  %6633 = vmatpush1.bf16.msra.mxu0 %v8498_v53  ;;  %v5188_v30 = vld [vmem:[%s10519_s29 + $0x6e8] sm:$0xff]  ;;  %v8552_v53 = vcombine.low %v5175_v20, %v5179_v21 }
 0x508   : > { %6552 = vmatprep.subr.bf16.mxu1 %v8505_v9  ;;  %6634 = vmatprep.subr.bf16.mxu0 %v8507_v31  ;;  %v8554_v9 = vcombine.low %v5176_v28, %v5180_v22  ;;  %v8561_v31 = vcombine.high %v5183_v26, %v5187_v27  ;;  %v8563_v33 = vcombine.high %v5184_v29, %v5188_v30  ;;  %v4977_v22 = vld [vmem:[%s10519_s29 + $0x50] sm:$0xff] }
 0x50b   : > { %6553 = vmatpush1.bf16.msra.mxu1 %v8504_v35  ;;  %6635 = vmatpush1.bf16.msra.mxu0 %v8506_v49  ;;  %v5196_v35 = vld [vmem:[%s10519_s29 + $0x728] sm:$0xff]  ;;  %v8560_v49 = vcombine.low %v5183_v26, %v5187_v27 }
 0x50c   : > { %6554 = vmatprep.subr.bf16.mxu1 %v8513_v36  ;;  %6636 = vmatprep.subr.bf16.mxu0 %v8515_v37  ;;  %v8562_v36 = vcombine.low %v5184_v29, %v5188_v30  ;;  %v8569_v37 = vcombine.high %v5191_v34, %v5195_v46  ;;  %v8571_v38 = vcombine.high %v5192_v54, %v5196_v35 }
 0x50f   : > { %6555 = vmatpush1.bf16.msra.mxu1 %v8512_v51  ;;  %6637 = vmatpush1.bf16.msra.mxu0 %v8514_v55  ;;  %v5204_v51 = vld [vmem:[%s10519_s29 + $0x768] sm:$0xff]  ;;  %v8568_v55 = vcombine.low %v5191_v34, %v5195_v46 }
 0x510   : > { %6556 = vmatprep.subr.bf16.mxu1 %v8521_v57  ;;  %6638 = vmatprep.subr.bf16.mxu0 %v8523_v58  ;;  %v8570_v57 = vcombine.low %v5192_v54, %v5196_v35  ;;  %v1733_v58 = vsub.s32 2, %v11347_v39  ;;  %v8579_v59 = vcombine.high %v5200_v50, %v5204_v51 }
 0x512   : > { %v1734_v2 = vrot.slane %v11351_v41, %v1733_v58 }
 0x513   : > { %6557 = vmatpush1.bf16.msra.mxu1 %v8520_v32  ;;  %6639 = vmatpush1.bf16.msra.mxu0 %v8522_v62  ;;  %v5208_v32 = vld [vmem:[%s10519_s29 + $0x788] sm:$0xff] }
 0x514   : > { %6558 = vmatprep.subr.bf16.mxu1 %v8529_v63  ;;  %6640 = vmatprep.subr.bf16.mxu0 %v8531_v0  ;;  %v5212_v62 = vld [vmem:[%s10519_s29 + $0x7a8] sm:$0xff]  ;;  %v8576_v63 = vcombine.low %v5199_v47, %v5203_v48  ;;  %v8578_v0 = vcombine.low %v5200_v50, %v5204_v51  ;;  %v8830_v12 = vadd.f32 %v11364_v56, %v1734_v2  ;;  %v5001_v51 = vld [vmem:[%s10519_s29 + $0x110] sm:$0xff]  ;;  %v5014_v2 = vld [vmem:[%s10519_s29 + $0x178] sm:$0xff] }
 0x515   : > { %v8587_v4 = vcombine.high %v5208_v32, %v5212_v62  ;;  %v8586_v11 = vcombine.low %v5208_v32, %v5212_v62  ;;  %v5009_v62 = vld [vmem:[%s10519_s29 + $0x150] sm:$0xff] }
 0x516   : > { %v4961_v21 = vmax.f32 %v8830_v12, 0.0 }
 0x517   : > { %6559 = vmatpush1.bf16.msra.mxu1 %v8528_v5  ;;  %6641 = vmatpush1.bf16.msra.mxu0 %v8530_v8  ;;  %v5219_v5 = vld [vmem:[%s10519_s29 + $0x7e0] sm:$0xff]  ;;  %v5216_v8 = vld [vmem:[%s10519_s29 + $0x7c8] sm:$0xff] }
 0x518   : > { %6560 = vmatprep.subr.bf16.mxu1 %v8537_v7  ;;  %6642 = vmatprep.subr.bf16.mxu0 %v8539_v10  ;;  %v5220_v7 = vld [vmem:[%s10519_s29 + $0x7e8] sm:$0xff]  ;;  %v8584_v10 = vcombine.low %v5207_v60, %v5211_v61  ;;  %v8593_v41 = vcombine.high %v5215_v52, %v5219_v5  ;;  %v11451_v26 = vpack.c.bf16 %v4961_v21, %v4961_v21 }
 0x519   : > { %v8595_v13 = vcombine.high %v5216_v8, %v5220_v7  ;;  %v8594_v20 = vcombine.low %v5216_v8, %v5220_v7  ;;  %v5017_v8 = vld [vmem:[%s10519_s29 + $0x190] sm:$0xff] }
 0x51a   : > { %v5021_v7 = vld [vmem:[%s10519_s29 + $0x1b0] sm:$0xff] }
 0x51b   : > { %6561 = vmatpush1.bf16.msra.mxu1 %v8536_v1  ;;  %6643 = vmatpush1.bf16.msra.mxu0 %v8538_v16  ;;  %v4973_v1 = vld [vmem:[%s10519_s29 + $0x30] sm:$0xff]  ;;  %v4970_v16 = vld [vmem:[%s10519_s29 + $0x18] sm:$0xff] }
 0x51c   : > { %6562 = vmatprep.subr.bf16.mxu1 %v8545_v17  ;;  %6644 = vmatprep.subr.bf16.mxu0 %v8547_v18  ;;  %v4974_v17 = vld [vmem:[%s10519_s29 + $0x38] sm:$0xff]  ;;  %v8592_v18 = vcombine.low %v5215_v52, %v5219_v5  ;;  %v8349_v56 = vcombine.high %v4969_v15, %v4973_v1 }
 0x51d   : > { %v8351_v28 = vcombine.high %v4970_v16, %v4974_v17  ;;  %v8350_v27 = vcombine.low %v4970_v16, %v4974_v17  ;;  %v5029_v16 = vld [vmem:[%s10519_s29 + $0x1f0] sm:$0xff]  ;;  %v5026_v17 = vld [vmem:[%s10519_s29 + $0x1d8] sm:$0xff] }
 0x51f   : > { %6563 = vmatpush1.bf16.msra.mxu1 %v8544_v23  ;;  %6645 = vmatpush1.bf16.msra.mxu0 %v8546_v24  ;;  %v4981_v23 = vld [vmem:[%s10519_s29 + $0x70] sm:$0xff]  ;;  %v4978_v24 = vld [vmem:[%s10519_s29 + $0x58] sm:$0xff] }
 0x520   : > { %6564 = vmatprep.subr.bf16.mxu1 %v8553_v19  ;;  %6646 = vmatprep.subr.bf16.mxu0 %v8555_v25  ;;  %v4982_v19 = vld [vmem:[%s10519_s29 + $0x78] sm:$0xff]  ;;  %v8348_v25 = vcombine.low %v4969_v15, %v4973_v1  ;;  %v8357_v29 = vcombine.high %v4977_v22, %v4981_v23  ;;  %v8356_v34 = vcombine.low %v4977_v22, %v4981_v23  ;;  %v5025_v1 = vld [vmem:[%s10519_s29 + $0x1d0] sm:$0xff] }
 0x521   : > { %v8359_v30 = vcombine.high %v4978_v24, %v4982_v19  ;;  %v8358_v46 = vcombine.low %v4978_v24, %v4982_v19  ;;  %v5033_v22 = vld [vmem:[%s10519_s29 + $0x210] sm:$0xff]  ;;  %v5034_v24 = vld [vmem:[%s10519_s29 + $0x218] sm:$0xff] }
 0x522   : > { %v5037_v23 = vld [vmem:[%s10519_s29 + $0x230] sm:$0xff]  ;;  %v5038_v19 = vld [vmem:[%s10519_s29 + $0x238] sm:$0xff] }
 0x523   : > { %6565 = vmatpush1.bf16.msra.mxu1 %v8552_v53  ;;  %6647 = vmatpush1.bf16.msra.mxu0 %v8554_v9  ;;  %v4985_v53 = vld [vmem:[%s10519_s29 + $0x90] sm:$0xff] }
 0x524   : > { %6566 = vmatprep.subr.bf16.mxu1 %v8561_v31  ;;  %6648 = vmatprep.subr.bf16.mxu0 %v8563_v33  ;;  %v4989_v9 = vld [vmem:[%s10519_s29 + $0xb0] sm:$0xff]  ;;  %v4986_v31 = vld [vmem:[%s10519_s29 + $0x98] sm:$0xff] }
 0x525   : > { %v4990_v33 = vld [vmem:[%s10519_s29 + $0xb8] sm:$0xff]  ;;  %v8365_v54 = vcombine.high %v4985_v53, %v4989_v9  ;;  %v8364_v47 = vcombine.low %v4985_v53, %v4989_v9  ;;  %v5041_v53 = vld [vmem:[%s10519_s29 + $0x250] sm:$0xff] }
 0x526   : > { %v8367_v35 = vcombine.high %v4986_v31, %v4990_v33  ;;  %v8366_v48 = vcombine.low %v4986_v31, %v4990_v33  ;;  %v5045_v9 = vld [vmem:[%s10519_s29 + $0x270] sm:$0xff]  ;;  %v5042_v31 = vld [vmem:[%s10519_s29 + $0x258] sm:$0xff] }
 0x527   : > { %6567 = vmatpush1.bf16.msra.mxu1 %v8560_v49  ;;  %6649 = vmatpush1.bf16.msra.mxu0 %v8562_v36  ;;  %v4993_v49 = vld [vmem:[%s10519_s29 + $0xd0] sm:$0xff]  ;;  %v5046_v33 = vld [vmem:[%s10519_s29 + $0x278] sm:$0xff] }
 0x528   : > { %6568 = vmatprep.subr.bf16.mxu1 %v8569_v37  ;;  %6650 = vmatprep.subr.bf16.mxu0 %v8571_v38  ;;  %v4997_v36 = vld [vmem:[%s10519_s29 + $0xf0] sm:$0xff]  ;;  %v4994_v37 = vld [vmem:[%s10519_s29 + $0xd8] sm:$0xff] }
 0x529   : > { %v4998_v38 = vld [vmem:[%s10519_s29 + $0xf8] sm:$0xff] }
 0x52a   : > { %v8375_v50 = vcombine.high %v4994_v37, %v4998_v38  ;;  %v8374_v60 = vcombine.low %v4994_v37, %v4998_v38  ;;  %v5050_v37 = vld [vmem:[%s10519_s29 + $0x298] sm:$0xff] }
 0x52b   : > { %6569 = vmatpush1.bf16.msra.mxu1 %v8568_v55  ;;  %6651 = vmatpush1.bf16.msra.mxu0 %v8570_v57  ;;  %v5005_v55 = vld [vmem:[%s10519_s29 + $0x130] sm:$0xff]  ;;  %v5002_v57 = vld [vmem:[%s10519_s29 + $0x118] sm:$0xff] }
 0x52c   : > { %6570 = vmatprep.subr.bf16.mxu1 %v8577_v42  ;;  %6652 = vmatprep.subr.bf16.mxu0 %v8579_v59  ;;  %v5006_v42 = vld [vmem:[%s10519_s29 + $0x138] sm:$0xff]  ;;  %v8372_v59 = vcombine.low %v4993_v49, %v4997_v36  ;;  %v8381_v61 = vcombine.high %v5001_v51, %v5005_v55 }
 0x52d   : > { %v8383_v32 = vcombine.high %v5002_v57, %v5006_v42  ;;  %v5054_v38 = vld [vmem:[%s10519_s29 + $0x2b8] sm:$0xff] }
 0x52f   : > { %6571 = vmatpush1.bf16.msra.mxu1 %v8576_v63  ;;  %6653 = vmatpush1.bf16.msra.mxu0 %v8578_v0  ;;  %v5013_v63 = vld [vmem:[%s10519_s29 + $0x170] sm:$0xff]  ;;  %v5010_v0 = vld [vmem:[%s10519_s29 + $0x158] sm:$0xff] }
 0x530   : > { %6572 = vmatprep.subr.bf16.mxu1 %v8585_v3  ;;  %6654 = vmatprep.subr.bf16.mxu0 %v8587_v4  ;;  %v8380_v3 = vcombine.low %v5001_v51, %v5005_v55  ;;  %v8382_v4 = vcombine.low %v5002_v57, %v5006_v42  ;;  %v8389_v52 = vcombine.high %v5009_v62, %v5013_v63  ;;  %v5057_v51 = vld [vmem:[%s10519_s29 + $0x2d0] sm:$0xff]  ;;  %v5058_v57 = vld [vmem:[%s10519_s29 + $0x2d8] sm:$0xff] }
 0x531   : > { %v8391_v5 = vcombine.high %v5010_v0, %v5014_v2  ;;  %v8388_v12 = vcombine.low %v5009_v62, %v5013_v63  ;;  %v5061_v55 = vld [vmem:[%s10519_s29 + $0x2f0] sm:$0xff]  ;;  %v5062_v42 = vld [vmem:[%s10519_s29 + $0x2f8] sm:$0xff] }
 0x532   : > { %v5065_v62 = vld [vmem:[%s10519_s29 + $0x310] sm:$0xff] }
 0x533   : > { %6573 = vmatpush1.bf16.msra.mxu1 %v8584_v10  ;;  %6655 = vmatpush1.bf16.msra.mxu0 %v8586_v11  ;;  %v5018_v10 = vld [vmem:[%s10519_s29 + $0x198] sm:$0xff]  ;;  %v5069_v63 = vld [vmem:[%s10519_s29 + $0x330] sm:$0xff] }
 0x534   : > { %6574 = vmatprep.subr.bf16.mxu1 %v8593_v41  ;;  %6656 = vmatprep.subr.bf16.mxu0 %v8595_v13  ;;  %v5022_v11 = vld [vmem:[%s10519_s29 + $0x1b8] sm:$0xff]  ;;  %v8390_v41 = vcombine.low %v5010_v0, %v5014_v2  ;;  %v8397_v13 = vcombine.high %v5017_v8, %v5021_v7 }
 0x535   : > { %v8399_v15 = vcombine.high %v5018_v10, %v5022_v11  ;;  %v8398_v21 = vcombine.low %v5018_v10, %v5022_v11  ;;  %v5066_v0 = vld [vmem:[%s10519_s29 + $0x318] sm:$0xff] }
 0x536   : > { %v5070_v2 = vld [vmem:[%s10519_s29 + $0x338] sm:$0xff] }
 0x537   : > { %6575 = vmatpush1.bf16.msra.mxu1 %v8592_v18  ;;  %6657 = vmatpush1.bf16.msra.mxu0 %v8594_v20  ;;  %v5030_v18 = vld [vmem:[%s10519_s29 + $0x1f8] sm:$0xff]  ;;  %v8396_v20 = vcombine.low %v5017_v8, %v5021_v7  ;;  %v5073_v8 = vld [vmem:[%s10519_s29 + $0x350] sm:$0xff] }
 0x538   : > { %6667 = vmatprep.subr.bf16.mxu1 %v8349_v56  ;;  %6749 = vmatprep.subr.bf16.mxu0 %v8351_v28  ;;  %v8405_v56 = vcombine.high %v5025_v1, %v5029_v16  ;;  %v8407_v28 = vcombine.high %v5026_v17, %v5030_v18  ;;  %v5077_v7 = vld [vmem:[%s10519_s29 + $0x370] sm:$0xff]  ;;  %v5074_v10 = vld [vmem:[%s10519_s29 + $0x358] sm:$0xff] }
 0x539   : > { %v5078_v11 = vld [vmem:[%s10519_s29 + $0x378] sm:$0xff] }
 0x53a   : > { %6577 = vmatmul.mubr.bf16.vlgmr.msra.gmra.mrb[4].mxu1 %v11451_v26  ;;  %6659 = vmatmul.mubr.bf16.vlgmr.msra.gmra.mrb[36].mxu0 %v11451_v26 }
 0x53b   : > { %6668 = vmatpush1.bf16.msra.mxu1 %v8348_v25  ;;  %6699 = vmatprep.mubr.bf16.mxu1 %v11370_v45  ;;  %v8404_v25 = vcombine.low %v5025_v1, %v5029_v16  ;;  %v5081_v1 = vld [vmem:[%s10519_s29 + $0x390] sm:$0xff] }
 0x53c   : > { %6750 = vmatpush1.bf16.msra.mxu0 %v8350_v27  ;;  %6781 = vmatprep.mubr.bf16.mxu0 %v11370_v45  ;;  %v8373_v45 = vcombine.high %v4993_v49, %v4997_v36  ;;  %v8406_v27 = vcombine.low %v5026_v17, %v5030_v18  ;;  %v5049_v49 = vld [vmem:[%s10519_s29 + $0x290] sm:$0xff]  ;;  %v5082_v17 = vld [vmem:[%s10519_s29 + $0x398] sm:$0xff] }
 0x53d   : > { %6669 = vmatprep.subr.bf16.mxu1 %v8357_v29  ;;  %6751 = vmatprep.subr.bf16.mxu0 %v8359_v30  ;;  %v8413_v29 = vcombine.high %v5033_v22, %v5037_v23  ;;  %v8415_v30 = vcombine.high %v5034_v24, %v5038_v19  ;;  %v5053_v36 = vld [vmem:[%s10519_s29 + $0x2b0] sm:$0xff]  ;;  %v5086_v18 = vld [vmem:[%s10519_s29 + $0x3b8] sm:$0xff] }
 0x53e   : > { %v5085_v16 = vld [vmem:[%s10519_s29 + $0x3b0] sm:$0xff] }
 0x53f   : > { %6670 = vmatpush1.bf16.msra.mxu1 %v8356_v34  ;;  %v8412_v34 = vcombine.low %v5033_v22, %v5037_v23  ;;  %v5089_v22 = vld [vmem:[%s10519_s29 + $0x3d0] sm:$0xff] }
 0x540   : > { %6752 = vmatpush1.bf16.msra.mxu0 %v8358_v46  ;;  %6671 = vmatprep.subr.bf16.mxu1 %v8365_v54  ;;  %v8414_v46 = vcombine.low %v5034_v24, %v5038_v19  ;;  %v8421_v54 = vcombine.high %v5041_v53, %v5045_v9  ;;  %v5093_v23 = vld [vmem:[%s10519_s29 + $0x3f0] sm:$0xff]  ;;  %v5090_v24 = vld [vmem:[%s10519_s29 + $0x3d8] sm:$0xff] }
 0x541   : > { %6753 = vmatprep.subr.bf16.mxu0 %v8367_v35  ;;  %v8423_v35 = vcombine.high %v5042_v31, %v5046_v33  ;;  %v5094_v19 = vld [vmem:[%s10519_s29 + $0x3f8] sm:$0xff] }
 0x543   : > { %6672 = vmatpush1.bf16.msra.mxu1 %v8364_v47  ;;  %v8420_v47 = vcombine.low %v5041_v53, %v5045_v9  ;;  %v5097_v53 = vld [vmem:[%s10519_s29 + $0x410] sm:$0xff] }
 0x544   : > { %6754 = vmatpush1.bf16.msra.mxu0 %v8366_v48  ;;  %6673 = vmatprep.subr.bf16.mxu1 %v8373_v45  ;;  %v8422_v48 = vcombine.low %v5042_v31, %v5046_v33  ;;  %v8429_v45 = vcombine.high %v5049_v49, %v5053_v36  ;;  %v5101_v9 = vld [vmem:[%s10519_s29 + $0x430] sm:$0xff]  ;;  %v5098_v31 = vld [vmem:[%s10519_s29 + $0x418] sm:$0xff] }
 0x545   : > { %6755 = vmatprep.subr.bf16.mxu0 %v8375_v50  ;;  %v8431_v50 = vcombine.high %v5050_v37, %v5054_v38  ;;  %v5102_v33 = vld [vmem:[%s10519_s29 + $0x438] sm:$0xff] }
 0x547   : > { %6674 = vmatpush1.bf16.msra.mxu1 %v8372_v59  ;;  %v8428_v59 = vcombine.low %v5049_v49, %v5053_v36  ;;  %v5105_v49 = vld [vmem:[%s10519_s29 + $0x450] sm:$0xff] }
 0x548   : > { %6756 = vmatpush1.bf16.msra.mxu0 %v8374_v60  ;;  %6675 = vmatprep.subr.bf16.mxu1 %v8381_v61  ;;  %v8430_v60 = vcombine.low %v5050_v37, %v5054_v38  ;;  %v8437_v61 = vcombine.high %v5057_v51, %v5061_v55  ;;  %v5109_v36 = vld [vmem:[%s10519_s29 + $0x470] sm:$0xff]  ;;  %v8476_v37 = vcombine.low %v5097_v53, %v5101_v9  ;;  %v5106_v38 = vld [vmem:[%s10519_s29 + $0x458] sm:$0xff] }
 0x549   : > { %6757 = vmatprep.subr.bf16.mxu0 %v8383_v32  ;;  %v8439_v32 = vcombine.high %v5058_v57, %v5062_v42 }
 0x54b   : > { %6676 = vmatpush1.bf16.msra.mxu1 %v8380_v3  ;;  %v8436_v3 = vcombine.low %v5057_v51, %v5061_v55  ;;  %v5117_v51 = vld [vmem:[%s10519_s29 + $0x4b0] sm:$0xff] }
 0x54c   : > { %6758 = vmatpush1.bf16.msra.mxu0 %v8382_v4  ;;  %6677 = vmatprep.subr.bf16.mxu1 %v8389_v52  ;;  %v8438_v4 = vcombine.low %v5058_v57, %v5062_v42  ;;  %v8445_v52 = vcombine.high %v5065_v62, %v5069_v63  ;;  %v5114_v57 = vld [vmem:[%s10519_s29 + $0x498] sm:$0xff] }
 0x54d   : > { %6759 = vmatprep.subr.bf16.mxu0 %v8391_v5  ;;  %v8447_v5 = vcombine.high %v5066_v0, %v5070_v2  ;;  %v5118_v42 = vld [vmem:[%s10519_s29 + $0x4b8] sm:$0xff] }
 0x54f   : > { %6678 = vmatpush1.bf16.msra.mxu1 %v8388_v12  ;;  %v8444_v12 = vcombine.low %v5065_v62, %v5069_v63  ;;  %v5121_v62 = vld [vmem:[%s10519_s29 + $0x4d0] sm:$0xff] }
 0x550   : > { %6760 = vmatpush1.bf16.msra.mxu0 %v8390_v41  ;;  %6679 = vmatprep.subr.bf16.mxu1 %v8397_v13  ;;  %v8446_v41 = vcombine.low %v5066_v0, %v5070_v2  ;;  %v8453_v13 = vcombine.high %v5073_v8, %v5077_v7  ;;  %v5125_v63 = vld [vmem:[%s10519_s29 + $0x4f0] sm:$0xff]  ;;  %v5122_v0 = vld [vmem:[%s10519_s29 + $0x4d8] sm:$0xff] }
 0x551   : > { %6761 = vmatprep.subr.bf16.mxu0 %v8399_v15  ;;  %v8455_v15 = vcombine.high %v5074_v10, %v5078_v11 }
 0x553   : > { %6680 = vmatpush1.bf16.msra.mxu1 %v8396_v20  ;;  %v8452_v20 = vcombine.low %v5073_v8, %v5077_v7  ;;  %v5130_v8 = vld [vmem:[%s10519_s29 + $0x518] sm:$0xff] }
 0x554   : > { %6762 = vmatpush1.bf16.msra.mxu0 %v8398_v21  ;;  %6681 = vmatprep.subr.bf16.mxu1 %v8405_v56  ;;  %v8454_v21 = vcombine.low %v5074_v10, %v5078_v11  ;;  %v8461_v56 = vcombine.high %v5081_v1, %v5085_v16  ;;  %v5134_v7 = vld [vmem:[%s10519_s29 + $0x538] sm:$0xff]  ;;  %v8500_v10 = vcombine.low %v5121_v62, %v5125_v63 }
 0x555   : > { %6763 = vmatprep.subr.bf16.mxu0 %v8407_v28  ;;  %v8463_v28 = vcombine.high %v5082_v17, %v5086_v18 }
 0x557   : > { %6682 = vmatpush1.bf16.msra.mxu1 %v8404_v25  ;;  %v8460_v25 = vcombine.low %v5081_v1, %v5085_v16  ;;  %v5138_v1 = vld [vmem:[%s10519_s29 + $0x558] sm:$0xff] }
 0x558   : > { %6764 = vmatpush1.bf16.msra.mxu0 %v8406_v27  ;;  %6683 = vmatprep.subr.bf16.mxu1 %v8413_v29  ;;  %v8462_v27 = vcombine.low %v5082_v17, %v5086_v18  ;;  %v8469_v29 = vcombine.high %v5089_v22, %v5093_v23  ;;  %v5142_v16 = vld [vmem:[%s10519_s29 + $0x578] sm:$0xff]  ;;  %v8510_v18 = vcombine.low %v5130_v8, %v5134_v7 }
 0x559   : > { %6765 = vmatprep.subr.bf16.mxu0 %v8415_v30  ;;  %v8471_v30 = vcombine.high %v5090_v24, %v5094_v19 }
 0x55b   : > { %6684 = vmatpush1.bf16.msra.mxu1 %v8412_v34  ;;  %v8468_v34 = vcombine.low %v5089_v22, %v5093_v23  ;;  %v5146_v22 = vld [vmem:[%s10519_s29 + $0x598] sm:$0xff] }
 0x55c   : > { %6766 = vmatpush1.bf16.msra.mxu0 %v8414_v46  ;;  %6685 = vmatprep.subr.bf16.mxu1 %v8421_v54  ;;  %v8470_v46 = vcombine.low %v5090_v24, %v5094_v19  ;;  %v8477_v54 = vcombine.high %v5097_v53, %v5101_v9  ;;  %v5150_v23 = vld [vmem:[%s10519_s29 + $0x5b8] sm:$0xff]  ;;  %v8518_v19 = vcombine.low %v5138_v1, %v5142_v16 }
 0x55d   : > { %6767 = vmatprep.subr.bf16.mxu0 %v8423_v35  ;;  %v8479_v35 = vcombine.high %v5098_v31, %v5102_v33  ;;  %v5154_v53 = vld [vmem:[%s10519_s29 + $0x5d8] sm:$0xff] }
 0x55e   : > { %v5158_v9 = vld [vmem:[%s10519_s29 + $0x5f8] sm:$0xff] }
 0x55f   : > { %6686 = vmatpush1.bf16.msra.mxu1 %v8420_v47  ;;  %v5110_v47 = vld [vmem:[%s10519_s29 + $0x478] sm:$0xff] }
 0x560   : > { %6768 = vmatpush1.bf16.msra.mxu0 %v8422_v48  ;;  %6687 = vmatprep.subr.bf16.mxu1 %v8429_v45  ;;  %v8478_v48 = vcombine.low %v5098_v31, %v5102_v33  ;;  %v8485_v45 = vcombine.high %v5105_v49, %v5109_v36  ;;  %v8487_v55 = vcombine.high %v5106_v38, %v5110_v47 }
 0x561   : > { %6769 = vmatprep.subr.bf16.mxu0 %v8431_v50  ;;  %v5113_v50 = vld [vmem:[%s10519_s29 + $0x490] sm:$0xff]  ;;  %v8526_v33 = vcombine.low %v5146_v22, %v5150_v23 }
 0x562   : > { %v8492_v2 = vcombine.low %v5113_v50, %v5117_v51 }
 0x563   : > { %6688 = vmatpush1.bf16.msra.mxu1 %v8428_v59  ;;  %v8484_v59 = vcombine.low %v5105_v49, %v5109_v36  ;;  %v5162_v49 = vld [vmem:[%s10519_s29 + $0x618] sm:$0xff] }
 0x564   : > { %6770 = vmatpush1.bf16.msra.mxu0 %v8430_v60  ;;  %6689 = vmatprep.subr.bf16.mxu1 %v8437_v61  ;;  %v8486_v60 = vcombine.low %v5106_v38, %v5110_v47  ;;  %v8493_v61 = vcombine.high %v5113_v50, %v5117_v51  ;;  %v5166_v36 = vld [vmem:[%s10519_s29 + $0x638] sm:$0xff]  ;;  %v8534_v38 = vcombine.low %v5154_v53, %v5158_v9  ;;  %v5173_v50 = vld [vmem:[%s10519_s29 + $0x670] sm:$0xff] }
 0x565   : > { %6771 = vmatprep.subr.bf16.mxu0 %v8439_v32  ;;  %v8495_v32 = vcombine.high %v5114_v57, %v5118_v42  ;;  %v5170_v51 = vld [vmem:[%s10519_s29 + $0x658] sm:$0xff] }
 0x567   : > { %6690 = vmatpush1.bf16.msra.mxu1 %v8436_v3  ;;  %v8494_v3 = vcombine.low %v5114_v57, %v5118_v42  ;;  %v8542_v42 = vcombine.low %v5162_v49, %v5166_v36 }
 0x568   : > { %6772 = vmatpush1.bf16.msra.mxu0 %v8438_v4  ;;  %6691 = vmatprep.subr.bf16.mxu1 %v8445_v52  ;;  %v8501_v4 = vcombine.high %v5121_v62, %v5125_v63  ;;  %v5129_v52 = vld [vmem:[%s10519_s29 + $0x510] sm:$0xff]  ;;  %v5178_v62 = vld [vmem:[%s10519_s29 + $0x698] sm:$0xff] }
 0x569   : > { %6773 = vmatprep.subr.bf16.mxu0 %v8447_v5  ;;  %v5133_v5 = vld [vmem:[%s10519_s29 + $0x530] sm:$0xff]  ;;  %v5182_v63 = vld [vmem:[%s10519_s29 + $0x6b8] sm:$0xff] }
 0x56a   : > { %v8508_v17 = vcombine.low %v5129_v52, %v5133_v5 }
 0x56b   : > { %6692 = vmatpush1.bf16.msra.mxu1 %v8444_v12  ;;  %v8509_v12 = vcombine.high %v5129_v52, %v5133_v5  ;;  %v5186_v52 = vld [vmem:[%s10519_s29 + $0x6d8] sm:$0xff] }
 0x56c   : > { %6774 = vmatpush1.bf16.msra.mxu0 %v8446_v41  ;;  %6693 = vmatprep.subr.bf16.mxu1 %v8453_v13  ;;  %v8511_v41 = vcombine.high %v5130_v8, %v5134_v7  ;;  %v5137_v13 = vld [vmem:[%s10519_s29 + $0x550] sm:$0xff]  ;;  %v5190_v5 = vld [vmem:[%s10519_s29 + $0x6f8] sm:$0xff]  ;;  %v8558_v7 = vcombine.low %v5178_v62, %v5182_v63 }
 0x56d   : > { %6775 = vmatprep.subr.bf16.mxu0 %v8455_v15  ;;  %v5141_v15 = vld [vmem:[%s10519_s29 + $0x570] sm:$0xff] }
 0x56e   : > { %v8516_v24 = vcombine.low %v5137_v13, %v5141_v15 }
 0x56f   : > { %6694 = vmatpush1.bf16.msra.mxu1 %v8452_v20  ;;  %v8517_v20 = vcombine.high %v5137_v13, %v5141_v15  ;;  %v5194_v13 = vld [vmem:[%s10519_s29 + $0x718] sm:$0xff] }
 0x570   : > { %6776 = vmatpush1.bf16.msra.mxu0 %v8454_v21  ;;  %6695 = vmatprep.subr.bf16.mxu1 %v8461_v56  ;;  %v8519_v21 = vcombine.high %v5138_v1, %v5142_v16  ;;  %v5145_v56 = vld [vmem:[%s10519_s29 + $0x590] sm:$0xff]  ;;  %v5198_v15 = vld [vmem:[%s10519_s29 + $0x738] sm:$0xff]  ;;  %v8566_v16 = vcombine.low %v5186_v52, %v5190_v5 }
 0x571   : > { %6777 = vmatprep.subr.bf16.mxu0 %v8463_v28  ;;  %v5149_v28 = vld [vmem:[%s10519_s29 + $0x5b0] sm:$0xff] }
 0x572   : > { %v8524_v31 = vcombine.low %v5145_v56, %v5149_v28 }
 0x573   : > { %6696 = vmatpush1.bf16.msra.mxu1 %v8460_v25  ;;  %v8525_v25 = vcombine.high %v5145_v56, %v5149_v28  ;;  %v5202_v56 = vld [vmem:[%s10519_s29 + $0x758] sm:$0xff] }
 0x574   : > { %6778 = vmatpush1.bf16.msra.mxu0 %v8462_v27  ;;  %6697 = vmatprep.subr.bf16.mxu1 %v8469_v29  ;;  %v8527_v27 = vcombine.high %v5146_v22, %v5150_v23  ;;  %v5153_v29 = vld [vmem:[%s10519_s29 + $0x5d0] sm:$0xff]  ;;  %v5206_v28 = vld [vmem:[%s10519_s29 + $0x778] sm:$0xff]  ;;  %v8574_v23 = vcombine.low %v5194_v13, %v5198_v15 }
 0x575   : > { %6779 = vmatprep.subr.bf16.mxu0 %v8471_v30  ;;  %v5157_v30 = vld [vmem:[%s10519_s29 + $0x5f0] sm:$0xff] }
 0x577   : > { %6698 = vmatpush1.bf16.msra.mxu1 %v8468_v34  ;;  %v8533_v34 = vcombine.high %v5153_v29, %v5157_v30 }
 0x578   : > { %6780 = vmatpush1.bf16.msra.mxu0 %v8470_v46  ;;  %6708 = vmatprep.subr.bf16.mxu1 %v8477_v54  ;;  %v8535_v46 = vcombine.high %v5154_v53, %v5158_v9  ;;  %v5161_v54 = vld [vmem:[%s10519_s29 + $0x610] sm:$0xff]  ;;  %v8582_v9 = vcombine.low %v5202_v56, %v5206_v28 }
 0x579   : > { %6790 = vmatprep.subr.bf16.mxu0 %v8479_v35  ;;  %v5165_v35 = vld [vmem:[%s10519_s29 + $0x630] sm:$0xff] }
 0x57a   : > { %6700 = vmatmul.mubr.bf16.vlgmr.msra.gmra.mrb[8].mxu1 %v11372_v6  ;;  %v8541_v47 = vcombine.high %v5161_v54, %v5165_v35  ;;  %v8540_v57 = vcombine.low %v5161_v54, %v5165_v35  ;;  %v5218_v54 = vld [vmem:[%s10519_s29 + $0x7d8] sm:$0xff] }
 0x57b   : > { %6782 = vmatmul.mubr.bf16.vlgmr.msra.gmra.mrb[40].mxu0 %v11372_v6  ;;  %6709 = vmatpush1.bf16.msra.mxu1 %v8476_v37  ;;  %v5126_v6 = vld [vmem:[%s10519_s29 + $0x4f8] sm:$0xff]  ;;  %v8532_v37 = vcombine.low %v5153_v29, %v5157_v30 }
 0x57c   : > { %6740 = vmatprep.mubr.bf16.mxu1 %v11380_v14  ;;  %6791 = vmatpush1.bf16.msra.mxu0 %v8478_v48  ;;  %v8502_v11 = vcombine.low %v5122_v0, %v5126_v6  ;;  %v8543_v48 = vcombine.high %v5162_v49, %v5166_v36  ;;  %v5210_v29 = vld [vmem:[%s10519_s29 + $0x798] sm:$0xff] }
 0x57d   : > { %6822 = vmatprep.mubr.bf16.mxu0 %v11380_v14  ;;  %6710 = vmatprep.subr.bf16.mxu1 %v8485_v45  ;;  %v8503_v14 = vcombine.high %v5122_v0, %v5126_v6  ;;  %v5169_v45 = vld [vmem:[%s10519_s29 + $0x650] sm:$0xff]  ;;  %v5214_v30 = vld [vmem:[%s10519_s29 + $0x7b8] sm:$0xff] }
 0x57e   : > { %6792 = vmatprep.subr.bf16.mxu0 %v8487_v55  ;;  %v5174_v55 = vld [vmem:[%s10519_s29 + $0x678] sm:$0xff]  ;;  %v8548_v0 = vcombine.low %v5169_v45, %v5173_v50  ;;  %v8590_v36 = vcombine.low %v5210_v29, %v5214_v30 }
 0x57f   : > { %6711 = vmatpush1.bf16.msra.mxu1 %v8484_v59  ;;  %v8549_v59 = vcombine.high %v5169_v45, %v5173_v50  ;;  %v8550_v6 = vcombine.low %v5170_v51, %v5174_v55  ;;  %v5222_v35 = vld [vmem:[%s10519_s29 + $0x7f8] sm:$0xff] }
 0x580   : > { %6793 = vmatpush1.bf16.msra.mxu0 %v8486_v60  ;;  %6712 = vmatprep.subr.bf16.mxu1 %v8493_v61  ;;  %v8551_v60 = vcombine.high %v5170_v51, %v5174_v55  ;;  %v5177_v61 = vld [vmem:[%s10519_s29 + $0x690] sm:$0xff] }
 0x581   : > { %6794 = vmatprep.subr.bf16.mxu0 %v8495_v32  ;;  %v5181_v32 = vld [vmem:[%s10519_s29 + $0x6b0] sm:$0xff] }
 0x582   : > { %v8556_v8 = vcombine.low %v5177_v61, %v5181_v32 }
 0x583   : > { %6713 = vmatpush1.bf16.msra.mxu1 %v8492_v2  ;;  %v8557_v2 = vcombine.high %v5177_v61, %v5181_v32 }
 0x584   : > { %6795 = vmatpush1.bf16.msra.mxu0 %v8494_v3  ;;  %6714 = vmatprep.subr.bf16.mxu1 %v8501_v4  ;;  %v8559_v3 = vcombine.high %v5178_v62, %v5182_v63  ;;  %v5185_v4 = vld [vmem:[%s10519_s29 + $0x6d0] sm:$0xff] }
 0x585   : > { %6796 = vmatprep.subr.bf16.mxu0 %v8503_v14  ;;  %v5189_v14 = vld [vmem:[%s10519_s29 + $0x6f0] sm:$0xff] }
 0x586   : > { %v8564_v1 = vcombine.low %v5185_v4, %v5189_v14 }
 0x587   : > { %6715 = vmatpush1.bf16.msra.mxu1 %v8500_v10  ;;  %v8565_v10 = vcombine.high %v5185_v4, %v5189_v14 }
 0x588   : > { %6797 = vmatpush1.bf16.msra.mxu0 %v8502_v11  ;;  %6716 = vmatprep.subr.bf16.mxu1 %v8509_v12  ;;  %v8567_v11 = vcombine.high %v5186_v52, %v5190_v5  ;;  %v5193_v12 = vld [vmem:[%s10519_s29 + $0x710] sm:$0xff] }
 0x589   : > { %6798 = vmatprep.subr.bf16.mxu0 %v8511_v41  ;;  %v5197_v41 = vld [vmem:[%s10519_s29 + $0x730] sm:$0xff] }
 0x58a   : > { %v8572_v22 = vcombine.low %v5193_v12, %v5197_v41 }
 0x58b   : > { %6717 = vmatpush1.bf16.msra.mxu1 %v8508_v17  ;;  %v8573_v17 = vcombine.high %v5193_v12, %v5197_v41 }
 0x58c   : > { %6799 = vmatpush1.bf16.msra.mxu0 %v8510_v18  ;;  %6718 = vmatprep.subr.bf16.mxu1 %v8517_v20  ;;  %v8575_v18 = vcombine.high %v5194_v13, %v5198_v15  ;;  %v5201_v20 = vld [vmem:[%s10519_s29 + $0x750] sm:$0xff] }
 0x58d   : > { %6800 = vmatprep.subr.bf16.mxu0 %v8519_v21  ;;  %v5205_v21 = vld [vmem:[%s10519_s29 + $0x770] sm:$0xff] }
 0x58e   : > { %v8580_v53 = vcombine.low %v5201_v20, %v5205_v21 }
 0x58f   : > { %6719 = vmatpush1.bf16.msra.mxu1 %v8516_v24  ;;  %v8581_v24 = vcombine.high %v5201_v20, %v5205_v21 }
 0x590   : > { %6801 = vmatpush1.bf16.msra.mxu0 %v8518_v19  ;;  %6720 = vmatprep.subr.bf16.mxu1 %v8525_v25  ;;  %v8583_v19 = vcombine.high %v5202_v56, %v5206_v28  ;;  %v5209_v25 = vld [vmem:[%s10519_s29 + $0x790] sm:$0xff] }
 0x591   : > { %6802 = vmatprep.subr.bf16.mxu0 %v8527_v27  ;;  %v5213_v27 = vld [vmem:[%s10519_s29 + $0x7b0] sm:$0xff] }
 0x592   : > { %v8588_v49 = vcombine.low %v5209_v25, %v5213_v27 }
 0x593   : > { %6721 = vmatpush1.bf16.msra.mxu1 %v8524_v31  ;;  %v8589_v31 = vcombine.high %v5209_v25, %v5213_v27 }
 0x594   : > { %6803 = vmatpush1.bf16.msra.mxu0 %v8526_v33  ;;  %6722 = vmatprep.subr.bf16.mxu1 %v8533_v34  ;;  %v8591_v33 = vcombine.high %v5210_v29, %v5214_v30  ;;  %v5217_v34 = vld [vmem:[%s10519_s29 + $0x7d0] sm:$0xff] }
 0x595   : > { %6804 = vmatprep.subr.bf16.mxu0 %v8535_v46  ;;  %v5221_v46 = vld [vmem:[%s10519_s29 + $0x7f0] sm:$0xff] }
 0x597   : > { %6723 = vmatpush1.bf16.msra.mxu1 %v8532_v37  ;;  %v8597_v37 = vcombine.high %v5217_v34, %v5221_v46 }
 0x598   : > { %6805 = vmatpush1.bf16.msra.mxu0 %v8534_v38  ;;  %6724 = vmatprep.subr.bf16.mxu1 %v8541_v47  ;;  %v8599_v38 = vcombine.high %v5218_v54, %v5222_v35  ;;  %v8596_v47 = vcombine.low %v5217_v34, %v5221_v46 }
 0x599   : > { %6806 = vmatprep.subr.bf16.mxu0 %v8543_v48  ;;  %v8598_v48 = vcombine.low %v5218_v54, %v5222_v35 }
 0x59b   : > { %6725 = vmatpush1.bf16.msra.mxu1 %v8540_v57 }
 0x59c   : > { %6807 = vmatpush1.bf16.msra.mxu0 %v8542_v42  ;;  %6726 = vmatprep.subr.bf16.mxu1 %v8549_v59 }
 0x59d   : > { %6808 = vmatprep.subr.bf16.mxu0 %v8551_v60 }
 0x59f   : > { %6727 = vmatpush1.bf16.msra.mxu1 %v8548_v0 }
 0x5a0   : > { %6809 = vmatpush1.bf16.msra.mxu0 %v8550_v6  ;;  %6728 = vmatprep.subr.bf16.mxu1 %v8557_v2 }
 0x5a1   : > { %6810 = vmatprep.subr.bf16.mxu0 %v8559_v3 }
 0x5a3   : > { %6729 = vmatpush1.bf16.msra.mxu1 %v8556_v8 }
 0x5a4   : > { %6811 = vmatpush1.bf16.msra.mxu0 %v8558_v7  ;;  %6730 = vmatprep.subr.bf16.mxu1 %v8565_v10 }
 0x5a5   : > { %6812 = vmatprep.subr.bf16.mxu0 %v8567_v11 }
 0x5a7   : > { %6731 = vmatpush1.bf16.msra.mxu1 %v8564_v1 }
 0x5a8   : > { %6813 = vmatpush1.bf16.msra.mxu0 %v8566_v16  ;;  %6732 = vmatprep.subr.bf16.mxu1 %v8573_v17 }
 0x5a9   : > { %6814 = vmatprep.subr.bf16.mxu0 %v8575_v18 }
 0x5ab   : > { %6733 = vmatpush1.bf16.msra.mxu1 %v8572_v22 }
 0x5ac   : > { %6815 = vmatpush1.bf16.msra.mxu0 %v8574_v23  ;;  %6734 = vmatprep.subr.bf16.mxu1 %v8581_v24 }
 0x5ad   : > { %6816 = vmatprep.subr.bf16.mxu0 %v8583_v19 }
 0x5af   : > { %6735 = vmatpush1.bf16.msra.mxu1 %v8580_v53 }
 0x5b0   : > { %6817 = vmatpush1.bf16.msra.mxu0 %v8582_v9  ;;  %6736 = vmatprep.subr.bf16.mxu1 %v8589_v31 }
 0x5b1   : > { %6818 = vmatprep.subr.bf16.mxu0 %v8591_v33 }
 0x5b3   : > { %6737 = vmatpush1.bf16.msra.mxu1 %v8588_v49 }
 0x5b4   : > { %6819 = vmatpush1.bf16.msra.mxu0 %v8590_v36  ;;  %6738 = vmatprep.subr.bf16.mxu1 %v8597_v37 }
 0x5b5   : > { %6820 = vmatprep.subr.bf16.mxu0 %v8599_v38 }
 0x5b7   : > { %6739 = vmatpush1.bf16.msra.mxu1 %v8596_v47 }
 0x5b8   : > { %6821 = vmatpush1.bf16.msra.mxu0 %v8598_v48 }
 0x5ba   : > { %6741 = vmatmul.mubr.bf16.vlgmr.msra.gmra.mrb[8].mxu1 %v11451_v26 }
 0x5bb   : > { %6823 = vmatmul.mubr.bf16.vlgmr.msra.gmra.mrb[40].mxu0 %v11451_v26 }
 0x60d   : > { %v11583_v45 = vpop.f32.mrb[4].mxu1  ;;  %v11585_v50 = vpop.f32.mrb[36].mxu0 }
 0x60e   : > { %v11587_v51 = vpop.f32.mrb[5].mxu1  ;;  %v11589_v55 = vpop.f32.mrb[37].mxu0  ;;  %6834 = vst [vmem:[#allocation4] sm:$0xff] (!%p11917_p5), %v11583_v45  ;;  %6836 = vst [vmem:[#allocation4 + $0x10] sm:$0xff] (!%p11917_p5), %v11585_v50 }
 0x60f   : > { %v6582_v57 = vpop.f32.mrb[6].mxu1  ;;  %v6664_v42 = vpop.f32.mrb[38].mxu0  ;;  %6835 = vst [vmem:[#allocation4 + $0x8] sm:$0xff] (!%p11917_p5), %v11587_v51  ;;  %6837 = vst [vmem:[#allocation4 + $0x18] sm:$0xff] (!%p11917_p5), %v11589_v55 }
 0x610   : > { %v6583_v59 = vpop.f32.mrb[7].mxu1  ;;  %v6665_v60 = vpop.f32.mrb[39].mxu0 }
 0x68b   : > { %6833 = sbr.rel (%p11917_p5) target bundleno = 1682 (0x692), region = 92 }
 0x68d   : > { %v11591_v61 = vpop.f32.mrb[8].mxu1 }
 0x68e   : > { %v11593_v32 = vpop.f32.mrb[40].mxu0  ;;  %v11595_v62 = vpop.f32.mrb[9].mxu1  ;;  %6838 = vst [vmem:[#allocation4 + $0x20] sm:$0xff] (!%p11917_p5), %v11591_v61 }
 0x68f   : > { %v11597_v63 = vpop.f32.mrb[41].mxu0  ;;  %v6746_v26 = vpop.f32.mrb[10].mxu1  ;;  %6839 = vst [vmem:[#allocation4 + $0x28] sm:$0xff] (!%p11917_p5), %v11595_v62  ;;  %6840 = vst [vmem:[#allocation4 + $0x30] sm:$0xff] (!%p11917_p5), %v11593_v32 }
 0x690   : > { %v6828_v0 = vpop.f32.mrb[42].mxu0  ;;  %v6747_v6 = vpop.f32.mrb[11].mxu1  ;;  %6841 = vst [vmem:[#allocation4 + $0x38] sm:$0xff] (!%p11917_p5), %v11597_v63 }
 0x691   : > { %v6829_v2 = vpop.f32.mrb[43].mxu0 }
 0x692 PF: > { %p8601_p10 = scmp.ne.s32.totalorder %s10221_s13, 1 }
 0x693   : > { %v9786_v3 = vld [vmem:[%s11875_s7 + $0x40] sm:$0xff] (!%p8601_p10)   ;;  %v9790_v5 = vld [vmem:[%s11875_s7 + $0x48] sm:$0xff] (!%p8601_p10)   ;;  %v9794_v11 = vld [vmem:[%s11875_s7 + $0x50] sm:$0xff] (!%p8601_p10)   ;;  %vm7599_vm4 = vcmask (!%p8601_p10), 9216  }
 0x694   : > { %6845 = sbr.rel (%p8601_p10) target bundleno = 1969 (0x7b1), region = 96  ;;  %v9787_v4 = vld [vmem:[%s11875_s7 + $0xc0] sm:$0xff] (!%p8601_p10)   ;;  %8740 = vmatprep.subr.bf16.mxu0 (!%p8601_p10), %v9786_v3  ;;  %v9791_v8 = vld [vmem:[%s11875_s7 + $0xc8] sm:$0xff] (!%p8601_p10)   ;;  %v9795_v12 = vld [vmem:[%s11875_s7 + $0xd0] sm:$0xff] (!%p8601_p10)  }
 0x695   : > { %v9788_v14 = vld [vmem:[%s11875_s7] sm:$0xff] (!%p8601_p10)   ;;  %8762 = vmatprep.subr.bf16.mxu1 (!%p8601_p10), %v9787_v4  ;;  %v9792_v7 = vld [vmem:[%s11875_s7 + $0x8] sm:$0xff] (!%p8601_p10)   ;;  %v9796_v41 = vld [vmem:[%s11875_s7 + $0x10] sm:$0xff] (!%p8601_p10)  }
 0x696   : > { %v9789_v52 = vld [vmem:[%s11875_s7 + $0x80] sm:$0xff] (!%p8601_p10)   ;;  %8741 = vmatpush3.bf16.msra.mxu0 (!%p8601_p10), %v9788_v14  ;;  %v9793_v10 = vld [vmem:[%s11875_s7 + $0x88] sm:$0xff] (!%p8601_p10)   ;;  %v9797_v13 = vld [vmem:[%s11875_s7 + $0x90] sm:$0xff] (!%p8601_p10)  }
 0x697   : > { %8763 = vmatpush3.bf16.msra.mxu1 (!%p8601_p10), %v9789_v52  ;;  %8742 = vmatprep.subr.bf16.mxu0 (!%p8601_p10), %v9790_v5  ;;  %v9798_v15 = vld [vmem:[%s11875_s7 + $0x58] sm:$0xff] (!%p8601_p10)   ;;  %v9802_v18 = vld [vmem:[%s11875_s7 + $0x60] sm:$0xff] (!%p8601_p10)   ;;  %v9806_v28 = vld [vmem:[%s11875_s7 + $0x68] sm:$0xff] (!%p8601_p10)  }
 0x698   : > { %8764 = vmatprep.subr.bf16.mxu1 (!%p8601_p10), %v9791_v8  ;;  %v9799_v1 = vld [vmem:[%s11875_s7 + $0xd8] sm:$0xff] (!%p8601_p10)   ;;  %v9803_v20 = vld [vmem:[%s11875_s7 + $0xe0] sm:$0xff] (!%p8601_p10)   ;;  %v9807_v22 = vld [vmem:[%s11875_s7 + $0xe8] sm:$0xff] (!%p8601_p10)  }
 0x699   : > { %v9800_v16 = vld [vmem:[%s11875_s7 + $0x18] sm:$0xff] (!%p8601_p10)   ;;  %v9804_v21 = vld [vmem:[%s11875_s7 + $0x20] sm:$0xff] (!%p8601_p10)   ;;  %v9808_v23 = vld [vmem:[%s11875_s7 + $0x28] sm:$0xff] (!%p8601_p10)  }
 0x69a   : > { %8743 = vmatpush3.bf16.msra.mxu0 (!%p8601_p10), %v9792_v7  ;;  %v9801_v17 = vld [vmem:[%s11875_s7 + $0x98] sm:$0xff] (!%p8601_p10)   ;;  %v9805_v56 = vld [vmem:[%s11875_s7 + $0xa0] sm:$0xff] (!%p8601_p10)   ;;  %v9809_v24 = vld [vmem:[%s11875_s7 + $0xa8] sm:$0xff] (!%p8601_p10)  }
 0x69b   : > { %8765 = vmatpush3.bf16.msra.mxu1 %v9793_v10  ;;  %8744 = vmatprep.subr.bf16.mxu0 %v9794_v11  ;;  %v9810_v19 = vld [vmem:[%s11875_s7 + $0x70] sm:$0xff]   ;;  %v9814_v30 = vld [vmem:[%s11875_s7 + $0x78] sm:$0xff]   ;;  %v6847_v33 = vld [vmem:[#allocation4 + $0x8] sm:$0xff] }
 0x69c   : > { %8766 = vmatprep.subr.bf16.mxu1 %v9795_v12  ;;  %v9811_v25 = vld [vmem:[%s11875_s7 + $0xf0] sm:$0xff]   ;;  %v9815_v53 = vld [vmem:[%s11875_s7 + $0xf8] sm:$0xff]   ;;  %v6855_v54 = vadd.f32 %v6847_v33, %v11587_v51  ;;  %v6846_v37 = vld [vmem:[#allocation4] sm:$0xff] }
 0x69d   : > { %v9812_v27 = vld [vmem:[%s11875_s7 + $0x30] sm:$0xff]   ;;  %v9816_v9 = vld [vmem:[%s11875_s7 + $0x38] sm:$0xff]   ;;  %v6854_v47 = vadd.f32 %v6846_v37, %v11583_v45  ;;  %v9819_v45 = vld [vmem:[%s11875_s7 + $0x1c0] sm:$0xff]  }
 0x69e   : > { %8745 = vmatpush3.bf16.msra.mxu0 %v9796_v41  ;;  %v9813_v29 = vld [vmem:[%s11875_s7 + $0xb0] sm:$0xff]   ;;  %v9817_v31 = vld [vmem:[%s11875_s7 + $0xb8] sm:$0xff]   ;;  %v9822_v6 = vld [vmem:[%s11875_s7 + $0x148] sm:$0xff]  }
 0x69f   : > { %8767 = vmatpush3.bf16.msra.mxu1 %v9797_v13  ;;  %8746 = vmatprep.subr.bf16.mxu0 %v9798_v15  ;;  %v11706_v34 = vld [vmem:[#allocation14] sm:$0xff]  ;;  %v6849_v46 = vld [vmem:[#allocation4 + $0x18] sm:$0xff]  ;;  %v9834_v41 = vld [vmem:[%s11875_s7 + $0x160] sm:$0xff]  }
 0x6a0   : > { %8768 = vmatprep.subr.bf16.mxu1 %v9799_v1  ;;  %v6871_v35 = vrot.slane %v11706_v34, %v1729_v43  ;;  %v6857_v49 = vadd.f32 %v6849_v46, %v11589_v55  ;;  %v6879_v36 = vrot.slane %v11706_v34, %v1737_v44  ;;  %v6848_v38 = vld [vmem:[#allocation4 + $0x10] sm:$0xff]  ;;  %v6867_v48 = vrot.slane %v11706_v34, %v1725_v40  ;;  %v9818_v55 = vld [vmem:[%s11875_s7 + $0x140] sm:$0xff]   ;;  %v9823_v2 = vld [vmem:[%s11875_s7 + $0x1c8] sm:$0xff]  }
 0x6a1   : > { %v6856_v51 = vadd.f32 %v6848_v38, %v11585_v50  ;;  %v6875_v43 = vrot.slane %v11706_v34, %v1733_v58  ;;  %v9820_v40 = vld [vmem:[%s11875_s7 + $0x100] sm:$0xff]   ;;  %v9824_v3 = vld [vmem:[%s11875_s7 + $0x108] sm:$0xff]   ;;  %v9826_v14 = vld [vmem:[%s11875_s7 + $0x150] sm:$0xff]  }
 0x6a2   : > { %8747 = vmatpush3.bf16.msra.mxu0 %v9800_v16  ;;  %v6905_v57 = vadd.f32 %v6871_v35, %v6855_v54  ;;  %v6907_v44 = vadd.f32 %v6879_v36, %v6857_v49  ;;  %v6904_v42 = vadd.f32 %v6867_v48, %v6854_v47  ;;  %v9821_v58 = vld [vmem:[%s11875_s7 + $0x180] sm:$0xff]   ;;  %v9825_v4 = vld [vmem:[%s11875_s7 + $0x188] sm:$0xff]   ;;  %v9827_v52 = vld [vmem:[%s11875_s7 + $0x1d0] sm:$0xff]  }
 0x6a3   : > { %8769 = vmatpush3.bf16.msra.mxu1 %v9801_v17  ;;  %8748 = vmatprep.subr.bf16.mxu0 %v9802_v18  ;;  %v6906_v59 = vadd.f32 %v6875_v43, %v6856_v51  ;;  %v9828_v5 = vld [vmem:[%s11875_s7 + $0x110] sm:$0xff]   ;;  %v9830_v7 = vld [vmem:[%s11875_s7 + $0x158] sm:$0xff]   ;;  %v9835_v13 = vld [vmem:[%s11875_s7 + $0x1e0] sm:$0xff]  }
 0x6a4   : > { %8770 = vmatprep.subr.bf16.mxu1 %v9803_v20  ;;  %v6913_v50 = vpack.c.bf16 %v6905_v57, %v6905_v57  ;;  %v6915_v60 = vpack.c.bf16 %v6907_v44, %v6907_v44  ;;  %v6912_v26 = vpack.c.bf16 %v6904_v42, %v6904_v42  ;;  %v9829_v8 = vld [vmem:[%s11875_s7 + $0x190] sm:$0xff]   ;;  %v9831_v10 = vld [vmem:[%s11875_s7 + $0x1d8] sm:$0xff]   ;;  %v9836_v15 = vld [vmem:[%s11875_s7 + $0x120] sm:$0xff]  }
 0x6a5   : > { %v6914_v0 = vpack.c.bf16 %v6906_v59, %v6906_v59  ;;  %v9832_v11 = vld [vmem:[%s11875_s7 + $0x118] sm:$0xff]   ;;  %v9837_v1 = vld [vmem:[%s11875_s7 + $0x1a0] sm:$0xff]   ;;  %v9838_v16 = vld [vmem:[%s11875_s7 + $0x168] sm:$0xff]  }
 0x6a6   : > { %8749 = vmatpush3.bf16.msra.mxu0 %v9804_v21  ;;  %7471 = vmatprep.mubr.bf16.mxu0 %v6913_v50  ;;  %v9833_v12 = vld [vmem:[%s11875_s7 + $0x198] sm:$0xff]   ;;  %v9839_v17 = vld [vmem:[%s11875_s7 + $0x1e8] sm:$0xff]   ;;  %v9842_v21 = vld [vmem:[%s11875_s7 + $0x170] sm:$0xff]  }
 0x6a7   : > { %8771 = vmatpush3.bf16.msra.mxu1 %v9805_v56  ;;  %8750 = vmatprep.subr.bf16.mxu0 %v9806_v28  ;;  %v9840_v18 = vld [vmem:[%s11875_s7 + $0x128] sm:$0xff]   ;;  %v6886_v56 = vsub.s32 5, %v11347_v39  ;;  %v9843_v28 = vld [vmem:[%s11875_s7 + $0x1f0] sm:$0xff]   ;;  %v6853_v35 = vld [vmem:[#allocation4 + $0x38] sm:$0xff] }
 0x6a8   : > { %8772 = vmatprep.subr.bf16.mxu1 %v9807_v22  ;;  %7511 = vmatprep.mubr.bf16.mxu1 %v6915_v60  ;;  %v9841_v20 = vld [vmem:[%s11875_s7 + $0x1a8] sm:$0xff]   ;;  %v6894_v22 = vsub.s32 7, %v11347_v39  ;;  %v6850_v49 = vld [vmem:[#allocation4 + $0x20] sm:$0xff]  ;;  %v6852_v36 = vld [vmem:[#allocation4 + $0x30] sm:$0xff]  ;;  %v6861_v37 = vadd.f32 %v6853_v35, %v11597_v63 }
 0x6a9   : > { %v6858_v38 = vadd.f32 %v6850_v49, %v11591_v61  ;;  %v6860_v47 = vadd.f32 %v6852_v36, %v11593_v32  ;;  %v8602_v42 = vld [vmem:[#allocation16] ss:$0 sm:$0xff] }
 0x6aa   : > { %8751 = vmatpush3.bf16.msra.mxu0 %v9808_v23  ;;  %v9844_v23 = vld [vmem:[%s11875_s7 + $0x130] sm:$0xff]  }
 0x6ab   : > { %8773 = vmatpush3.bf16.msra.mxu1 %v9809_v24  ;;  %8752 = vmatprep.subr.bf16.mxu0 %v9810_v19  ;;  %v6882_v24 = vsub.s32 4, %v11347_v39  ;;  %v9845_v19 = vld [vmem:[%s11875_s7 + $0x1b0] sm:$0xff]  }
 0x6ac   : > { %8774 = vmatprep.subr.bf16.mxu1 %v9811_v25  ;;  %v6890_v25 = vsub.s32 6, %v11347_v39  ;;  %v9849_v39 = vld [vmem:[%s11875_s7 + $0x1b8] sm:$0xff]  }
 0x6ad   : > { %v6883_v33 = vrot.slane %v11706_v34, %v6882_v24 }
 0x6ae   : > { %8753 = vmatpush3.bf16.msra.mxu0 %v9812_v27  ;;  %v9846_v27 = vld [vmem:[%s11875_s7 + $0x178] sm:$0xff]   ;;  %v6891_v46 = vrot.slane %v11706_v34, %v6890_v25 }
 0x6af   : > { %8775 = vmatpush3.bf16.msra.mxu1 %v9813_v29  ;;  %8754 = vmatprep.subr.bf16.mxu0 %v9814_v30  ;;  %v9847_v29 = vld [vmem:[%s11875_s7 + $0x1f8] sm:$0xff]   ;;  %v6908_v43 = vadd.f32 %v6883_v33, %v6858_v38 }
 0x6b0   : > { %8776 = vmatprep.subr.bf16.mxu1 %v9815_v53  ;;  %v9848_v30 = vld [vmem:[%s11875_s7 + $0x138] sm:$0xff]   ;;  %v6887_v53 = vrot.slane %v11706_v34, %v6886_v56 }
 0x6b1   : > { %v6916_v44 = vpack.c.bf16 %v6908_v43, %v6908_v43 }
 0x6b2   : > { %8755 = vmatpush3.bf16.msra.mxu0 %v9816_v9  ;;  %v6851_v9 = vld [vmem:[#allocation4 + $0x28] sm:$0xff] }
 0x6b3   : > { %8777 = vmatpush3.bf16.msra.mxu1 %v9817_v31  ;;  %8784 = vmatprep.subr.bf16.mxu0 %v9818_v55  ;;  %v6895_v31 = vrot.slane %v11706_v34, %v6894_v22  ;;  %v6859_v54 = vadd.f32 %v6851_v9, %v11595_v62  ;;  %v6910_v55 = vadd.f32 %v6891_v46, %v6860_v47 }
 0x6b4   : > { %8806 = vmatprep.subr.bf16.mxu1 %v9819_v45 }
 0x6b5   : > { %7472 = vmatmul.mubr.bf16.vlgmr.msra.gmra.mrb[0].mxu0 %v6912_v26  ;;  %v6909_v48 = vadd.f32 %v6887_v53, %v6859_v54  ;;  %v6911_v51 = vadd.f32 %v6895_v31, %v6861_v37  ;;  %v6918_v45 = vpack.c.bf16 %v6910_v55, %v6910_v55 }
 0x6b6   : > { %7512 = vmatmul.mubr.bf16.vlgmr.msra.gmra.mrb[0].mxu1 %v6914_v0  ;;  %8785 = vmatpush3.bf16.msra.mxu0 %v9820_v40 }
 0x6b7   : > { %8807 = vmatpush3.bf16.msra.mxu1 %v9821_v58  ;;  %8786 = vmatprep.subr.bf16.mxu0 %v9822_v6  ;;  %v6917_v34 = vpack.c.bf16 %v6909_v48, %v6909_v48  ;;  %v6919_v57 = vpack.c.bf16 %v6911_v51, %v6911_v51 }
 0x6b8   : > { %8808 = vmatprep.subr.bf16.mxu1 %v9823_v2 }
 0x6b9   : > { %7551 = vmatprep.mubr.bf16.mxu0 %v6917_v34  ;;  %7591 = vmatprep.mubr.bf16.mxu1 %v6919_v57 }
 0x6ba   : > { %8787 = vmatpush3.bf16.msra.mxu0 %v9824_v3 }
 0x6bb   : > { %8809 = vmatpush3.bf16.msra.mxu1 %v9825_v4  ;;  %8788 = vmatprep.subr.bf16.mxu0 %v9826_v14 }
 0x6bc   : > { %8810 = vmatprep.subr.bf16.mxu1 %v9827_v52 }
 0x6be   : > { %8789 = vmatpush3.bf16.msra.mxu0 %v9828_v5 }
 0x6bf   : > { %8811 = vmatpush3.bf16.msra.mxu1 %v9829_v8  ;;  %8790 = vmatprep.subr.bf16.mxu0 %v9830_v7 }
 0x6c0   : > { %8812 = vmatprep.subr.bf16.mxu1 %v9831_v10 }
 0x6c2   : > { %8791 = vmatpush3.bf16.msra.mxu0 %v9832_v11 }
 0x6c3   : > { %8813 = vmatpush3.bf16.msra.mxu1 %v9833_v12  ;;  %8792 = vmatprep.subr.bf16.mxu0 %v9834_v41 }
 0x6c4   : > { %8814 = vmatprep.subr.bf16.mxu1 %v9835_v13 }
 0x6c6   : > { %8793 = vmatpush3.bf16.msra.mxu0 %v9836_v15 }
 0x6c7   : > { %8815 = vmatpush3.bf16.msra.mxu1 %v9837_v1  ;;  %8794 = vmatprep.subr.bf16.mxu0 %v9838_v16 }
 0x6c8   : > { %8816 = vmatprep.subr.bf16.mxu1 %v9839_v17 }
 0x6ca   : > { %8795 = vmatpush3.bf16.msra.mxu0 %v9840_v18 }
 0x6cb   : > { %8817 = vmatpush3.bf16.msra.mxu1 %v9841_v20  ;;  %8796 = vmatprep.subr.bf16.mxu0 %v9842_v21 }
 0x6cc   : > { %8818 = vmatprep.subr.bf16.mxu1 %v9843_v28 }
 0x6ce   : > { %8797 = vmatpush3.bf16.msra.mxu0 %v9844_v23 }
 0x6cf   : > { %8819 = vmatpush3.bf16.msra.mxu1 %v9845_v19  ;;  %8798 = vmatprep.subr.bf16.mxu0 %v9846_v27 }
 0x6d0   : > { %8820 = vmatprep.subr.bf16.mxu1 %v9847_v29 }
 0x6d2   : > { %8799 = vmatpush3.bf16.msra.mxu0 %v9848_v30 }
 0x6d3   : > { %8821 = vmatpush3.bf16.msra.mxu1 %v9849_v39 }
 0x6d5   : > { %7552 = vmatmul.mubr.bf16.vlgmr.msra.gmra.mrb[4].mxu0 %v6916_v44 }
 0x6d6   : > { %7592 = vmatmul.mubr.bf16.vlgmr.msra.gmra.mrb[4].mxu1 %v6918_v45 }
 0x788   : > { %v8756_v62 = vpop.f32.mrb[0].mxu0 }
 0x789   : > { %v8778_v63 = vpop.f32.mrb[0].mxu1  ;;  %v8757_v61 = vpop.f32.mrb[1].mxu0 }
 0x78a   : > { %v8779_v59 = vpop.f32.mrb[1].mxu1  ;;  %v8758_v32 = vadd.f32 %v8757_v61, %v8756_v62  ;;  %v8759_v50 = vpop.f32.mrb[2].mxu0 }
 0x78b   : > { %v8780_v40 = vadd.f32 %v8779_v59, %v8778_v63  ;;  %v8781_v60 = vpop.f32.mrb[2].mxu1  ;;  %v8760_v58 = vpop.f32.mrb[3].mxu0 }
 0x78c   : > { %v8782_v26 = vpop.f32.mrb[3].mxu1  ;;  %v7474_v0 = vadd.f32 %v8758_v32, %v8602_v42 }
 0x78e   : > { %v7514_v6 = vadd.f32 %v8780_v40, %v7474_v0 }
 0x7a8   : > { %v8800_v2 = vpop.f32.mrb[4].mxu0 }
 0x7a9   : > { %v8822_v3 = vpop.f32.mrb[4].mxu1  ;;  %v8801_v4 = vpop.f32.mrb[5].mxu0 }
 0x7aa   : > { %v8802_v14 = vadd.f32 %v8801_v4, %v8800_v2  ;;  %v8823_v52 = vpop.f32.mrb[5].mxu1  ;;  %v8803_v5 = vpop.f32.mrb[6].mxu0 }
 0x7ab   : > { %v8824_v8 = vadd.f32 %v8823_v52, %v8822_v3  ;;  %v8825_v7 = vpop.f32.mrb[6].mxu1  ;;  %v8804_v10 = vpop.f32.mrb[7].mxu0 }
 0x7ac   : > { %v7554_v11 = vadd.f32 %v8802_v14, %v7514_v6  ;;  %v8826_v12 = vpop.f32.mrb[7].mxu1 }
 0x7ae   : > { %v7594_v41 = vadd.f32 %v8824_v8, %v7554_v11 }
 0x7b0   : > { %7600 = vst.msk [vmem:[#allocation17] sm:$0x3] %vm7599_vm4, %v7594_v41 }
 0x7b1 PF: > { %p8954_p3 = scmp.eq.s32.totalorder %s10221_s13, 1  ;;  %s10151_s14 = smov [#allocation17]  }
 0x7b2   : > { %s7608_s20 = sshll.u32 %s10151_s14, 4  ;;  %s7609_s20 = int_to_ptr.vmem [resolvable:$true] %s7608_s20 }
 0x7b3   : > { %s10056_s26 = scalar_lea.vmem %s7609_s20, 32  ;;  %p10063_p4 = scmp.lt.s32.totalorder %s7609_s20, %s7609_s20 }
 0x7b4   : > { %p10057_p13 = scmp.ne.s32.totalorder %s7609_s20, %s10056_s26  ;;  %p10064_p0 = scmp.lt.s32.totalorder %s10056_s26, %s10056_s26 }
 0x7b6   : > { %p10058_p1 = pnand %p10057_p13, %p8954_p3  ;;  %p10065_p9 = por %p10064_p0, %p10063_p4 }
 0x7b8   : > { %p10059_p2 = pneg %p10058_p1 }
 0x7ba   : > { %p10066_p6 = pnand %p10065_p9, %p10059_p2 }
 0x7bc   : > { %10069 = shalt.err (!%p10066_p6)
}
 0x7bd   : > { %s10070_s25 = scalar_lea.hbm %s11877_s9, 32 }
 0x7be   : > { %p10071_p11 = scmp.ne.s32.totalorder %s11877_s9, %s10070_s25  ;;  %p10076_p12 = scmp.lt.u32.totalorder %s10070_s25, %s11877_s9 }
 0x7c0   : > { %p10072_p8 = pnand %p10071_p11, %p8954_p3 }
 0x7c2   : > { %p10073_p7 = pneg %p10072_p8 }
 0x7c4   : > { %p10078_p5 = pnand %p10076_p12, %p10073_p7 }
 0x7c6   : > { %10081 = shalt.err (!%p10078_p5)
}
 0x7c7   : > { %8923 = dma.vmem_to_hbm [thread:$0]  (%p8954_p3), %s7609_s20, 32, %s11877_s9, [#allocation7]  }
 0x7c8   : > { %10115 = dma.done.wait (%p8954_p3), [#allocation7], 32  }
 0x7c9   : > { %10117 = vsyncadd (%p8954_p3), [#allocation7], 4294967264 }
 0x7ca PF: > { %s11918_s12 = sld [smem:[#allocation24_spill]]  ;;  %s11919_s18 = sld [smem:[#allocation23_spill]] }
 0x7cb   : > { %s11920_s11 = sld [smem:[#allocation25_spill]]  ;;  %s11921_s30 = smov %s10124_s10 }
 0x7d0   : > { %p27_p10 = scmp.ge.s32.totalorder %s11918_s12, 4   ;;  %s11922_s10 = smov %s11919_s18 }
 0x7d2   :  { %29 = sbr.rel (!%p27_p10) target bundleno = 12 (0xc), region = 166 }
 0x7d9   :  { %7621 = vsyncpa [#allocation6], 1 }
 0x7da   :  { %7623 = vsyncpa [#allocation6 + $0x1], 1 }
 0x7db   :  { %7624 = vsyncpa [#allocation9], 1 }
 0x7dc   :  { %7626 = vsyncpa [#allocation9 + $0x1], 1 }
 0x7dd   :  { %7627 = vsyncpa [#allocation12], 1 }
 0x7de   :  { %7629 = vsyncpa [#allocation12 + $0x1], 1 }
 0x7df   :  { %7630 = vsyncpa [#allocation15], 1 }
 0x7e0   :  { %7631 = vsyncpa [#allocation7], 1 }
 0x7e1   :  { %7633 = vsyncpa [#allocation7 + $0x1], 1 }

</bundles_post_ra>
